<compile_context>
chip_gen: v7x
topology: tpu7x:2x2x1
jax: 0.10.0
libtpu: 0.0.40
codegen_flags: <defaults>
</compile_context>

<pallas_src>
import jax
import jax.numpy as jnp
import numpy as np
from jax.experimental import pallas as pl
from jax.experimental.pallas import tpu as pltpu

NB_MAX = 128                       # images per grid step (all TPU generations)
VMEM_LIMIT_BYTES = 32 * 1024 * 1024


def _cdiv(a, b):
    return (a + b - 1) // b


def _round_up(a, b):
    return _cdiv(a, b) * b


def _pick_batch_block(n):
    """(padded_n, block, num_blocks): block is a multiple of 8, padding waste
    is small, and there are >=2 grid steps whenever the batch allows (keeps
    both v7x TensorCores busy; harmless on single-core v5e/v6e)."""
    n_pad = _round_up(max(n, 8), 8)
    min_blocks = 2 if n_pad >= 16 else 1
    nblocks = max(min_blocks, _cdiv(n_pad, NB_MAX))
    nb = _round_up(_cdiv(n_pad, nblocks), 8)
    nblocks = _cdiv(n_pad, nb)
    return nb * nblocks, nb, nblocks


# ---------------------------------------------------------------------------
# Fused kernel: conv1+pool -> conv2+pool -> lin1 -> lin2 -> lin3 (all + ReLU)
# ---------------------------------------------------------------------------
def _lenet5_fused_kernel(x16_ref, w1_ref, b1_ref, w2_ref, b2_ref,
                         wl1_ref, bl1_ref, wl2_ref, bl2_ref, wl3_ref, bl3_ref,
                         out_ref):
    nb = out_ref.shape[0]                       # images in this batch block
    f32 = jnp.float32
    # (5, NB, 512) -> (5*NB, 512); rows ordered ph2-major within the block.
    lhs1 = x16_ref[...].reshape(5 * nb, 512)
    b1 = b1_ref[...]

    def pool4(y):  # max over the four 2x2-pool offsets (128-lane groups)
        return jnp.maximum(jnp.maximum(y[:, 0:128], y[:, 128:256]),
                           jnp.maximum(y[:, 256:384], y[:, 384:512]))

    # conv1 (5x5, pad 2) + ReLU + 2x2 max-pool, emitted once per conv2 row
    # window j (pooled conv1 row 2*ph2 + j); bias/ReLU hoisted after the max.
    parts = []
    for j in range(6):
        y = jnp.dot(lhs1, w1_ref[:, j * 512:(j + 1) * 512],
                    preferred_element_type=f32)                      # (5NB, 512)
        parts.append(jnp.maximum(pool4(y) + b1, 0.0).astype(jnp.bfloat16))
    lhs2 = jnp.concatenate(parts, axis=1)                            # (5NB, 768)

    # conv2 (5x5, no pad) + ReLU + 2x2 max-pool.
    y2 = jnp.dot(lhs2, w2_ref[...], preferred_element_type=f32)      # (5NB, 512)
    a2 = jnp.maximum(pool4(y2) + b2_ref[...], 0.0).astype(jnp.bfloat16)

    # Gather each image's 5 pooled rows into one 640-lane row; PyTorch's NCHW
    # flatten order is folded into wl1's row layout.
    lhs3 = jnp.concatenate([a2[j * nb:(j + 1) * nb, :] for j in range(5)],
                           axis=1)                                    # (NB, 640)

    h = jnp.maximum(jnp.dot(lhs3, wl1_ref[...], preferred_element_type=f32)
                    + bl1_ref[...], 0.0)
    h = jnp.maximum(jnp.dot(h.astype(jnp.bfloat16), wl2_ref[...],
                            preferred_element_type=f32) + bl2_ref[...], 0.0)
    h = jnp.maximum(jnp.dot(h.astype(jnp.bfloat16), wl3_ref[...],
                            preferred_element_type=f32) + bl3_ref[...], 0.0)
    out_ref[...] = h.astype(out_ref.dtype)                            # (NB, 128)


# ---------------------------------------------------------------------------
# Wrapper-side layout glue (cheap; no im2col blow-up)
# ---------------------------------------------------------------------------
def _prep_input(x_nchw, n_pad):
    """Raw NCHW images -> (5, n_pad, 512) bf16: for each image, the five
    overlapping 16-row windows of the zero-padded 32x32 image (one window per
    pooled conv2 row ph2)."""
    n = x_nchw.shape[0]
    x = x_nchw.reshape(n, 28, 28).astype(jnp.bfloat16)
    x = jnp.pad(x, ((0, n_pad - n), (2, 2), (2, 2)))                 # (n_pad,32,32)
    x16 = jnp.stack([x[:, 4 * j:4 * j + 16, :] for j in range(5)], axis=0)
    return x16.reshape(5, n_pad, 512)


@jax.jit
def lenet5_forward(prepped, x_nchw):
    # q=False path of the PyTorch module (QuantStub/DeQuantStub are no-ops).
    n = x_nchw.shape[0]
    n_pad, nb, nblocks = _pick_batch_block(n)
    x16 = _prep_input(x_nchw, n_pad)

    weights = (prepped["w1pool"], prepped["b1row"], prepped["w2pool"],
               prepped["b2row"], prepped["w1lin"], prepped["b1lin"],
               prepped["w2lin"], prepped["b2lin"], prepped["w3lin"],
               prepped["b3lin"])
    flops = 2 * n_pad * (5 * 512 * 3072 + 5 * 768 * 512
                         + 640 * 128 + 2 * 128 * 128)
    bytes_accessed = (x16.size * x16.dtype.itemsize
                      + sum(int(w.size) * w.dtype.itemsize for w in weights)
                      + n_pad * 128 * 2)

    out = pl.pallas_call(
        _lenet5_fused_kernel,
        out_shape=jax.ShapeDtypeStruct((n_pad, 128), jnp.bfloat16),
        grid_spec=pltpu.PrefetchScalarGridSpec(
            num_scalar_prefetch=0,
            grid=(nblocks,),
            in_specs=[
                pl.BlockSpec((5, nb, 512), lambda i: (0, i, 0)),   # image block
                pl.BlockSpec((512, 3072), lambda i: (0, 0)),       # conv1+pool
                pl.BlockSpec((1, 128), lambda i: (0, 0)),
                pl.BlockSpec((768, 512), lambda i: (0, 0)),        # conv2+pool
                pl.BlockSpec((1, 128), lambda i: (0, 0)),
                pl.BlockSpec((640, 128), lambda i: (0, 0)),        # lin1
                pl.BlockSpec((1, 128), lambda i: (0, 0)),
                pl.BlockSpec((128, 128), lambda i: (0, 0)),        # lin2
                pl.BlockSpec((1, 128), lambda i: (0, 0)),
                pl.BlockSpec((128, 128), lambda i: (0, 0)),        # lin3
                pl.BlockSpec((1, 128), lambda i: (0, 0)),
            ],
            out_specs=pl.BlockSpec((nb, 128), lambda i: (i, 0)),
        ),
        compiler_params=pltpu.CompilerParams(
            dimension_semantics=("parallel",),
            vmem_limit_bytes=VMEM_LIMIT_BYTES),
        cost_estimate=pl.CostEstimate(flops=flops, transcendentals=0,
                                      bytes_accessed=bytes_accessed),
    )(x16, *weights)
    return out[:n, :10].astype(jnp.float32)


# ---------------------------------------------------------------------------
# Parameters (deterministic synthetic init; shapes match the PyTorch module)
# ---------------------------------------------------------------------------
def init_params(key):
    ks = jax.random.split(key, 10)

    def w(k, shape, scale):
        return jax.random.normal(k, shape, jnp.float32) * scale

    return {
        "conv1_w": w(ks[0], (6, 1, 5, 5), 0.1),
        "conv1_b": w(ks[1], (6,), 0.1),
        "conv2_w": w(ks[2], (16, 6, 5, 5), 0.05),
        "conv2_b": w(ks[3], (16,), 0.05),
        "lin1_w": w(ks[4], (120, 400), 0.05),
        "lin1_b": w(ks[5], (120,), 0.05),
        "lin2_w": w(ks[6], (84, 120), 0.05),
        "lin2_b": w(ks[7], (84,), 0.05),
        "lin3_w": w(ks[8], (10, 84), 0.1),
        "lin3_b": w(ks[9], (10,), 0.1),
    }


def prepare_params(params):
    """One-time host-side prep: fold conv windowing, the four 2x2-pool offsets
    and the NCHW flatten into sparse, lane-dense bf16 matmul weights."""
    w1 = np.asarray(params["conv1_w"], np.float32)    # (6, 1, 5, 5)
    b1 = np.asarray(params["conv1_b"], np.float32)
    w2 = np.asarray(params["conv2_w"], np.float32)    # (16, 6, 5, 5)
    b2 = np.asarray(params["conv2_b"], np.float32)
    l1w = np.asarray(params["lin1_w"], np.float32)    # (120, 400)
    l1b = np.asarray(params["lin1_b"], np.float32)
    l2w = np.asarray(params["lin2_w"], np.float32)    # (84, 120)
    l2b = np.asarray(params["lin2_b"], np.float32)
    l3w = np.asarray(params["lin3_w"], np.float32)    # (10, 84)
    l3b = np.asarray(params["lin3_b"], np.float32)

    pw = np.arange(14)
    cc = np.arange(6)
    c2i = np.arange(16)

    # conv1+pool: rows = flattened 16x32 window (rr*32 + wc) of the padded
    # image (window ph2 starts at padded row 4*ph2); cols = j*512 + o*128 +
    # pw*6 + c == pre-pool conv1 output at (2*(2*ph2+j)+dh, 2*pw+dw, c).
    w1pool = np.zeros((512, 6 * 4 * 128), np.float32)
    for j in range(6):
        for dh in range(2):
            for dw in range(2):
                o = 2 * dh + dw
                for kh in range(5):
                    rr = 2 * j + dh + kh
                    for kw in range(5):
                        rows = rr * 32 + 2 * pw + dw + kw               # (14,)
                        cols = (j * 512 + o * 128
                                + pw[:, None] * 6 + cc[None, :])        # (14,6)
                        w1pool[rows[:, None], cols] = w1[:, 0, kh, kw][None, :]

    # conv2+pool: rows = j*128 + pw*6 + c over the 6 pooled conv1 rows held in
    # lhs2; cols = (2*dh2+dw2)*128 + pw2*16 + c2.
    w2pool = np.zeros((768, 512), np.float32)
    for dh2 in range(2):
        for dw2 in range(2):
            o2 = 2 * dh2 + dw2
            for kh in range(5):
                j = dh2 + kh
                for kw in range(5):
                    for pw2 in range(5):
                        pwi = 2 * pw2 + dw2 + kw
                        rows = j * 128 + pwi * 6 + cc                    # (6,)
                        cols = o2 * 128 + pw2 * 16 + c2i                 # (16,)
                        w2pool[rows[:, None], cols[None, :]] = w2[:, :, kh, kw].T

    b1row = np.zeros((1, 128), np.float32)
    b1row[0, (pw[:, None] * 6 + cc[None, :]).ravel()] = np.tile(b1, 14)
    b2row = np.zeros((1, 128), np.float32)
    b2row[0, (np.arange(5)[:, None] * 16 + c2i[None, :]).ravel()] = np.tile(b2, 5)

    # lin1: kernel row ph2*128 + pw2*16 + c2 <-> torch in-feature c2*25+ph2*5+pw2.
    w1lin = np.zeros((640, 128), np.float32)
    for ph2 in range(5):
        for pw2 in range(5):
            for c2 in range(16):
                w1lin[ph2 * 128 + pw2 * 16 + c2, :120] = \
                    l1w[:, c2 * 25 + ph2 * 5 + pw2]
    b1lin = np.zeros((1, 128), np.float32); b1lin[0, :120] = l1b
    w2lin = np.zeros((128, 128), np.float32); w2lin[:120, :84] = l2w.T
    b2lin = np.zeros((1, 128), np.float32); b2lin[0, :84] = l2b
    w3lin = np.zeros((128, 128), np.float32); w3lin[:84, :10] = l3w.T
    b3lin = np.zeros((1, 128), np.float32); b3lin[0, :10] = l3b

    bf16 = jnp.bfloat16
    return {
        "w1pool": jnp.asarray(w1pool, dtype=bf16), "b1row": jnp.asarray(b1row),
        "w2pool": jnp.asarray(w2pool, dtype=bf16), "b2row": jnp.asarray(b2row),
        "w1lin": jnp.asarray(w1lin, dtype=bf16), "b1lin": jnp.asarray(b1lin),
        "w2lin": jnp.asarray(w2lin, dtype=bf16), "b2lin": jnp.asarray(b2lin),
        "w3lin": jnp.asarray(w3lin, dtype=bf16), "b3lin": jnp.asarray(b3lin),
    }


# ---------------------------------------------------------------------------
# Pure-JAX reference (same bf16 quantization points) for a numeric self-check
# ---------------------------------------------------------------------------
def reference_forward(params, x_nchw):
    bf16, f32 = jnp.bfloat16, jnp.float32

    def conv_block(x, w, b, pad):
        y = jax.lax.conv_general_dilated(
            x.astype(bf16), w.astype(bf16), (1, 1), [(pad, pad), (pad, pad)],
            dimension_numbers=("NCHW", "OIHW", "NCHW"),
            preferred_element_type=f32)
        y = jnp.maximum(y + b.reshape(1, -1, 1, 1), 0.0)
        n, c, h, wd = y.shape
        y = y.reshape(n, c, h // 2, 2, wd // 2, 2).max(axis=(3, 5))
        return y.astype(bf16)

    def lin_block(h, w, b):
        y = jnp.dot(h.astype(bf16), w.astype(bf16).T,
                    preferred_element_type=f32) + b
        return jnp.maximum(y, 0.0).astype(bf16)

    a = conv_block(x_nchw.astype(bf16), params["conv1_w"], params["conv1_b"], 2)
    a = conv_block(a, params["conv2_w"], params["conv2_b"], 0)
    h = a.reshape(a.shape[0], -1)
    h = lin_block(h, params["lin1_w"], params["lin1_b"])
    h = lin_block(h, params["lin2_w"], params["lin2_b"])
    h = lin_block(h, params["lin3_w"], params["lin3_b"])
    return h.astype(f32)


if __name__ == "__main__":
    key = jax.random.PRNGKey(0)
    pkey, xkey = jax.random.split(key)
    params = init_params(pkey)
    prepped = prepare_params(params)
    # LeNet5's Linear(400, 120) implies 28x28 single-channel inputs.
    x = jax.random.normal(xkey, (2, 1, 28, 28), jnp.float32)
    out = jax.block_until_ready(lenet5_forward(prepped, x))
    assert out.shape == (2, 10) and out.dtype == jnp.float32
    assert bool(jnp.all(out >= 0.0))          # module ends with ReLU
    ref = jax.block_until_ready(reference_forward(params, x))
    err = float(jnp.max(jnp.abs(out - ref)))
    assert err < 2e-2, f"kernel/reference mismatch: max abs err {err}"
    print("KERNEL_OK")
</pallas_src>

<mosaic_0001>
module attributes {stable_mosaic.version = 11 : i64} {
  func.func @_lenet5_fused_kernel(%arg0: i32, %arg1: memref<5x8x512xbf16, #tpu.memory_space<vmem>>, %arg2: memref<512x3072xbf16, #tpu.memory_space<vmem>>, %arg3: memref<1x128xf32, #tpu.memory_space<vmem>>, %arg4: memref<768x512xbf16, #tpu.memory_space<vmem>>, %arg5: memref<1x128xf32, #tpu.memory_space<vmem>>, %arg6: memref<640x128xbf16, #tpu.memory_space<vmem>>, %arg7: memref<1x128xf32, #tpu.memory_space<vmem>>, %arg8: memref<128x128xbf16, #tpu.memory_space<vmem>>, %arg9: memref<1x128xf32, #tpu.memory_space<vmem>>, %arg10: memref<128x128xbf16, #tpu.memory_space<vmem>>, %arg11: memref<1x128xf32, #tpu.memory_space<vmem>>, %arg12: memref<8x128xbf16, #tpu.memory_space<vmem>>) attributes {dimension_semantics = [#tpu.dimension_semantics<parallel>], iteration_bounds = array<i64: 1>, scalar_prefetch = 0 : i64, scratch_operands = 0 : i64, tpu.core_type = #tpu.core_type<tc>, window_params = [{transform_indices = @transform_0, window_bounds = array<i64: 5, 8, 512>}, {pipeline_mode = #tpu.pipeline_mode<synchronous>, transform_indices = @transform_1, window_bounds = array<i64: 512, 3072>}, {pipeline_mode = #tpu.pipeline_mode<synchronous>, transform_indices = @transform_2, window_bounds = array<i64: 1, 128>}, {pipeline_mode = #tpu.pipeline_mode<synchronous>, transform_indices = @transform_3, window_bounds = array<i64: 768, 512>}, {pipeline_mode = #tpu.pipeline_mode<synchronous>, transform_indices = @transform_4, window_bounds = array<i64: 1, 128>}, {pipeline_mode = #tpu.pipeline_mode<synchronous>, transform_indices = @transform_5, window_bounds = array<i64: 640, 128>}, {pipeline_mode = #tpu.pipeline_mode<synchronous>, transform_indices = @transform_6, window_bounds = array<i64: 1, 128>}, {pipeline_mode = #tpu.pipeline_mode<synchronous>, transform_indices = @transform_7, window_bounds = array<i64: 128, 128>}, {pipeline_mode = #tpu.pipeline_mode<synchronous>, transform_indices = @transform_8, window_bounds = array<i64: 1, 128>}, {pipeline_mode = #tpu.pipeline_mode<synchronous>, transform_indices = @transform_9, window_bounds = array<i64: 128, 128>}, {pipeline_mode = #tpu.pipeline_mode<synchronous>, transform_indices = @transform_10, window_bounds = array<i64: 1, 128>}, {transform_indices = @transform_11, window_bounds = array<i64: 8, 128>}]} {
    %c0 = arith.constant 0 : index
    %c0_0 = arith.constant 0 : index
    %c0_1 = arith.constant 0 : index
    %0 = vector.load %arg1[%c0, %c0_0, %c0_1] : memref<5x8x512xbf16, #tpu.memory_space<vmem>>, vector<5x8x512xbf16>
    %1 = vector.shape_cast %0 : vector<5x8x512xbf16> to vector<40x512xbf16>
    %c0_2 = arith.constant 0 : index
    %c0_3 = arith.constant 0 : index
    %2 = vector.load %arg3[%c0_2, %c0_3] : memref<1x128xf32, #tpu.memory_space<vmem>>, vector<1x128xf32>
    %c0_4 = arith.constant 0 : index
    %c0_5 = arith.constant 0 : index
    %3 = vector.load %arg2[%c0_4, %c0_5] : memref<512x3072xbf16, #tpu.memory_space<vmem>>, vector<512x512xbf16>
    %cst = arith.constant dense<0.000000e+00> : vector<40x512xf32>
    %4 = tpu.matmul %1, %3, %cst {dimension_numbers = #tpu.dot_dimension_numbers<[1], [0], [0], [1], [0, 0, 1, 1], [], []>} : vector<40x512xbf16>, vector<512x512xbf16>, vector<40x512xf32> -> vector<40x512xf32>
    %5 = vector.extract_strided_slice %4 {offsets = [0, 0], sizes = [40, 128], strides = [1, 1]} : vector<40x512xf32> to vector<40x128xf32>
    %6 = vector.extract_strided_slice %4 {offsets = [0, 128], sizes = [40, 128], strides = [1, 1]} : vector<40x512xf32> to vector<40x128xf32>
    %7 = arith.maximumf %5, %6 : vector<40x128xf32>
    %8 = vector.extract_strided_slice %4 {offsets = [0, 256], sizes = [40, 128], strides = [1, 1]} : vector<40x512xf32> to vector<40x128xf32>
    %9 = vector.extract_strided_slice %4 {offsets = [0, 384], sizes = [40, 128], strides = [1, 1]} : vector<40x512xf32> to vector<40x128xf32>
    %10 = arith.maximumf %8, %9 : vector<40x128xf32>
    %11 = arith.maximumf %7, %10 : vector<40x128xf32>
    %12 = vector.broadcast %2 : vector<1x128xf32> to vector<40x128xf32>
    %13 = arith.addf %11, %12 : vector<40x128xf32>
    %cst_6 = arith.constant 0.000000e+00 : f32
    %14 = vector.broadcast %cst_6 : f32 to vector<40x128xf32>
    %15 = arith.maximumf %13, %14 : vector<40x128xf32>
    %16 = arith.truncf %15 : vector<40x128xf32> to vector<40x128xbf16>
    %c0_7 = arith.constant 0 : index
    %c512 = arith.constant 512 : index
    %17 = vector.load %arg2[%c0_7, %c512] : memref<512x3072xbf16, #tpu.memory_space<vmem>>, vector<512x512xbf16>
    %cst_8 = arith.constant dense<0.000000e+00> : vector<40x512xf32>
    %18 = tpu.matmul %1, %17, %cst_8 {dimension_numbers = #tpu.dot_dimension_numbers<[1], [0], [0], [1], [0, 0, 1, 1], [], []>} : vector<40x512xbf16>, vector<512x512xbf16>, vector<40x512xf32> -> vector<40x512xf32>
    %19 = vector.extract_strided_slice %18 {offsets = [0, 0], sizes = [40, 128], strides = [1, 1]} : vector<40x512xf32> to vector<40x128xf32>
    %20 = vector.extract_strided_slice %18 {offsets = [0, 128], sizes = [40, 128], strides = [1, 1]} : vector<40x512xf32> to vector<40x128xf32>
    %21 = arith.maximumf %19, %20 : vector<40x128xf32>
    %22 = vector.extract_strided_slice %18 {offsets = [0, 256], sizes = [40, 128], strides = [1, 1]} : vector<40x512xf32> to vector<40x128xf32>
    %23 = vector.extract_strided_slice %18 {offsets = [0, 384], sizes = [40, 128], strides = [1, 1]} : vector<40x512xf32> to vector<40x128xf32>
    %24 = arith.maximumf %22, %23 : vector<40x128xf32>
    %25 = arith.maximumf %21, %24 : vector<40x128xf32>
    %26 = vector.broadcast %2 : vector<1x128xf32> to vector<40x128xf32>
    %27 = arith.addf %25, %26 : vector<40x128xf32>
    %cst_9 = arith.constant 0.000000e+00 : f32
    %28 = vector.broadcast %cst_9 : f32 to vector<40x128xf32>
    %29 = arith.maximumf %27, %28 : vector<40x128xf32>
    %30 = arith.truncf %29 : vector<40x128xf32> to vector<40x128xbf16>
    %c0_10 = arith.constant 0 : index
    %c1024 = arith.constant 1024 : index
    %31 = vector.load %arg2[%c0_10, %c1024] : memref<512x3072xbf16, #tpu.memory_space<vmem>>, vector<512x512xbf16>
    %cst_11 = arith.constant dense<0.000000e+00> : vector<40x512xf32>
    %32 = tpu.matmul %1, %31, %cst_11 {dimension_numbers = #tpu.dot_dimension_numbers<[1], [0], [0], [1], [0, 0, 1, 1], [], []>} : vector<40x512xbf16>, vector<512x512xbf16>, vector<40x512xf32> -> vector<40x512xf32>
    %33 = vector.extract_strided_slice %32 {offsets = [0, 0], sizes = [40, 128], strides = [1, 1]} : vector<40x512xf32> to vector<40x128xf32>
    %34 = vector.extract_strided_slice %32 {offsets = [0, 128], sizes = [40, 128], strides = [1, 1]} : vector<40x512xf32> to vector<40x128xf32>
    %35 = arith.maximumf %33, %34 : vector<40x128xf32>
    %36 = vector.extract_strided_slice %32 {offsets = [0, 256], sizes = [40, 128], strides = [1, 1]} : vector<40x512xf32> to vector<40x128xf32>
    %37 = vector.extract_strided_slice %32 {offsets = [0, 384], sizes = [40, 128], strides = [1, 1]} : vector<40x512xf32> to vector<40x128xf32>
    %38 = arith.maximumf %36, %37 : vector<40x128xf32>
    %39 = arith.maximumf %35, %38 : vector<40x128xf32>
    %40 = vector.broadcast %2 : vector<1x128xf32> to vector<40x128xf32>
    %41 = arith.addf %39, %40 : vector<40x128xf32>
    %cst_12 = arith.constant 0.000000e+00 : f32
    %42 = vector.broadcast %cst_12 : f32 to vector<40x128xf32>
    %43 = arith.maximumf %41, %42 : vector<40x128xf32>
    %44 = arith.truncf %43 : vector<40x128xf32> to vector<40x128xbf16>
    %c0_13 = arith.constant 0 : index
    %c1536 = arith.constant 1536 : index
    %45 = vector.load %arg2[%c0_13, %c1536] : memref<512x3072xbf16, #tpu.memory_space<vmem>>, vector<512x512xbf16>
    %cst_14 = arith.constant dense<0.000000e+00> : vector<40x512xf32>
    %46 = tpu.matmul %1, %45, %cst_14 {dimension_numbers = #tpu.dot_dimension_numbers<[1], [0], [0], [1], [0, 0, 1, 1], [], []>} : vector<40x512xbf16>, vector<512x512xbf16>, vector<40x512xf32> -> vector<40x512xf32>
    %47 = vector.extract_strided_slice %46 {offsets = [0, 0], sizes = [40, 128], strides = [1, 1]} : vector<40x512xf32> to vector<40x128xf32>
    %48 = vector.extract_strided_slice %46 {offsets = [0, 128], sizes = [40, 128], strides = [1, 1]} : vector<40x512xf32> to vector<40x128xf32>
    %49 = arith.maximumf %47, %48 : vector<40x128xf32>
    %50 = vector.extract_strided_slice %46 {offsets = [0, 256], sizes = [40, 128], strides = [1, 1]} : vector<40x512xf32> to vector<40x128xf32>
    %51 = vector.extract_strided_slice %46 {offsets = [0, 384], sizes = [40, 128], strides = [1, 1]} : vector<40x512xf32> to vector<40x128xf32>
    %52 = arith.maximumf %50, %51 : vector<40x128xf32>
    %53 = arith.maximumf %49, %52 : vector<40x128xf32>
    %54 = vector.broadcast %2 : vector<1x128xf32> to vector<40x128xf32>
    %55 = arith.addf %53, %54 : vector<40x128xf32>
    %cst_15 = arith.constant 0.000000e+00 : f32
    %56 = vector.broadcast %cst_15 : f32 to vector<40x128xf32>
    %57 = arith.maximumf %55, %56 : vector<40x128xf32>
    %58 = arith.truncf %57 : vector<40x128xf32> to vector<40x128xbf16>
    %c0_16 = arith.constant 0 : index
    %c2048 = arith.constant 2048 : index
    %59 = vector.load %arg2[%c0_16, %c2048] : memref<512x3072xbf16, #tpu.memory_space<vmem>>, vector<512x512xbf16>
    %cst_17 = arith.constant dense<0.000000e+00> : vector<40x512xf32>
    %60 = tpu.matmul %1, %59, %cst_17 {dimension_numbers = #tpu.dot_dimension_numbers<[1], [0], [0], [1], [0, 0, 1, 1], [], []>} : vector<40x512xbf16>, vector<512x512xbf16>, vector<40x512xf32> -> vector<40x512xf32>
    %61 = vector.extract_strided_slice %60 {offsets = [0, 0], sizes = [40, 128], strides = [1, 1]} : vector<40x512xf32> to vector<40x128xf32>
    %62 = vector.extract_strided_slice %60 {offsets = [0, 128], sizes = [40, 128], strides = [1, 1]} : vector<40x512xf32> to vector<40x128xf32>
    %63 = arith.maximumf %61, %62 : vector<40x128xf32>
    %64 = vector.extract_strided_slice %60 {offsets = [0, 256], sizes = [40, 128], strides = [1, 1]} : vector<40x512xf32> to vector<40x128xf32>
    %65 = vector.extract_strided_slice %60 {offsets = [0, 384], sizes = [40, 128], strides = [1, 1]} : vector<40x512xf32> to vector<40x128xf32>
    %66 = arith.maximumf %64, %65 : vector<40x128xf32>
    %67 = arith.maximumf %63, %66 : vector<40x128xf32>
    %68 = vector.broadcast %2 : vector<1x128xf32> to vector<40x128xf32>
    %69 = arith.addf %67, %68 : vector<40x128xf32>
    %cst_18 = arith.constant 0.000000e+00 : f32
    %70 = vector.broadcast %cst_18 : f32 to vector<40x128xf32>
    %71 = arith.maximumf %69, %70 : vector<40x128xf32>
    %72 = arith.truncf %71 : vector<40x128xf32> to vector<40x128xbf16>
    %c0_19 = arith.constant 0 : index
    %c2560 = arith.constant 2560 : index
    %73 = vector.load %arg2[%c0_19, %c2560] : memref<512x3072xbf16, #tpu.memory_space<vmem>>, vector<512x512xbf16>
    %cst_20 = arith.constant dense<0.000000e+00> : vector<40x512xf32>
    %74 = tpu.matmul %1, %73, %cst_20 {dimension_numbers = #tpu.dot_dimension_numbers<[1], [0], [0], [1], [0, 0, 1, 1], [], []>} : vector<40x512xbf16>, vector<512x512xbf16>, vector<40x512xf32> -> vector<40x512xf32>
    %75 = vector.extract_strided_slice %74 {offsets = [0, 0], sizes = [40, 128], strides = [1, 1]} : vector<40x512xf32> to vector<40x128xf32>
    %76 = vector.extract_strided_slice %74 {offsets = [0, 128], sizes = [40, 128], strides = [1, 1]} : vector<40x512xf32> to vector<40x128xf32>
    %77 = arith.maximumf %75, %76 : vector<40x128xf32>
    %78 = vector.extract_strided_slice %74 {offsets = [0, 256], sizes = [40, 128], strides = [1, 1]} : vector<40x512xf32> to vector<40x128xf32>
    %79 = vector.extract_strided_slice %74 {offsets = [0, 384], sizes = [40, 128], strides = [1, 1]} : vector<40x512xf32> to vector<40x128xf32>
    %80 = arith.maximumf %78, %79 : vector<40x128xf32>
    %81 = arith.maximumf %77, %80 : vector<40x128xf32>
    %82 = vector.broadcast %2 : vector<1x128xf32> to vector<40x128xf32>
    %83 = arith.addf %81, %82 : vector<40x128xf32>
    %cst_21 = arith.constant 0.000000e+00 : f32
    %84 = vector.broadcast %cst_21 : f32 to vector<40x128xf32>
    %85 = arith.maximumf %83, %84 : vector<40x128xf32>
    %86 = arith.truncf %85 : vector<40x128xf32> to vector<40x128xbf16>
    %87 = tpu.concatenate %16, %30, %44, %58, %72, %86 in 1 : vector<40x128xbf16>, vector<40x128xbf16>, vector<40x128xbf16>, vector<40x128xbf16>, vector<40x128xbf16>, vector<40x128xbf16> -> vector<40x768xbf16>
    %c0_22 = arith.constant 0 : index
    %c0_23 = arith.constant 0 : index
    %88 = vector.load %arg4[%c0_22, %c0_23] : memref<768x512xbf16, #tpu.memory_space<vmem>>, vector<768x512xbf16>
    %cst_24 = arith.constant dense<0.000000e+00> : vector<40x512xf32>
    %89 = tpu.matmul %87, %88, %cst_24 {dimension_numbers = #tpu.dot_dimension_numbers<[1], [0], [0], [1], [0, 0, 1, 1], [], []>} : vector<40x768xbf16>, vector<768x512xbf16>, vector<40x512xf32> -> vector<40x512xf32>
    %90 = vector.extract_strided_slice %89 {offsets = [0, 0], sizes = [40, 128], strides = [1, 1]} : vector<40x512xf32> to vector<40x128xf32>
    %91 = vector.extract_strided_slice %89 {offsets = [0, 128], sizes = [40, 128], strides = [1, 1]} : vector<40x512xf32> to vector<40x128xf32>
    %92 = arith.maximumf %90, %91 : vector<40x128xf32>
    %93 = vector.extract_strided_slice %89 {offsets = [0, 256], sizes = [40, 128], strides = [1, 1]} : vector<40x512xf32> to vector<40x128xf32>
    %94 = vector.extract_strided_slice %89 {offsets = [0, 384], sizes = [40, 128], strides = [1, 1]} : vector<40x512xf32> to vector<40x128xf32>
    %95 = arith.maximumf %93, %94 : vector<40x128xf32>
    %96 = arith.maximumf %92, %95 : vector<40x128xf32>
    %c0_25 = arith.constant 0 : index
    %c0_26 = arith.constant 0 : index
    %97 = vector.load %arg5[%c0_25, %c0_26] : memref<1x128xf32, #tpu.memory_space<vmem>>, vector<1x128xf32>
    %98 = vector.broadcast %97 : vector<1x128xf32> to vector<40x128xf32>
    %99 = arith.addf %96, %98 : vector<40x128xf32>
    %cst_27 = arith.constant 0.000000e+00 : f32
    %100 = vector.broadcast %cst_27 : f32 to vector<40x128xf32>
    %101 = arith.maximumf %99, %100 : vector<40x128xf32>
    %102 = arith.truncf %101 : vector<40x128xf32> to vector<40x128xbf16>
    %103 = vector.extract_strided_slice %102 {offsets = [0, 0], sizes = [8, 128], strides = [1, 1]} : vector<40x128xbf16> to vector<8x128xbf16>
    %104 = vector.extract_strided_slice %102 {offsets = [8, 0], sizes = [8, 128], strides = [1, 1]} : vector<40x128xbf16> to vector<8x128xbf16>
    %105 = vector.extract_strided_slice %102 {offsets = [16, 0], sizes = [8, 128], strides = [1, 1]} : vector<40x128xbf16> to vector<8x128xbf16>
    %106 = vector.extract_strided_slice %102 {offsets = [24, 0], sizes = [8, 128], strides = [1, 1]} : vector<40x128xbf16> to vector<8x128xbf16>
    %107 = vector.extract_strided_slice %102 {offsets = [32, 0], sizes = [8, 128], strides = [1, 1]} : vector<40x128xbf16> to vector<8x128xbf16>
    %108 = tpu.concatenate %103, %104, %105, %106, %107 in 1 : vector<8x128xbf16>, vector<8x128xbf16>, vector<8x128xbf16>, vector<8x128xbf16>, vector<8x128xbf16> -> vector<8x640xbf16>
    %c0_28 = arith.constant 0 : index
    %c0_29 = arith.constant 0 : index
    %109 = vector.load %arg6[%c0_28, %c0_29] : memref<640x128xbf16, #tpu.memory_space<vmem>>, vector<640x128xbf16>
    %cst_30 = arith.constant dense<0.000000e+00> : vector<8x128xf32>
    %110 = tpu.matmul %108, %109, %cst_30 {dimension_numbers = #tpu.dot_dimension_numbers<[1], [0], [0], [1], [0, 0, 1, 1], [], []>} : vector<8x640xbf16>, vector<640x128xbf16>, vector<8x128xf32> -> vector<8x128xf32>
    %c0_31 = arith.constant 0 : index
    %c0_32 = arith.constant 0 : index
    %111 = vector.load %arg7[%c0_31, %c0_32] : memref<1x128xf32, #tpu.memory_space<vmem>>, vector<1x128xf32>
    %112 = vector.broadcast %111 : vector<1x128xf32> to vector<8x128xf32>
    %113 = arith.addf %110, %112 : vector<8x128xf32>
    %cst_33 = arith.constant 0.000000e+00 : f32
    %114 = vector.broadcast %cst_33 : f32 to vector<8x128xf32>
    %115 = arith.maximumf %113, %114 : vector<8x128xf32>
    %116 = arith.truncf %115 : vector<8x128xf32> to vector<8x128xbf16>
    %c0_34 = arith.constant 0 : index
    %c0_35 = arith.constant 0 : index
    %117 = vector.load %arg8[%c0_34, %c0_35] : memref<128x128xbf16, #tpu.memory_space<vmem>>, vector<128x128xbf16>
    %cst_36 = arith.constant dense<0.000000e+00> : vector<8x128xf32>
    %118 = tpu.matmul %116, %117, %cst_36 {dimension_numbers = #tpu.dot_dimension_numbers<[1], [0], [0], [1], [0, 0, 1, 1], [], []>} : vector<8x128xbf16>, vector<128x128xbf16>, vector<8x128xf32> -> vector<8x128xf32>
    %c0_37 = arith.constant 0 : index
    %c0_38 = arith.constant 0 : index
    %119 = vector.load %arg9[%c0_37, %c0_38] : memref<1x128xf32, #tpu.memory_space<vmem>>, vector<1x128xf32>
    %120 = vector.broadcast %119 : vector<1x128xf32> to vector<8x128xf32>
    %121 = arith.addf %118, %120 : vector<8x128xf32>
    %cst_39 = arith.constant 0.000000e+00 : f32
    %122 = vector.broadcast %cst_39 : f32 to vector<8x128xf32>
    %123 = arith.maximumf %121, %122 : vector<8x128xf32>
    %124 = arith.truncf %123 : vector<8x128xf32> to vector<8x128xbf16>
    %c0_40 = arith.constant 0 : index
    %c0_41 = arith.constant 0 : index
    %125 = vector.load %arg10[%c0_40, %c0_41] : memref<128x128xbf16, #tpu.memory_space<vmem>>, vector<128x128xbf16>
    %cst_42 = arith.constant dense<0.000000e+00> : vector<8x128xf32>
    %126 = tpu.matmul %124, %125, %cst_42 {dimension_numbers = #tpu.dot_dimension_numbers<[1], [0], [0], [1], [0, 0, 1, 1], [], []>} : vector<8x128xbf16>, vector<128x128xbf16>, vector<8x128xf32> -> vector<8x128xf32>
    %c0_43 = arith.constant 0 : index
    %c0_44 = arith.constant 0 : index
    %127 = vector.load %arg11[%c0_43, %c0_44] : memref<1x128xf32, #tpu.memory_space<vmem>>, vector<1x128xf32>
    %128 = vector.broadcast %127 : vector<1x128xf32> to vector<8x128xf32>
    %129 = arith.addf %126, %128 : vector<8x128xf32>
    %cst_45 = arith.constant 0.000000e+00 : f32
    %130 = vector.broadcast %cst_45 : f32 to vector<8x128xf32>
    %131 = arith.maximumf %129, %130 : vector<8x128xf32>
    %132 = arith.truncf %131 : vector<8x128xf32> to vector<8x128xbf16>
    %c0_46 = arith.constant 0 : index
    %c0_47 = arith.constant 0 : index
    %133 = vector.load %arg12[%c0_46, %c0_47] : memref<8x128xbf16, #tpu.memory_space<vmem>>, vector<8x128xbf16>
    tpu.vector_store %arg12[%c0_46, %c0_47], %132 {strides = array<i32>} : memref<8x128xbf16, #tpu.memory_space<vmem>>, vector<8x128xbf16>,
    return
  }
  func.func @transform_0(%arg0: i32) -> (i32, i32, i32) {
    %c0_i32 = arith.constant 0 : i32
    %c0_i32_0 = arith.constant 0 : i32
    %c0_i32_1 = arith.constant 0 : i32
    return %c0_i32, %arg0, %c0_i32_0 : i32, i32, i32
  }
  func.func @transform_1(%arg0: i32) -> (i32, i32) {
    %c0_i32 = arith.constant 0 : i32
    %c0_i32_0 = arith.constant 0 : i32
    %c0_i32_1 = arith.constant 0 : i32
    return %c0_i32, %c0_i32_0 : i32, i32
  }
  func.func @transform_2(%arg0: i32) -> (i32, i32) {
    %c0_i32 = arith.constant 0 : i32
    %c0_i32_0 = arith.constant 0 : i32
    %c0_i32_1 = arith.constant 0 : i32
    return %c0_i32, %c0_i32_0 : i32, i32
  }
  func.func @transform_3(%arg0: i32) -> (i32, i32) {
    %c0_i32 = arith.constant 0 : i32
    %c0_i32_0 = arith.constant 0 : i32
    %c0_i32_1 = arith.constant 0 : i32
    return %c0_i32, %c0_i32_0 : i32, i32
  }
  func.func @transform_4(%arg0: i32) -> (i32, i32) {
    %c0_i32 = arith.constant 0 : i32
    %c0_i32_0 = arith.constant 0 : i32
    %c0_i32_1 = arith.constant 0 : i32
    return %c0_i32, %c0_i32_0 : i32, i32
  }
  func.func @transform_5(%arg0: i32) -> (i32, i32) {
    %c0_i32 = arith.constant 0 : i32
    %c0_i32_0 = arith.constant 0 : i32
    %c0_i32_1 = arith.constant 0 : i32
    return %c0_i32, %c0_i32_0 : i32, i32
  }
  func.func @transform_6(%arg0: i32) -> (i32, i32) {
    %c0_i32 = arith.constant 0 : i32
    %c0_i32_0 = arith.constant 0 : i32
    %c0_i32_1 = arith.constant 0 : i32
    return %c0_i32, %c0_i32_0 : i32, i32
  }
  func.func @transform_7(%arg0: i32) -> (i32, i32) {
    %c0_i32 = arith.constant 0 : i32
    %c0_i32_0 = arith.constant 0 : i32
    %c0_i32_1 = arith.constant 0 : i32
    return %c0_i32, %c0_i32_0 : i32, i32
  }
  func.func @transform_8(%arg0: i32) -> (i32, i32) {
    %c0_i32 = arith.constant 0 : i32
    %c0_i32_0 = arith.constant 0 : i32
    %c0_i32_1 = arith.constant 0 : i32
    return %c0_i32, %c0_i32_0 : i32, i32
  }
  func.func @transform_9(%arg0: i32) -> (i32, i32) {
    %c0_i32 = arith.constant 0 : i32
    %c0_i32_0 = arith.constant 0 : i32
    %c0_i32_1 = arith.constant 0 : i32
    return %c0_i32, %c0_i32_0 : i32, i32
  }
  func.func @transform_10(%arg0: i32) -> (i32, i32) {
    %c0_i32 = arith.constant 0 : i32
    %c0_i32_0 = arith.constant 0 : i32
    %c0_i32_1 = arith.constant 0 : i32
    return %c0_i32, %c0_i32_0 : i32, i32
  }
  func.func @transform_11(%arg0: i32) -> (i32, i32) {
    %c0_i32 = arith.constant 0 : i32
    %c0_i32_0 = arith.constant 0 : i32
    return %arg0, %c0_i32 : i32, i32
  }
}

</mosaic_0001>

<bundles_post_ra>
// kernel: lenet5_forward.1
= control target key start
LH: loop header
LB: loop body
LE: loop exit
PB: predicated region body
PF: predicated region fallthrough
CT: control target
= control target key end

     0   :  { %16 = vsyncpa [#allocation3], 0  ;;  %s11300_s0 = inlined_call_operand.vmem [shape: bf16[5,8,512], index: 0, kind: input, shape index: {}]   ;;  %s11301_s1 = inlined_call_operand.hbm [shape: bf16[512,3072], index: 1, kind: input, shape index: {}]   ;;  %s11302_s2 = inlined_call_operand.hbm [shape: f32[1,128], index: 2, kind: input, shape index: {}]   ;;  %s11303_s3 = inlined_call_operand.hbm [shape: bf16[768,512], index: 3, kind: input, shape index: {}]   ;;  %s11304_s4 = inlined_call_operand.hbm [shape: f32[1,128], index: 4, kind: input, shape index: {}]   ;;  %s11305_s5 = inlined_call_operand.hbm [shape: bf16[640,128], index: 5, kind: input, shape index: {}]   ;;  %s11306_s6 = inlined_call_operand.hbm [shape: f32[1,128], index: 6, kind: input, shape index: {}]   ;;  %s11307_s7 = inlined_call_operand.hbm [shape: bf16[128,128], index: 7, kind: input, shape index: {}]   ;;  %s11308_s8 = inlined_call_operand.hbm [shape: f32[1,128], index: 8, kind: input, shape index: {}]   ;;  %s11309_s9 = inlined_call_operand.hbm [shape: bf16[128,128], index: 9, kind: input, shape index: {}]   ;;  %s11310_s10 = inlined_call_operand.hbm [shape: f32[1,128], index: 10, kind: input, shape index: {}]   ;;  %s11311_s11 = inlined_call_operand.vmem [shape: bf16[8,128], index: 11, kind: output, shape index: {}]  }
   0x1   :  { %17 = vsyncpa [#allocation5], 0 }
   0x2   :  { %18 = vsyncpa [#allocation8], 0 }
   0x3   :  { %19 = vsyncpa [#allocation11], 0 }
   0x4   :  { %20 = vsyncpa [#allocation14], 0 }
   0x5   :  { %21 = vsyncpa [#allocation17], 0  ;;  %s10714_s17 = smov [#allocation4]   ;;  %s10715_s19 = smov [#allocation7]  }
   0x6   :  { %s42_s18 = sshll.u32 %s10714_s17, 4  ;;  %s64_s20 = sshll.u32 %s10715_s19, 4  ;;  %s43_s18 = int_to_ptr.vmem [resolvable:$true] %s42_s18  ;;  %s65_s20 = int_to_ptr.vmem [resolvable:$true] %s64_s20 }
   0x7   :  { %s10482_s23 = scalar_lea.hbm %s11302_s2, 16 }
   0x8   :  { %p10483_p0 = scmp.ne.s32.totalorder %s11302_s2, %s10482_s23  ;;  %p10486_p1 = scmp.lt.u32.totalorder %s10482_s23, %s11302_s2 }
   0xa   :  { %p10488_p2 = pnand %p10486_p1, %p10483_p0 }
   0xc   :  { %10491 = shalt.err (!%p10488_p2)
}
   0xd   :  { %s10492_s28 = scalar_lea.vmem %s43_s18, 16  ;;  %s10496_s29 = scalar_lea.vmem %s43_s18, 32 }
   0xe   :  { %p10493_p3 = scmp.ne.s32.totalorder %s43_s18, %s10492_s28  ;;  %p10497_p4 = scmp.lt.s32.totalorder %s43_s18, %s43_s18 }
   0xf   :  { %p10498_p5 = scmp.lt.s32.totalorder %s10496_s29, %s10492_s28 }
  0x11   :  { %p10499_p6 = por %p10498_p5, %p10497_p4 }
  0x13   :  { %p10500_p7 = pnand %p10499_p6, %p10493_p3 }
  0x15   :  { %10503 = shalt.err (!%p10500_p7)
}
  0x16   :  { %45 = dma.hbm_to_vmem [thread:$0]  %s11302_s2, 16, %s43_s18, [#allocation5]  }
  0x17   :  { %s10504_s15 = scalar_lea.hbm %s11304_s4, 16 }
  0x18   :  { %p10505_p8 = scmp.ne.s32.totalorder %s11304_s4, %s10504_s15  ;;  %p10508_p9 = scmp.lt.u32.totalorder %s10504_s15, %s11304_s4 }
  0x1a   :  { %p10510_p10 = pnand %p10508_p9, %p10505_p8 }
  0x1c   :  { %10513 = shalt.err (!%p10510_p10)
}
  0x1d   :  { %s10514_s22 = scalar_lea.vmem %s65_s20, 16  ;;  %s10518_s23 = scalar_lea.vmem %s65_s20, 32 }
  0x1e   :  { %p10515_p11 = scmp.ne.s32.totalorder %s65_s20, %s10514_s22  ;;  %p10519_p12 = scmp.lt.s32.totalorder %s65_s20, %s65_s20 }
  0x1f   :  { %p10520_p13 = scmp.lt.s32.totalorder %s10518_s23, %s10514_s22 }
  0x21   :  { %p10521_p0 = por %p10520_p13, %p10519_p12 }
  0x23   :  { %p10522_p1 = pnand %p10521_p0, %p10515_p11 }
  0x25   :  { %10525 = shalt.err (!%p10522_p1)
}
  0x26   :  { %67 = dma.hbm_to_vmem [thread:$0]  %s11304_s4, 16, %s65_s20, [#allocation8]  }
  0x27   :  { %s10716_s24 = smov [#allocation10]   ;;  %s10717_s26 = smov [#allocation13]  }
  0x28   :  { %s86_s25 = sshll.u32 %s10716_s24, 4  ;;  %s108_s27 = sshll.u32 %s10717_s26, 4  ;;  %s87_s25 = int_to_ptr.vmem [resolvable:$true] %s86_s25  ;;  %s109_s27 = int_to_ptr.vmem [resolvable:$true] %s108_s27 }
  0x29   :  { %s10526_s30 = scalar_lea.hbm %s11306_s6, 16 }
  0x2a   :  { %p10527_p2 = scmp.ne.s32.totalorder %s11306_s6, %s10526_s30  ;;  %p10530_p3 = scmp.lt.u32.totalorder %s10526_s30, %s11306_s6 }
  0x2c   :  { %p10532_p4 = pnand %p10530_p3, %p10527_p2 }
  0x2e   :  { %10535 = shalt.err (!%p10532_p4)
}
  0x2f   :  { %s10536_s4 = scalar_lea.vmem %s87_s25, 16  ;;  %s10540_s20 = scalar_lea.vmem %s87_s25, 32 }
  0x30   :  { %p10537_p5 = scmp.ne.s32.totalorder %s87_s25, %s10536_s4  ;;  %p10541_p6 = scmp.lt.s32.totalorder %s87_s25, %s87_s25 }
  0x31   :  { %p10542_p7 = scmp.lt.s32.totalorder %s10540_s20, %s10536_s4 }
  0x33   :  { %p10543_p8 = por %p10542_p7, %p10541_p6 }
  0x35   :  { %p10544_p9 = pnand %p10543_p8, %p10537_p5 }
  0x37   :  { %10547 = shalt.err (!%p10544_p9)
}
  0x38   :  { %89 = dma.hbm_to_vmem [thread:$0]  %s11306_s6, 16, %s87_s25, [#allocation11]  }
  0x39   :  { %s10548_s22 = scalar_lea.hbm %s11308_s8, 16 }
  0x3a   :  { %p10549_p10 = scmp.ne.s32.totalorder %s11308_s8, %s10548_s22  ;;  %p10552_p11 = scmp.lt.u32.totalorder %s10548_s22, %s11308_s8 }
  0x3c   :  { %p10554_p12 = pnand %p10552_p11, %p10549_p10 }
  0x3e   :  { %10557 = shalt.err (!%p10554_p12)
}
  0x3f   :  { %s10558_s26 = scalar_lea.vmem %s109_s27, 16  ;;  %s10562_s28 = scalar_lea.vmem %s109_s27, 32 }
  0x40   :  { %p10559_p13 = scmp.ne.s32.totalorder %s109_s27, %s10558_s26  ;;  %p10563_p0 = scmp.lt.s32.totalorder %s109_s27, %s109_s27 }
  0x41   :  { %p10564_p1 = scmp.lt.s32.totalorder %s10562_s28, %s10558_s26 }
  0x43   :  { %p10565_p2 = por %p10564_p1, %p10563_p0 }
  0x45   :  { %p10566_p3 = pnand %p10565_p2, %p10559_p13 }
  0x47   :  { %10569 = shalt.err (!%p10566_p3)
}
  0x48   :  { %111 = dma.hbm_to_vmem [thread:$0]  %s11308_s8, 16, %s109_s27, [#allocation14]  }
  0x49   :  { %s10718_s29 = smov [#allocation2]   ;;  %s10570_s14 = scalar_lea.hbm %s11301_s1, 98304 }
  0x4a   :  { %s29_s30 = sshll.u32 %s10718_s29, 4  ;;  %p10571_p4 = scmp.ne.s32.totalorder %s11301_s1, %s10570_s14  ;;  %s30_s30 = int_to_ptr.vmem [resolvable:$true] %s29_s30 }
  0x4b   :  { %p10574_p5 = scmp.lt.u32.totalorder %s10570_s14, %s11301_s1 }
  0x4d   :  { %p10576_p6 = pnand %p10574_p5, %p10571_p4 }
  0x4f   :  { %10579 = shalt.err (!%p10576_p6)
}
  0x50   :  { %s10580_s17 = scalar_lea.vmem %s30_s30, 98304  ;;  %p10585_p8 = scmp.lt.s32.totalorder %s30_s30, %s30_s30 }
  0x51   :  { %p10581_p7 = scmp.ne.s32.totalorder %s30_s30, %s10580_s17  ;;  %p10586_p9 = scmp.lt.s32.totalorder %s10580_s17, %s10580_s17 }
  0x53   :  { %p10587_p10 = por %p10586_p9, %p10585_p8 }
  0x55   :  { %p10588_p11 = pnand %p10587_p10, %p10581_p7 }
  0x57   :  { %10591 = shalt.err (!%p10588_p11)
}
  0x58   :  { %s10719_s8 = smov 1536   ;;  %s10720_s27 = smov 96  }
  0x59   :  { %35 = dma.hbm_to_vmem [thread:$0]  %s11301_s1, 98304, %s30_s30, [#allocation3], %s10719_s8, %s10719_s8, %s10720_s27  }
  0x5a   :  { %s10721_s22 = smov [#allocation6]   ;;  %s10592_s24 = scalar_lea.hbm %s11303_s3, 24576 }
  0x5b   :  { %s51_s23 = sshll.u32 %s10721_s22, 4  ;;  %p10593_p12 = scmp.ne.s32.totalorder %s11303_s3, %s10592_s24  ;;  %s52_s23 = int_to_ptr.vmem [resolvable:$true] %s51_s23 }
  0x5c   :  { %p10596_p13 = scmp.lt.u32.totalorder %s10592_s24, %s11303_s3 }
  0x5e   :  { %p10598_p0 = pnand %p10596_p13, %p10593_p12 }
  0x60   :  { %10601 = shalt.err (!%p10598_p0)
}
  0x61   :  { %s10602_s29 = scalar_lea.vmem %s52_s23, 24576  ;;  %p10607_p2 = scmp.lt.s32.totalorder %s52_s23, %s52_s23 }
  0x62   :  { %p10603_p1 = scmp.ne.s32.totalorder %s52_s23, %s10602_s29  ;;  %p10608_p3 = scmp.lt.s32.totalorder %s10602_s29, %s10602_s29 }
  0x64   :  { %p10609_p4 = por %p10608_p3, %p10607_p2 }
  0x66   :  { %p10610_p5 = pnand %p10609_p4, %p10603_p1 }
  0x68   :  { %10613 = shalt.err (!%p10610_p5)
}
  0x69   :  { %s10722_s1 = smov 256   ;;  %s10723_s30 = smov 16  }
  0x6a   :  { %57 = dma.hbm_to_vmem [thread:$0]  %s11303_s3, 24576, %s52_s23, [#allocation5], %s10722_s1, %s10722_s1, %s10723_s30  }
  0x6b   :  { %s10724_s14 = smov [#allocation9]   ;;  %s10614_s16 = scalar_lea.hbm %s11305_s5, 5120 }
  0x6c   :  { %s73_s15 = sshll.u32 %s10724_s14, 4  ;;  %p10615_p6 = scmp.ne.s32.totalorder %s11305_s5, %s10614_s16  ;;  %s74_s15 = int_to_ptr.vmem [resolvable:$true] %s73_s15 }
  0x6d   :  { %p10618_p7 = scmp.lt.u32.totalorder %s10614_s16, %s11305_s5 }
  0x6f   :  { %p10620_p8 = pnand %p10618_p7, %p10615_p6 }
  0x71   :  { %10623 = shalt.err (!%p10620_p8)
}
  0x72   :  { %s10624_s21 = scalar_lea.vmem %s74_s15, 5120  ;;  %p10629_p10 = scmp.lt.s32.totalorder %s74_s15, %s74_s15 }
  0x73   :  { %p10625_p9 = scmp.ne.s32.totalorder %s74_s15, %s10624_s21  ;;  %p10630_p11 = scmp.lt.s32.totalorder %s10624_s21, %s10624_s21 }
  0x75   :  { %p10631_p12 = por %p10630_p11, %p10629_p10 }
  0x77   :  { %p10632_p13 = pnand %p10631_p12, %p10625_p9 }
  0x79   :  { %10635 = shalt.err (!%p10632_p13)
}
  0x7a   :  { %s10725_s3 = smov 64   ;;  %s10726_s22 = smov 4  }
  0x7b   :  { %79 = dma.hbm_to_vmem [thread:$0]  %s11305_s5, 5120, %s74_s15, [#allocation8], %s10725_s3, %s10725_s3, %s10726_s22  }
  0x7c   :  { %s10727_s18 = smov [#allocation12]   ;;  %s10728_s26 = smov [#allocation15]  }
  0x7d   :  { %s95_s24 = sshll.u32 %s10727_s18, 4  ;;  %s117_s28 = sshll.u32 %s10728_s26, 4  ;;  %s96_s24 = int_to_ptr.vmem [resolvable:$true] %s95_s24  ;;  %s118_s28 = int_to_ptr.vmem [resolvable:$true] %s117_s28 }
  0x7e   :  { %s10636_s29 = scalar_lea.hbm %s11307_s7, 1024 }
  0x7f   :  { %p10637_p0 = scmp.ne.s32.totalorder %s11307_s7, %s10636_s29  ;;  %p10640_p1 = scmp.lt.u32.totalorder %s10636_s29, %s11307_s7 }
  0x81   :  { %p10642_p2 = pnand %p10640_p1, %p10637_p0 }
  0x83   :  { %10645 = shalt.err (!%p10642_p2)
}
  0x84   :  { %s10646_s5 = scalar_lea.vmem %s96_s24, 1024  ;;  %p10651_p4 = scmp.lt.s32.totalorder %s96_s24, %s96_s24 }
  0x85   :  { %p10647_p3 = scmp.ne.s32.totalorder %s96_s24, %s10646_s5  ;;  %p10652_p5 = scmp.lt.s32.totalorder %s10646_s5, %s10646_s5 }
  0x87   :  { %p10653_p6 = por %p10652_p5, %p10651_p4 }
  0x89   :  { %p10654_p7 = pnand %p10653_p6, %p10647_p3 }
  0x8b   :  { %10657 = shalt.err (!%p10654_p7)
}
  0x8c   :  { %101 = dma.hbm_to_vmem [thread:$0]  %s11307_s7, 1024, %s96_s24, [#allocation11], %s10725_s3, %s10725_s3, %s10726_s22  }
  0x8d   :  { %s10658_s16 = scalar_lea.hbm %s11309_s9, 1024 }
  0x8e   :  { %p10659_p8 = scmp.ne.s32.totalorder %s11309_s9, %s10658_s16  ;;  %p10662_p9 = scmp.lt.u32.totalorder %s10658_s16, %s11309_s9 }
  0x90   :  { %p10664_p10 = pnand %p10662_p9, %p10659_p8 }
  0x92   :  { %10667 = shalt.err (!%p10664_p10)
}
  0x93   :  { %s10668_s21 = scalar_lea.vmem %s118_s28, 1024  ;;  %p10673_p12 = scmp.lt.s32.totalorder %s118_s28, %s118_s28 }
  0x94   :  { %p10669_p11 = scmp.ne.s32.totalorder %s118_s28, %s10668_s21  ;;  %p10674_p13 = scmp.lt.s32.totalorder %s10668_s21, %s10668_s21 }
  0x96   :  { %p10675_p0 = por %p10674_p13, %p10673_p12 }
  0x98   :  { %p10676_p1 = pnand %p10675_p0, %p10669_p11 }
  0x9a   :  { %10679 = shalt.err (!%p10676_p1)
}
  0x9b   :  { %123 = dma.hbm_to_vmem [thread:$0]  %s11309_s9, 1024, %s118_s28, [#allocation14], %s10725_s3, %s10725_s3, %s10726_s22  }
  0x9c   :  { %s10729_s2 = smov [#allocation16]   ;;  %s10680_s6 = scalar_lea.hbm %s11310_s10, 16 }
  0x9d   :  { %s130_s18 = sshll.u32 %s10729_s2, 4  ;;  %p10681_p2 = scmp.ne.s32.totalorder %s11310_s10, %s10680_s6  ;;  %s131_s18 = int_to_ptr.vmem [resolvable:$true] %s130_s18 }
  0x9e   :  { %p10684_p3 = scmp.lt.u32.totalorder %s10680_s6, %s11310_s10 }
  0xa0   :  { %p10686_p4 = pnand %p10684_p3, %p10681_p2 }
  0xa2   :  { %10689 = shalt.err (!%p10686_p4)
}
  0xa3   :  { %s10690_s12 = scalar_lea.vmem %s131_s18, 16  ;;  %s10694_s9 = scalar_lea.vmem %s131_s18, 32 }
  0xa4   :  { %p10691_p5 = scmp.ne.s32.totalorder %s131_s18, %s10690_s12  ;;  %p10695_p6 = scmp.lt.s32.totalorder %s131_s18, %s131_s18 }
  0xa5   :  { %p10696_p7 = scmp.lt.s32.totalorder %s10694_s9, %s10690_s12 }
  0xa7   :  { %p10697_p8 = por %p10696_p7, %p10695_p6 }
  0xa9   :  { %p10698_p9 = pnand %p10697_p8, %p10691_p5 }
  0xab   :  { %10701 = shalt.err (!%p10698_p9)
}
  0xac   :  { %133 = dma.hbm_to_vmem [thread:$0]  %s11310_s10, 16, %s131_s18, [#allocation17]  }
  0xad   :  { %10702 = dma.done.wait [#allocation3], 98304  }
  0xae   :  { %10703 = vsyncadd [#allocation3], 4294868992 }
  0xaf   :  { %10704 = dma.done.wait [#allocation5], 24592  }
  0xb0   :  { %10705 = vsyncadd [#allocation5], 4294942704 }
  0xb1   :  { %10706 = dma.done.wait [#allocation8], 5136  }
  0xb2   :  { %10707 = vsyncadd [#allocation8], 4294962160 }
  0xb3   :  { %10708 = dma.done.wait [#allocation11], 1040  }
  0xb4   :  { %10709 = vsyncadd [#allocation11], 4294966256 }
  0xb5   :  { %10710 = dma.done.wait [#allocation14], 1040  }
  0xb6   :  { %10711 = vsyncadd [#allocation14], 4294966256 }
  0xb7   :  { %10712 = dma.done.wait [#allocation17], 16  }
  0xb8   :  { %10713 = vsyncadd [#allocation17], 4294967280  ;;  %v176_v0 = vld [vmem:[#allocation2] sm:$0xff]  ;;  %v177_v2 = vld [vmem:[#allocation2 + $0x8] sm:$0xff]  ;;  %vm10731_vm0 = vmmov 0  }
  0xb9   :  { %v178_v1 = vld [vmem:[#allocation2 + $0x60] sm:$0xff]  ;;  %v179_v4 = vld [vmem:[#allocation2 + $0x68] sm:$0xff] }
  0xba   :  { %v8734_v3 = vcombine.high %v176_v0, %v178_v1  ;;  %v8733_v5 = vcombine.low %v176_v0, %v178_v1  ;;  %v180_v6 = vld [vmem:[#allocation2 + $0xc0] sm:$0xff]  ;;  %v8736_v8 = vcombine.high %v177_v2, %v179_v4  ;;  %v8735_v9 = vcombine.low %v177_v2, %v179_v4  ;;  %v181_v11 = vld [vmem:[#allocation2 + $0xc8] sm:$0xff] }
  0xbb   :  { %v182_v7 = vld [vmem:[#allocation2 + $0x120] sm:$0xff]  ;;  %v183_v12 = vld [vmem:[#allocation2 + $0x128] sm:$0xff] }
  0xbc   :  { %v8738_v10 = vcombine.high %v180_v6, %v182_v7  ;;  %v184_v13 = vld [vmem:[#allocation2 + $0x180] sm:$0xff]  ;;  %998 = vmatprep.subr.bf16.mxu0 %v8734_v3  ;;  %v8740_v14 = vcombine.high %v181_v11, %v183_v12  ;;  %v185_v16 = vld [vmem:[#allocation2 + $0x188] sm:$0xff]  ;;  %1120 = vmatprep.subr.bf16.mxu1 %v8736_v8  ;;  %v8737_v18 = vcombine.low %v180_v6, %v182_v7 }
  0xbd   :  { %v186_v15 = vld [vmem:[#allocation2 + $0x1e0] sm:$0xff]  ;;  %v187_v17 = vld [vmem:[#allocation2 + $0x1e8] sm:$0xff]  ;;  %999 = vmatpush1.bf16.msra.mxu0 %v8733_v5  ;;  %1121 = vmatpush1.bf16.msra.mxu1 %v8735_v9  ;;  %v8739_v19 = vcombine.low %v181_v11, %v183_v12 }
  0xbe   :  { %1000 = vmatprep.subr.bf16.mxu0 %v8738_v10  ;;  %v8742_v20 = vcombine.high %v184_v13, %v186_v15  ;;  %1122 = vmatprep.subr.bf16.mxu1 %v8740_v14  ;;  %v8744_v21 = vcombine.high %v185_v16, %v187_v17  ;;  %v188_v22 = vld [vmem:[#allocation2 + $0x240] sm:$0xff]  ;;  %v189_v24 = vld [vmem:[#allocation2 + $0x248] sm:$0xff]  ;;  %v8741_v26 = vcombine.low %v184_v13, %v186_v15 }
  0xbf   :  { %v190_v23 = vld [vmem:[#allocation2 + $0x2a0] sm:$0xff]  ;;  %v191_v25 = vld [vmem:[#allocation2 + $0x2a8] sm:$0xff]  ;;  %v8743_v27 = vcombine.low %v185_v16, %v187_v17 }
  0xc0   :  { %v8746_v28 = vcombine.high %v188_v22, %v190_v23  ;;  %v8748_v29 = vcombine.high %v189_v24, %v191_v25  ;;  %v192_v30 = vld [vmem:[#allocation2 + $0x300] sm:$0xff]  ;;  %v193_v32 = vld [vmem:[#allocation2 + $0x308] sm:$0xff]  ;;  %v8745_v34 = vcombine.low %v188_v22, %v190_v23  ;;  %v8747_v35 = vcombine.low %v189_v24, %v191_v25 }
  0xc1   :  { %1001 = vmatpush1.bf16.msra.mxu0 %v8737_v18  ;;  %1123 = vmatpush1.bf16.msra.mxu1 %v8739_v19  ;;  %v194_v31 = vld [vmem:[#allocation2 + $0x360] sm:$0xff]  ;;  %v195_v33 = vld [vmem:[#allocation2 + $0x368] sm:$0xff] }
  0xc2   :  { %1002 = vmatprep.subr.bf16.mxu0 %v8742_v20  ;;  %1124 = vmatprep.subr.bf16.mxu1 %v8744_v21  ;;  %v8750_v36 = vcombine.high %v192_v30, %v194_v31  ;;  %v8752_v37 = vcombine.high %v193_v32, %v195_v33  ;;  %v196_v38 = vld [vmem:[#allocation2 + $0x3c0] sm:$0xff]  ;;  %v197_v40 = vld [vmem:[#allocation2 + $0x3c8] sm:$0xff]  ;;  %v8749_v42 = vcombine.low %v192_v30, %v194_v31 }
  0xc3   :  { %v198_v39 = vld [vmem:[#allocation2 + $0x420] sm:$0xff]  ;;  %v199_v41 = vld [vmem:[#allocation2 + $0x428] sm:$0xff]  ;;  %v8751_v43 = vcombine.low %v193_v32, %v195_v33 }
  0xc4   :  { %v8754_v44 = vcombine.high %v196_v38, %v198_v39  ;;  %v8756_v45 = vcombine.high %v197_v40, %v199_v41  ;;  %v200_v46 = vld [vmem:[#allocation2 + $0x480] sm:$0xff]  ;;  %v201_v48 = vld [vmem:[#allocation2 + $0x488] sm:$0xff]  ;;  %v8753_v50 = vcombine.low %v196_v38, %v198_v39  ;;  %v8755_v51 = vcombine.low %v197_v40, %v199_v41 }
  0xc5   :  { %1003 = vmatpush1.bf16.msra.mxu0 %v8741_v26  ;;  %1125 = vmatpush1.bf16.msra.mxu1 %v8743_v27  ;;  %v202_v47 = vld [vmem:[#allocation2 + $0x4e0] sm:$0xff]  ;;  %v203_v49 = vld [vmem:[#allocation2 + $0x4e8] sm:$0xff] }
  0xc6   :  { %1004 = vmatprep.subr.bf16.mxu0 %v8746_v28  ;;  %1126 = vmatprep.subr.bf16.mxu1 %v8748_v29  ;;  %v8758_v52 = vcombine.high %v200_v46, %v202_v47  ;;  %v8760_v53 = vcombine.high %v201_v48, %v203_v49  ;;  %v204_v54 = vld [vmem:[#allocation2 + $0x540] sm:$0xff]  ;;  %v205_v57 = vld [vmem:[#allocation2 + $0x548] sm:$0xff]  ;;  %v8757_v59 = vcombine.low %v200_v46, %v202_v47 }
  0xc7   :  { %v206_v55 = vld [vmem:[#allocation2 + $0x5a0] sm:$0xff]  ;;  %v207_v58 = vld [vmem:[#allocation2 + $0x5a8] sm:$0xff]  ;;  %v8759_v60 = vcombine.low %v201_v48, %v203_v49 }
  0xc8   :  { %v10095_v56 = vld [vmem:[%s11300_s0 + $0x4] ss:$16 sps:$4 sm:$0xff]   ;;  %v8762_v61 = vcombine.high %v204_v54, %v206_v55  ;;  %v8764_v62 = vcombine.high %v205_v57, %v207_v58  ;;  %v209_v1 = vld [vmem:[#allocation2 + $0x608] sm:$0xff]  ;;  %v8761_v3 = vcombine.low %v204_v54, %v206_v55  ;;  %v8763_v4 = vcombine.low %v205_v57, %v207_v58 }
  0xc9   :  { %1005 = vmatpush1.bf16.msra.mxu0 %v8745_v34  ;;  %1127 = vmatpush1.bf16.msra.mxu1 %v8747_v35  ;;  %v208_v63 = vld [vmem:[#allocation2 + $0x600] sm:$0xff]  ;;  %v211_v2 = vld [vmem:[#allocation2 + $0x668] sm:$0xff] }
  0xca   :  { %1006 = vmatprep.subr.bf16.mxu0 %v8750_v36  ;;  %1128 = vmatprep.subr.bf16.mxu1 %v8752_v37  ;;  %v210_v0 = vld [vmem:[#allocation2 + $0x660] sm:$0xff]  ;;  %v8768_v6 = vcombine.high %v209_v1, %v211_v2  ;;  %v213_v9 = vld [vmem:[#allocation2 + $0x6c8] sm:$0xff]  ;;  %v8767_v12 = vcombine.low %v209_v1, %v211_v2 }
  0xcb   :  { %1030 = vmatprep.mubr.bf16.mxu0 %v10095_v56  ;;  %1152 = vmatprep.mubr.bf16.mxu1 %v10095_v56  ;;  %v8766_v5 = vcombine.high %v208_v63, %v210_v0  ;;  %v212_v7 = vld [vmem:[#allocation2 + $0x6c0] sm:$0xff]  ;;  %v215_v10 = vld [vmem:[#allocation2 + $0x728] sm:$0xff]  ;;  %v8765_v11 = vcombine.low %v208_v63, %v210_v0 }
  0xcc   :  { %v214_v8 = vld [vmem:[#allocation2 + $0x720] sm:$0xff]  ;;  %v8772_v14 = vcombine.high %v213_v9, %v215_v10  ;;  %v217_v17 = vld [vmem:[#allocation2 + $0x788] sm:$0xff]  ;;  %v8771_v20 = vcombine.low %v213_v9, %v215_v10 }
  0xcd   :  { %1007 = vmatpush1.bf16.msra.mxu0 %v8749_v42  ;;  %1129 = vmatpush1.bf16.msra.mxu1 %v8751_v43  ;;  %v8770_v13 = vcombine.high %v212_v7, %v214_v8  ;;  %v216_v15 = vld [vmem:[#allocation2 + $0x780] sm:$0xff]  ;;  %v219_v18 = vld [vmem:[#allocation2 + $0x7e8] sm:$0xff]  ;;  %v8769_v19 = vcombine.low %v212_v7, %v214_v8 }
  0xce   :  { %1008 = vmatprep.subr.bf16.mxu0 %v8754_v44  ;;  %1130 = vmatprep.subr.bf16.mxu1 %v8756_v45  ;;  %v218_v16 = vld [vmem:[#allocation2 + $0x7e0] sm:$0xff]  ;;  %v8776_v22 = vcombine.high %v217_v17, %v219_v18  ;;  %v221_v25 = vld [vmem:[#allocation2 + $0x848] sm:$0xff]  ;;  %v8775_v28 = vcombine.low %v217_v17, %v219_v18 }
  0xcf   :  { %v8774_v21 = vcombine.high %v216_v15, %v218_v16  ;;  %v220_v23 = vld [vmem:[#allocation2 + $0x840] sm:$0xff]  ;;  %v223_v26 = vld [vmem:[#allocation2 + $0x8a8] sm:$0xff]  ;;  %v8773_v27 = vcombine.low %v216_v15, %v218_v16 }
  0xd0   :  { %v222_v24 = vld [vmem:[#allocation2 + $0x8a0] sm:$0xff]  ;;  %v8780_v30 = vcombine.high %v221_v25, %v223_v26  ;;  %v225_v33 = vld [vmem:[#allocation2 + $0x908] sm:$0xff]  ;;  %v8779_v36 = vcombine.low %v221_v25, %v223_v26 }
  0xd1   :  { %1009 = vmatpush1.bf16.msra.mxu0 %v8753_v50  ;;  %1131 = vmatpush1.bf16.msra.mxu1 %v8755_v51  ;;  %v8778_v29 = vcombine.high %v220_v23, %v222_v24  ;;  %v224_v31 = vld [vmem:[#allocation2 + $0x900] sm:$0xff]  ;;  %v227_v34 = vld [vmem:[#allocation2 + $0x968] sm:$0xff]  ;;  %v8777_v35 = vcombine.low %v220_v23, %v222_v24 }
  0xd2   :  { %1010 = vmatprep.subr.bf16.mxu0 %v8758_v52  ;;  %1132 = vmatprep.subr.bf16.mxu1 %v8760_v53  ;;  %v226_v32 = vld [vmem:[#allocation2 + $0x960] sm:$0xff]  ;;  %v8784_v38 = vcombine.high %v225_v33, %v227_v34  ;;  %v229_v41 = vld [vmem:[#allocation2 + $0x9c8] sm:$0xff]  ;;  %v8783_v44 = vcombine.low %v225_v33, %v227_v34 }
  0xd3   :  { %v8782_v37 = vcombine.high %v224_v31, %v226_v32  ;;  %v228_v39 = vld [vmem:[#allocation2 + $0x9c0] sm:$0xff]  ;;  %v231_v42 = vld [vmem:[#allocation2 + $0xa28] sm:$0xff]  ;;  %v8781_v43 = vcombine.low %v224_v31, %v226_v32 }
  0xd4   :  { %v230_v40 = vld [vmem:[#allocation2 + $0xa20] sm:$0xff]  ;;  %v8788_v46 = vcombine.high %v229_v41, %v231_v42  ;;  %v233_v49 = vld [vmem:[#allocation2 + $0xa88] sm:$0xff]  ;;  %v8787_v52 = vcombine.low %v229_v41, %v231_v42 }
  0xd5   :  { %1011 = vmatpush1.bf16.msra.mxu0 %v8757_v59  ;;  %1133 = vmatpush1.bf16.msra.mxu1 %v8759_v60  ;;  %v8786_v45 = vcombine.high %v228_v39, %v230_v40  ;;  %v232_v47 = vld [vmem:[#allocation2 + $0xa80] sm:$0xff]  ;;  %v235_v50 = vld [vmem:[#allocation2 + $0xae8] sm:$0xff]  ;;  %v8785_v51 = vcombine.low %v228_v39, %v230_v40 }
  0xd6   :  { %1012 = vmatprep.subr.bf16.mxu0 %v8762_v61  ;;  %1134 = vmatprep.subr.bf16.mxu1 %v8764_v62  ;;  %v234_v48 = vld [vmem:[#allocation2 + $0xae0] sm:$0xff]  ;;  %v8792_v54 = vcombine.high %v233_v49, %v235_v50  ;;  %v237_v57 = vld [vmem:[#allocation2 + $0xb48] sm:$0xff]  ;;  %v8791_v60 = vcombine.low %v233_v49, %v235_v50 }
  0xd7   :  { %v8790_v53 = vcombine.high %v232_v47, %v234_v48  ;;  %v236_v55 = vld [vmem:[#allocation2 + $0xb40] sm:$0xff]  ;;  %v239_v58 = vld [vmem:[#allocation2 + $0xba8] sm:$0xff]  ;;  %v8789_v59 = vcombine.low %v232_v47, %v234_v48 }
  0xd8   :  { %v238_v56 = vld [vmem:[#allocation2 + $0xba0] sm:$0xff]  ;;  %v8796_v62 = vcombine.high %v237_v57, %v239_v58  ;;  %v241_v1 = vld [vmem:[#allocation2 + $0xc08] sm:$0xff] }
  0xd9   :  { %1013 = vmatpush1.bf16.msra.mxu0 %v8761_v3  ;;  %1135 = vmatpush1.bf16.msra.mxu1 %v8763_v4  ;;  %v8794_v61 = vcombine.high %v236_v55, %v238_v56  ;;  %v240_v63 = vld [vmem:[#allocation2 + $0xc00] sm:$0xff]  ;;  %v243_v2 = vld [vmem:[#allocation2 + $0xc68] sm:$0xff]  ;;  %v8793_v3 = vcombine.low %v236_v55, %v238_v56  ;;  %v8795_v4 = vcombine.low %v237_v57, %v239_v58 }
  0xda   :  { %1014 = vmatprep.subr.bf16.mxu0 %v8766_v5  ;;  %1136 = vmatprep.subr.bf16.mxu1 %v8768_v6  ;;  %v242_v0 = vld [vmem:[#allocation2 + $0xc60] sm:$0xff]  ;;  %v8800_v6 = vcombine.high %v241_v1, %v243_v2  ;;  %v245_v10 = vld [vmem:[#allocation2 + $0xcc8] sm:$0xff] }
  0xdb   :  { %v8798_v5 = vcombine.high %v240_v63, %v242_v0  ;;  %v244_v7 = vld [vmem:[#allocation2 + $0xcc0] sm:$0xff]  ;;  %v263_v47 = vld [vmem:[#allocation2 + $0x1028] sm:$0xff] }
  0xdc   :  { %v246_v8 = vld [vmem:[#allocation2 + $0xd20] sm:$0xff]  ;;  %v267_v55 = vld [vmem:[#allocation2 + $0x10e8] sm:$0xff] }
  0xdd   :  { %1015 = vmatpush1.bf16.msra.mxu0 %v8765_v11  ;;  %1137 = vmatpush1.bf16.msra.mxu1 %v8767_v12  ;;  %v10097_v9 = vld [vmem:[%s11300_s0] ss:$16 sps:$4 sm:$0xff]   ;;  %v247_v11 = vld [vmem:[#allocation2 + $0xd28] sm:$0xff]  ;;  %v8797_v12 = vcombine.low %v240_v63, %v242_v0  ;;  %v10098_v18 = vld [vmem:[%s11300_s0 + $0x24] ss:$16 sps:$4 sm:$0xff]  }
  0xde   :  { %1016 = vmatprep.subr.bf16.mxu0 %v8770_v13  ;;  %1138 = vmatprep.subr.bf16.mxu1 %v8772_v14  ;;  %v8799_v13 = vcombine.low %v241_v1, %v243_v2  ;;  %v8802_v14 = vcombine.high %v244_v7, %v246_v8  ;;  %v8804_v15 = vcombine.high %v245_v10, %v247_v11  ;;  %v248_v16 = vld [vmem:[#allocation2 + $0xd80] sm:$0xff]  ;;  %v10103_v57 = vld [vmem:[%s11300_s0 + $0xc] ss:$16 sps:$4 sm:$0xff]  }
  0xdf   :  { %v250_v17 = vld [vmem:[#allocation2 + $0xde0] sm:$0xff]  ;;  %v269_v63 = vld [vmem:[#allocation2 + $0x1148] sm:$0xff] }
  0xe0   :  { %v8806_v23 = vcombine.high %v248_v16, %v250_v17  ;;  %v252_v25 = vld [vmem:[#allocation2 + $0xe40] sm:$0xff]  ;;  %v8805_v31 = vcombine.low %v248_v16, %v250_v17  ;;  %v271_v1 = vld [vmem:[#allocation2 + $0x11a8] sm:$0xff] }
  0xe1   :  { %1017 = vmatpush1.bf16.msra.mxu0 %v8769_v19  ;;  %1139 = vmatpush1.bf16.msra.mxu1 %v8771_v20  ;;  %v249_v19 = vld [vmem:[#allocation2 + $0xd88] sm:$0xff]  ;;  %v254_v26 = vld [vmem:[#allocation2 + $0xea0] sm:$0xff] }
  0xe2   :  { %1018 = vmatprep.subr.bf16.mxu0 %v8774_v21  ;;  %1140 = vmatprep.subr.bf16.mxu1 %v8776_v22  ;;  %v251_v20 = vld [vmem:[#allocation2 + $0xde8] sm:$0xff]  ;;  %v8801_v21 = vcombine.low %v244_v7, %v246_v8  ;;  %v8803_v22 = vcombine.low %v245_v10, %v247_v11  ;;  %v8810_v33 = vcombine.high %v252_v25, %v254_v26  ;;  %v256_v34 = vld [vmem:[#allocation2 + $0xf00] sm:$0xff] }
  0xe3   :  { %v8808_v24 = vcombine.high %v249_v19, %v251_v20  ;;  %v8807_v32 = vcombine.low %v249_v19, %v251_v20  ;;  %v8809_v40 = vcombine.low %v252_v25, %v254_v26  ;;  %v264_v50 = vld [vmem:[#allocation2 + $0x1080] sm:$0xff]  ;;  %v273_v7 = vld [vmem:[#allocation2 + $0x1208] sm:$0xff]  ;;  %v8828_v8 = vcombine.high %v269_v63, %v271_v1 }
  0xe4   :  { %v8827_v11 = vcombine.low %v269_v63, %v271_v1  ;;  %v279_v17 = vld [vmem:[#allocation2 + $0x1328] sm:$0xff]  ;;  %v300_v63 = vld [vmem:[#allocation2 + $0x1740] sm:$0xff] }
  0xe5   :  { %1019 = vmatpush1.bf16.msra.mxu0 %v8773_v27  ;;  %1141 = vmatpush1.bf16.msra.mxu1 %v8775_v28  ;;  %v253_v27 = vld [vmem:[#allocation2 + $0xe48] sm:$0xff] }
  0xe6   :  { %1020 = vmatprep.subr.bf16.mxu0 %v8778_v29  ;;  %1142 = vmatprep.subr.bf16.mxu1 %v8780_v30  ;;  %v255_v28 = vld [vmem:[#allocation2 + $0xea8] sm:$0xff]  ;;  %v10100_v29 = vld [vmem:[%s11300_s0 + $0x20] ss:$16 sps:$4 sm:$0xff]  }
  0xe7   :  { %v173_v30 = vld [vmem:[%s11300_s0 + $0x40] sm:$0xff]  ;;  %v8811_v41 = vcombine.low %v253_v27, %v255_v28  ;;  %v283_v25 = vld [vmem:[#allocation2 + $0x13e8] sm:$0xff] }
  0xe8   :  { %v10936_v39 = vcombine.high %v173_v30, %v173_v30  ;;  %v10940_v48 = vcombine.low %v173_v30, %v173_v30  ;;  %v286_v30 = vld [vmem:[#allocation2 + $0x14a0] sm:$0xff]  ;;  %v301_v1 = vld [vmem:[#allocation2 + $0x1748] sm:$0xff] }
  0xe9   :  { %1021 = vmatpush1.bf16.msra.mxu0 %v8777_v35  ;;  %1143 = vmatpush1.bf16.msra.mxu1 %v8779_v36  ;;  %v258_v35 = vld [vmem:[#allocation2 + $0xf60] sm:$0xff]  ;;  %v257_v36 = vld [vmem:[#allocation2 + $0xf08] sm:$0xff] }
  0xea   :  { %1022 = vmatprep.subr.bf16.mxu0 %v8782_v37  ;;  %1144 = vmatprep.subr.bf16.mxu1 %v8784_v38  ;;  %v8812_v37 = vcombine.high %v253_v27, %v255_v28  ;;  %v259_v38 = vld [vmem:[#allocation2 + $0xf68] sm:$0xff]  ;;  %v8814_v42 = vcombine.high %v256_v34, %v258_v35  ;;  %v8813_v49 = vcombine.low %v256_v34, %v258_v35 }
  0xed   :  { %1023 = vmatpush1.bf16.msra.mxu0 %v8781_v43  ;;  %1145 = vmatpush1.bf16.msra.mxu1 %v8783_v44  ;;  %v260_v43 = vld [vmem:[#allocation2 + $0xfc0] sm:$0xff] }
  0xee   :  { %1024 = vmatprep.subr.bf16.mxu0 %v8786_v45  ;;  %1146 = vmatprep.subr.bf16.mxu1 %v8788_v46  ;;  %v262_v44 = vld [vmem:[#allocation2 + $0x1020] sm:$0xff]  ;;  %v261_v45 = vld [vmem:[#allocation2 + $0xfc8] sm:$0xff]  ;;  %v8816_v46 = vcombine.high %v257_v36, %v259_v38 }
  0xef   :  { %v8820_v56 = vcombine.high %v261_v45, %v263_v47  ;;  %v8817_v58 = vcombine.low %v260_v43, %v262_v44 }
  0xf1   :  { %1025 = vmatpush1.bf16.msra.mxu0 %v8785_v51  ;;  %1147 = vmatpush1.bf16.msra.mxu1 %v8787_v52  ;;  %v8815_v51 = vcombine.low %v257_v36, %v259_v38  ;;  %v8818_v52 = vcombine.high %v260_v43, %v262_v44  ;;  %v290_v38 = vld [vmem:[#allocation2 + $0x1560] sm:$0xff] }
  0xf2   :  { %1026 = vmatprep.subr.bf16.mxu0 %v8790_v53  ;;  %1148 = vmatprep.subr.bf16.mxu1 %v8792_v54  ;;  %v266_v53 = vld [vmem:[#allocation2 + $0x10e0] sm:$0xff]  ;;  %v265_v54 = vld [vmem:[#allocation2 + $0x1088] sm:$0xff] }
  0xf3   :  { %v8824_v0 = vcombine.high %v265_v54, %v267_v55  ;;  %v8821_v2 = vcombine.low %v264_v50, %v266_v53 }
  0xf5   :  { %1027 = vmatpush1.bf16.msra.mxu0 %v8789_v59  ;;  %1149 = vmatpush1.bf16.msra.mxu1 %v8791_v60  ;;  %v8819_v59 = vcombine.low %v261_v45, %v263_v47  ;;  %v8822_v60 = vcombine.high %v264_v50, %v266_v53  ;;  %v294_v47 = vld [vmem:[#allocation2 + $0x1620] sm:$0xff] }
  0xf6   :  { %1028 = vmatprep.subr.bf16.mxu0 %v8794_v61  ;;  %1150 = vmatprep.subr.bf16.mxu1 %v8796_v62  ;;  %v268_v61 = vld [vmem:[#allocation2 + $0x1140] sm:$0xff] }
  0xf7   :  { %v270_v62 = vld [vmem:[#allocation2 + $0x11a0] sm:$0xff] }
  0xf8   :  { %v8825_v10 = vcombine.low %v268_v61, %v270_v62 }
  0xf9   :  { %1029 = vmatpush1.bf16.msra.mxu0 %v8793_v3  ;;  %1151 = vmatpush1.bf16.msra.mxu1 %v8795_v4  ;;  %v8823_v3 = vcombine.low %v265_v54, %v267_v55  ;;  %v8826_v4 = vcombine.high %v268_v61, %v270_v62  ;;  %v296_v55 = vld [vmem:[#allocation2 + $0x1680] sm:$0xff] }
  0xfa   :  { %1059 = vmatprep.subr.bf16.mxu0 %v8798_v5  ;;  %1181 = vmatprep.subr.bf16.mxu1 %v8800_v6  ;;  %v272_v5 = vld [vmem:[#allocation2 + $0x1200] sm:$0xff] }
  0xfb   :  { %v274_v6 = vld [vmem:[#allocation2 + $0x1260] sm:$0xff] }
  0xfc   :  { %1031 = vmatmul.mubr.bf16.vlgmr.msra.gmra.mrb[0].mxu0 %v10097_v9  ;;  %1153 = vmatmul.mubr.bf16.vlgmr.msra.gmra.mrb[0].mxu1 %v10097_v9  ;;  %v275_v9 = vld [vmem:[#allocation2 + $0x1268] sm:$0xff] }
  0xfd   :  { %1060 = vmatpush1.bf16.msra.mxu0 %v8797_v12  ;;  %1182 = vmatpush1.bf16.msra.mxu1 %v8799_v13  ;;  %v8830_v12 = vcombine.high %v272_v5, %v274_v6  ;;  %v276_v13 = vld [vmem:[#allocation2 + $0x12c0] sm:$0xff]  ;;  %v8832_v16 = vcombine.high %v273_v7, %v275_v9  ;;  %v8831_v19 = vcombine.low %v273_v7, %v275_v9  ;;  %v1276_v7 = vld [vmem:[#allocation2 + $0x10] sm:$0xff]  ;;  %v1277_v9 = vld [vmem:[#allocation2 + $0x18] sm:$0xff] }
  0xfe   :  { %1061 = vmatprep.subr.bf16.mxu0 %v8802_v14  ;;  %1183 = vmatprep.subr.bf16.mxu1 %v8804_v15  ;;  %v278_v14 = vld [vmem:[#allocation2 + $0x1320] sm:$0xff]  ;;  %v277_v15 = vld [vmem:[#allocation2 + $0x12c8] sm:$0xff] }
  0xff   :  { %1040 = vmatprep.mubr.bf16.mxu0 %v10098_v18  ;;  %1162 = vmatprep.mubr.bf16.mxu1 %v10098_v18  ;;  %v8829_v18 = vcombine.low %v272_v5, %v274_v6  ;;  %v8834_v20 = vcombine.high %v276_v13, %v278_v14  ;;  %v8833_v26 = vcombine.low %v276_v13, %v278_v14  ;;  %v10105_v14 = vld [vmem:[%s11300_s0 + $0x8] ss:$16 sps:$4 sm:$0xff]  }
 0x100   :  { %v8835_v27 = vcombine.low %v277_v15, %v279_v17 }
 0x101   :  { %1062 = vmatpush1.bf16.msra.mxu0 %v8801_v21  ;;  %1184 = vmatpush1.bf16.msra.mxu1 %v8803_v22  ;;  %v280_v21 = vld [vmem:[#allocation2 + $0x1380] sm:$0xff] }
 0x102   :  { %1063 = vmatprep.subr.bf16.mxu0 %v8806_v23  ;;  %1185 = vmatprep.subr.bf16.mxu1 %v8808_v24  ;;  %v282_v22 = vld [vmem:[#allocation2 + $0x13e0] sm:$0xff]  ;;  %v281_v23 = vld [vmem:[#allocation2 + $0x1388] sm:$0xff]  ;;  %v8836_v24 = vcombine.high %v277_v15, %v279_v17  ;;  %v1282_v17 = vld [vmem:[#allocation2 + $0x130] sm:$0xff] }
 0x103   :  { %v8838_v28 = vcombine.high %v280_v21, %v282_v22  ;;  %v8837_v34 = vcombine.low %v280_v21, %v282_v22  ;;  %v8839_v35 = vcombine.low %v281_v23, %v283_v25  ;;  %v10106_v22 = vld [vmem:[%s11300_s0 + $0x2c] ss:$16 sps:$4 sm:$0xff]  }
 0x104   :  { %1041 = vmatmul.mubr.bf16.gmra.mrb[4].mxu0 %v10100_v29  ;;  %1163 = vmatmul.mubr.bf16.gmra.mrb[4].mxu1 %v10100_v29  ;;  %v284_v29 = vld [vmem:[#allocation2 + $0x1440] sm:$0xff] }
 0x105   :  { %1064 = vmatpush1.bf16.msra.mxu0 %v8805_v31  ;;  %1186 = vmatpush1.bf16.msra.mxu1 %v8807_v32  ;;  %v285_v31 = vld [vmem:[#allocation2 + $0x1448] sm:$0xff]  ;;  %v8840_v32 = vcombine.high %v281_v23, %v283_v25  ;;  %v8842_v36 = vcombine.high %v284_v29, %v286_v30  ;;  %v8841_v43 = vcombine.low %v284_v29, %v286_v30  ;;  %v1284_v25 = vld [vmem:[#allocation2 + $0x190] sm:$0xff]  ;;  %v1287_v29 = vld [vmem:[#allocation2 + $0x1f8] sm:$0xff] }
 0x106   :  { %1065 = vmatprep.subr.bf16.mxu0 %v8810_v33  ;;  %1187 = vmatprep.subr.bf16.mxu1 %v8812_v37  ;;  %v287_v33 = vld [vmem:[#allocation2 + $0x14a8] sm:$0xff]  ;;  %v288_v37 = vld [vmem:[#allocation2 + $0x1500] sm:$0xff] }
 0x107   :  { %1050 = vmatprep.mubr.bf16.mxu0 %v10936_v39  ;;  %1172 = vmatprep.mubr.bf16.mxu1 %v10936_v39  ;;  %v8843_v44 = vcombine.low %v285_v31, %v287_v33  ;;  %v8846_v45 = vcombine.high %v288_v37, %v290_v38 }
 0x109   :  { %1066 = vmatpush1.bf16.msra.mxu0 %v8809_v40  ;;  %1188 = vmatpush1.bf16.msra.mxu1 %v8811_v41  ;;  %v289_v40 = vld [vmem:[#allocation2 + $0x1508] sm:$0xff]  ;;  %v8844_v41 = vcombine.high %v285_v31, %v287_v33  ;;  %v1288_v31 = vld [vmem:[#allocation2 + $0x250] sm:$0xff] }
 0x10a   :  { %1067 = vmatprep.subr.bf16.mxu0 %v8814_v42  ;;  %1189 = vmatprep.subr.bf16.mxu1 %v8816_v46  ;;  %v291_v42 = vld [vmem:[#allocation2 + $0x1568] sm:$0xff]  ;;  %v292_v46 = vld [vmem:[#allocation2 + $0x15c0] sm:$0xff] }
 0x10b   :  { %v8848_v50 = vcombine.high %v289_v40, %v291_v42  ;;  %v8847_v53 = vcombine.low %v289_v40, %v291_v42  ;;  %v8850_v54 = vcombine.high %v292_v46, %v294_v47  ;;  %v10108_v33 = vld [vmem:[%s11300_s0 + $0x28] ss:$16 sps:$4 sm:$0xff]  }
 0x10c   :  { %1051 = vmatmul.mubr.bf16.gmra.mrb[8].mxu0 %v10940_v48  ;;  %1173 = vmatmul.mubr.bf16.gmra.mrb[8].mxu1 %v10940_v48  ;;  %v174_v40 = vld [vmem:[%s11300_s0 + $0x48] sm:$0xff] }
 0x10d   :  { %1068 = vmatpush1.bf16.msra.mxu0 %v8813_v49  ;;  %1190 = vmatpush1.bf16.msra.mxu1 %v8815_v51  ;;  %v293_v49 = vld [vmem:[#allocation2 + $0x15c8] sm:$0xff] }
 0x10e   :  { %1069 = vmatprep.subr.bf16.mxu0 %v8818_v52  ;;  %1191 = vmatprep.subr.bf16.mxu1 %v8820_v56  ;;  %v295_v51 = vld [vmem:[#allocation2 + $0x1628] sm:$0xff]  ;;  %v8845_v52 = vcombine.low %v288_v37, %v290_v38  ;;  %v298_v56 = vld [vmem:[#allocation2 + $0x16e0] sm:$0xff]  ;;  %v1291_v37 = vld [vmem:[#allocation2 + $0x2b8] sm:$0xff] }
 0x10f   :  { %1091 = vmatprep.mubr.bf16.mxu0 %v10103_v57  ;;  %1213 = vmatprep.mubr.bf16.mxu1 %v10103_v57  ;;  %v297_v57 = vld [vmem:[#allocation2 + $0x1688] sm:$0xff]  ;;  %v8851_v61 = vcombine.low %v293_v49, %v295_v51  ;;  %v8854_v62 = vcombine.high %v296_v55, %v298_v56 }
 0x111   :  { %1070 = vmatpush1.bf16.msra.mxu0 %v8817_v58  ;;  %1192 = vmatpush1.bf16.msra.mxu1 %v8819_v59  ;;  %v8852_v58 = vcombine.high %v293_v49, %v295_v51  ;;  %v299_v59 = vld [vmem:[#allocation2 + $0x16e8] sm:$0xff]  ;;  %v10959_v49 = vcombine.high %v174_v40, %v174_v40 }
 0x112   :  { %1071 = vmatprep.subr.bf16.mxu0 %v8822_v60  ;;  %1193 = vmatprep.subr.bf16.mxu1 %v8824_v0  ;;  %v8849_v60 = vcombine.low %v292_v46, %v294_v47  ;;  %v302_v0 = vld [vmem:[#allocation2 + $0x17a0] sm:$0xff]  ;;  %v8855_v5 = vcombine.low %v297_v57, %v299_v59  ;;  %v1293_v46 = vld [vmem:[#allocation2 + $0x318] sm:$0xff] }
 0x113   :  { %v8858_v6 = vcombine.high %v300_v63, %v302_v0 }
 0x115   :  { %1072 = vmatpush1.bf16.msra.mxu0 %v8821_v2  ;;  %1194 = vmatpush1.bf16.msra.mxu1 %v8823_v3  ;;  %v8856_v2 = vcombine.high %v297_v57, %v299_v59  ;;  %v303_v3 = vld [vmem:[#allocation2 + $0x17a8] sm:$0xff]  ;;  %v10963_v59 = vcombine.low %v174_v40, %v174_v40 }
 0x116   :  { %1073 = vmatprep.subr.bf16.mxu0 %v8826_v4  ;;  %1195 = vmatprep.subr.bf16.mxu1 %v8828_v8  ;;  %v8853_v4 = vcombine.low %v296_v55, %v298_v56  ;;  %v1278_v8 = vld [vmem:[#allocation2 + $0x70] sm:$0xff]  ;;  %v8859_v13 = vcombine.low %v301_v1, %v303_v3  ;;  %v1297_v56 = vld [vmem:[#allocation2 + $0x3d8] sm:$0xff] }
 0x117   :  { %v8863_v15 = vcombine.high %v1276_v7, %v1278_v8  ;;  %v8862_v21 = vcombine.low %v1276_v7, %v1278_v8  ;;  %v1298_v55 = vld [vmem:[#allocation2 + $0x430] sm:$0xff] }
 0x118   :  { %v1304_v7 = vld [vmem:[#allocation2 + $0x550] sm:$0xff] }
 0x119   :  { %1074 = vmatpush1.bf16.msra.mxu0 %v8825_v10  ;;  %1196 = vmatpush1.bf16.msra.mxu1 %v8827_v11  ;;  %v8860_v10 = vcombine.high %v301_v1, %v303_v3  ;;  %v1279_v11 = vld [vmem:[#allocation2 + $0x78] sm:$0xff]  ;;  %v1306_v8 = vld [vmem:[#allocation2 + $0x5b0] sm:$0xff] }
 0x11a   :  { %1075 = vmatprep.subr.bf16.mxu0 %v8830_v12  ;;  %1197 = vmatprep.subr.bf16.mxu1 %v8832_v16  ;;  %v8857_v12 = vcombine.low %v300_v63, %v302_v0  ;;  %v1280_v16 = vld [vmem:[#allocation2 + $0xd0] sm:$0xff]  ;;  %v8864_v23 = vcombine.low %v1277_v9, %v1279_v11  ;;  %v1301_v1 = vld [vmem:[#allocation2 + $0x498] sm:$0xff] }
 0x11b   :  { %v8866_v30 = vcombine.low %v1280_v16, %v1282_v17  ;;  %v1300_v63 = vld [vmem:[#allocation2 + $0x490] sm:$0xff]  ;;  %v1303_v3 = vld [vmem:[#allocation2 + $0x4f8] sm:$0xff] }
 0x11c   :  { %v1302_v0 = vld [vmem:[#allocation2 + $0x4f0] sm:$0xff] }
 0x11d   :  { %1076 = vmatpush1.bf16.msra.mxu0 %v8829_v18  ;;  %1198 = vmatpush1.bf16.msra.mxu1 %v8831_v19  ;;  %v1281_v18 = vld [vmem:[#allocation2 + $0xd8] sm:$0xff]  ;;  %v8865_v19 = vcombine.high %v1277_v9, %v1279_v11 }
 0x11e   :  { %1077 = vmatprep.subr.bf16.mxu0 %v8834_v20  ;;  %1199 = vmatprep.subr.bf16.mxu1 %v8836_v24  ;;  %v1283_v20 = vld [vmem:[#allocation2 + $0x138] sm:$0xff]  ;;  %v8867_v24 = vcombine.high %v1280_v16, %v1282_v17  ;;  %v1308_v16 = vld [vmem:[#allocation2 + $0x610] sm:$0xff] }
 0x11f   :  { %v1305_v9 = vld [vmem:[#allocation2 + $0x558] sm:$0xff]  ;;  %v1310_v17 = vld [vmem:[#allocation2 + $0x670] sm:$0xff] }
 0x120   :  { %v1307_v11 = vld [vmem:[#allocation2 + $0x5b8] sm:$0xff] }
 0x121   :  { %1078 = vmatpush1.bf16.msra.mxu0 %v8833_v26  ;;  %1200 = vmatpush1.bf16.msra.mxu1 %v8835_v27  ;;  %v1286_v26 = vld [vmem:[#allocation2 + $0x1f0] sm:$0xff]  ;;  %v1285_v27 = vld [vmem:[#allocation2 + $0x198] sm:$0xff] }
 0x122   :  { %1079 = vmatprep.subr.bf16.mxu0 %v8838_v28  ;;  %1201 = vmatprep.subr.bf16.mxu1 %v8840_v32  ;;  %v8869_v28 = vcombine.high %v1281_v18, %v1283_v20  ;;  %v8868_v32 = vcombine.low %v1281_v18, %v1283_v20  ;;  %v8873_v38 = vcombine.high %v1285_v27, %v1287_v29  ;;  %v1309_v18 = vld [vmem:[#allocation2 + $0x618] sm:$0xff] }
 0x123   :  { %v8872_v42 = vcombine.low %v1285_v27, %v1287_v29  ;;  %v1311_v20 = vld [vmem:[#allocation2 + $0x678] sm:$0xff]  ;;  %v8894_v29 = vcombine.low %v1308_v16, %v1310_v17 }
 0x124   :  { %v8897_v27 = vcombine.high %v1309_v18, %v1311_v20 }
 0x125   :  { %1080 = vmatpush1.bf16.msra.mxu0 %v8837_v34  ;;  %1202 = vmatpush1.bf16.msra.mxu1 %v8839_v35  ;;  %v8871_v34 = vcombine.high %v1284_v25, %v1286_v26  ;;  %v1290_v35 = vld [vmem:[#allocation2 + $0x2b0] sm:$0xff] }
 0x126   :  { %1081 = vmatprep.subr.bf16.mxu0 %v8842_v36  ;;  %1203 = vmatprep.subr.bf16.mxu1 %v8844_v41  ;;  %v1289_v36 = vld [vmem:[#allocation2 + $0x258] sm:$0xff]  ;;  %v8870_v41 = vcombine.low %v1284_v25, %v1286_v26  ;;  %v8874_v51 = vcombine.low %v1288_v31, %v1290_v35  ;;  %v1314_v25 = vld [vmem:[#allocation2 + $0x730] sm:$0xff] }
 0x127   :  { %v8877_v47 = vcombine.high %v1289_v36, %v1291_v37  ;;  %v1313_v26 = vld [vmem:[#allocation2 + $0x6d8] sm:$0xff] }
 0x129   :  { %1082 = vmatpush1.bf16.msra.mxu0 %v8841_v43  ;;  %1204 = vmatpush1.bf16.msra.mxu1 %v8843_v44  ;;  %v8875_v43 = vcombine.high %v1288_v31, %v1290_v35  ;;  %v1292_v44 = vld [vmem:[#allocation2 + $0x310] sm:$0xff] }
 0x12a   :  { %1083 = vmatprep.subr.bf16.mxu0 %v8846_v45  ;;  %1205 = vmatprep.subr.bf16.mxu1 %v8848_v50  ;;  %v1294_v45 = vld [vmem:[#allocation2 + $0x370] sm:$0xff]  ;;  %v1295_v50 = vld [vmem:[#allocation2 + $0x378] sm:$0xff] }
 0x12b   :  { %v8881_v57 = vcombine.high %v1293_v46, %v1295_v50 }
 0x12d   :  { %1084 = vmatpush1.bf16.msra.mxu0 %v8845_v52  ;;  %1206 = vmatpush1.bf16.msra.mxu1 %v8847_v53  ;;  %v8876_v52 = vcombine.low %v1289_v36, %v1291_v37  ;;  %v8879_v53 = vcombine.high %v1292_v44, %v1294_v45  ;;  %v1319_v36 = vld [vmem:[#allocation2 + $0x7f8] sm:$0xff] }
 0x12e   :  { %1085 = vmatprep.subr.bf16.mxu0 %v8850_v54  ;;  %1207 = vmatprep.subr.bf16.mxu1 %v8852_v58  ;;  %v1296_v54 = vld [vmem:[#allocation2 + $0x3d0] sm:$0xff]  ;;  %v1299_v58 = vld [vmem:[#allocation2 + $0x438] sm:$0xff] }
 0x131   :  { %1086 = vmatpush1.bf16.msra.mxu0 %v8849_v60  ;;  %1208 = vmatpush1.bf16.msra.mxu1 %v8851_v61  ;;  %v8878_v60 = vcombine.low %v1292_v44, %v1294_v45  ;;  %v8880_v61 = vcombine.low %v1293_v46, %v1295_v50  ;;  %v1323_v45 = vld [vmem:[#allocation2 + $0x8b8] sm:$0xff] }
 0x132   :  { %1087 = vmatprep.subr.bf16.mxu0 %v8854_v62  ;;  %1209 = vmatprep.subr.bf16.mxu1 %v8856_v2  ;;  %v8883_v62 = vcombine.high %v1296_v54, %v1298_v55  ;;  %v8885_v2 = vcombine.high %v1297_v56, %v1299_v58 }
 0x135   :  { %1088 = vmatpush1.bf16.msra.mxu0 %v8853_v4  ;;  %1210 = vmatpush1.bf16.msra.mxu1 %v8855_v5  ;;  %v8882_v4 = vcombine.low %v1296_v54, %v1298_v55  ;;  %v8884_v5 = vcombine.low %v1297_v56, %v1299_v58  ;;  %v1327_v55 = vld [vmem:[#allocation2 + $0x978] sm:$0xff] }
 0x136   :  { %1089 = vmatprep.subr.bf16.mxu0 %v8858_v6  ;;  %1211 = vmatprep.subr.bf16.mxu1 %v8860_v10  ;;  %v8887_v6 = vcombine.high %v1300_v63, %v1302_v0  ;;  %v8889_v10 = vcombine.high %v1301_v1, %v1303_v3 }
 0x139   :  { %1090 = vmatpush1.bf16.msra.mxu0 %v8857_v12  ;;  %1212 = vmatpush1.bf16.msra.mxu1 %v8859_v13  ;;  %v10455_v12 = vld [vmem:[%s11300_s0 + $0x4] ss:$16 sps:$4 sm:$0xff]   ;;  %v8886_v13 = vcombine.low %v1300_v63, %v1302_v0  ;;  %v1331_v0 = vld [vmem:[#allocation2 + $0xa38] sm:$0xff] }
 0x13a   :  { %2044 = vmatprep.subr.bf16.mxu0 %v8863_v15  ;;  %2166 = vmatprep.subr.bf16.mxu1 %v8865_v19  ;;  %v8891_v15 = vcombine.high %v1304_v7, %v1306_v8  ;;  %v8893_v19 = vcombine.high %v1305_v9, %v1307_v11 }
 0x13c   :  { %1092 = vmatmul.mubr.bf16.vlgmr.msra.gmra.mrb[0].mxu0 %v10105_v14  ;;  %1214 = vmatmul.mubr.bf16.vlgmr.msra.gmra.mrb[0].mxu1 %v10105_v14  ;;  %v8888_v14 = vcombine.low %v1301_v1, %v1303_v3 }
 0x13d   :  { %2045 = vmatpush1.bf16.msra.mxu0 %v8862_v21  ;;  %2167 = vmatpush1.bf16.msra.mxu1 %v8864_v23  ;;  %v8890_v21 = vcombine.low %v1304_v7, %v1306_v8  ;;  %v8895_v23 = vcombine.high %v1308_v16, %v1310_v17  ;;  %v1335_v8 = vld [vmem:[#allocation2 + $0xaf8] sm:$0xff] }
 0x13e   :  { %2046 = vmatprep.subr.bf16.mxu0 %v8867_v24  ;;  %2168 = vmatprep.subr.bf16.mxu1 %v8869_v28  ;;  %v1312_v24 = vld [vmem:[#allocation2 + $0x6d0] sm:$0xff]  ;;  %v1315_v28 = vld [vmem:[#allocation2 + $0x738] sm:$0xff] }
 0x13f   :  { %1101 = vmatprep.mubr.bf16.mxu0 %v10106_v22  ;;  %1223 = vmatprep.mubr.bf16.mxu1 %v10106_v22  ;;  %v8892_v22 = vcombine.low %v1305_v9, %v1307_v11  ;;  %v8899_v31 = vcombine.high %v1312_v24, %v1314_v25  ;;  %v8901_v35 = vcombine.high %v1313_v26, %v1315_v28  ;;  %v1339_v16 = vld [vmem:[#allocation2 + $0xbb8] sm:$0xff] }
 0x140   :  { %v8898_v37 = vcombine.low %v1312_v24, %v1314_v25  ;;  %v1343_v24 = vld [vmem:[#allocation2 + $0xc78] sm:$0xff] }
 0x141   :  { %2047 = vmatpush1.bf16.msra.mxu0 %v8866_v30  ;;  %2169 = vmatpush1.bf16.msra.mxu1 %v8868_v32  ;;  %v8896_v30 = vcombine.low %v1309_v18, %v1311_v20  ;;  %v1316_v32 = vld [vmem:[#allocation2 + $0x790] sm:$0xff] }
 0x142   :  { %2048 = vmatprep.subr.bf16.mxu0 %v8871_v34  ;;  %2170 = vmatprep.subr.bf16.mxu1 %v8873_v38  ;;  %v1317_v34 = vld [vmem:[#allocation2 + $0x798] sm:$0xff]  ;;  %v8900_v38 = vcombine.low %v1313_v26, %v1315_v28  ;;  %v1340_v20 = vld [vmem:[#allocation2 + $0xc10] sm:$0xff] }
 0x143   :  { %v8905_v44 = vcombine.high %v1317_v34, %v1319_v36  ;;  %v1344_v28 = vld [vmem:[#allocation2 + $0xcd0] sm:$0xff] }
 0x144   :  { %1102 = vmatmul.mubr.bf16.gmra.mrb[4].mxu0 %v10108_v33  ;;  %1224 = vmatmul.mubr.bf16.gmra.mrb[4].mxu1 %v10108_v33  ;;  %v1318_v33 = vld [vmem:[#allocation2 + $0x7f0] sm:$0xff] }
 0x145   :  { %2049 = vmatpush1.bf16.msra.mxu0 %v8870_v41  ;;  %2171 = vmatpush1.bf16.msra.mxu1 %v8872_v42  ;;  %v8903_v40 = vcombine.high %v1316_v32, %v1318_v33  ;;  %v1320_v41 = vld [vmem:[#allocation2 + $0x850] sm:$0xff]  ;;  %v8902_v46 = vcombine.low %v1316_v32, %v1318_v33  ;;  %v1347_v32 = vld [vmem:[#allocation2 + $0xd38] sm:$0xff] }
 0x146   :  { %2050 = vmatprep.subr.bf16.mxu0 %v8875_v43  ;;  %2172 = vmatprep.subr.bf16.mxu1 %v8877_v47  ;;  %v1322_v42 = vld [vmem:[#allocation2 + $0x8b0] sm:$0xff]  ;;  %v1321_v43 = vld [vmem:[#allocation2 + $0x858] sm:$0xff]  ;;  %v8904_v47 = vcombine.low %v1317_v34, %v1319_v36 }
 0x147   :  { %1111 = vmatprep.mubr.bf16.mxu0 %v10959_v49  ;;  %1233 = vmatprep.mubr.bf16.mxu1 %v10959_v49  ;;  %v8907_v50 = vcombine.high %v1320_v41, %v1322_v42  ;;  %v8909_v54 = vcombine.high %v1321_v43, %v1323_v45  ;;  %v8906_v56 = vcombine.low %v1320_v41, %v1322_v42  ;;  %v1348_v36 = vld [vmem:[#allocation2 + $0xd90] sm:$0xff]  ;;  %v1351_v41 = vld [vmem:[#allocation2 + $0xdf8] sm:$0xff] }
 0x148   :  { %v10973_v42 = vld [vmem:[%s11300_s0] ss:$16 sps:$4 sm:$0xff]  }
 0x149   :  { %2051 = vmatpush1.bf16.msra.mxu0 %v8874_v51  ;;  %2173 = vmatpush1.bf16.msra.mxu1 %v8876_v52  ;;  %v1324_v51 = vld [vmem:[#allocation2 + $0x910] sm:$0xff] }
 0x14a   :  { %2052 = vmatprep.subr.bf16.mxu0 %v8879_v53  ;;  %2174 = vmatprep.subr.bf16.mxu1 %v8881_v57  ;;  %v1326_v52 = vld [vmem:[#allocation2 + $0x970] sm:$0xff]  ;;  %v1325_v53 = vld [vmem:[#allocation2 + $0x918] sm:$0xff]  ;;  %v8908_v57 = vcombine.low %v1321_v43, %v1323_v45 }
 0x14b   :  { %v8911_v58 = vcombine.high %v1324_v51, %v1326_v52  ;;  %v8913_v63 = vcombine.high %v1325_v53, %v1327_v55  ;;  %v8910_v1 = vcombine.low %v1324_v51, %v1326_v52  ;;  %v1355_v52 = vld [vmem:[#allocation2 + $0xeb8] sm:$0xff] }
 0x14c   :  { %1112 = vmatmul.mubr.bf16.gmra.mrb[8].mxu0 %v10963_v59  ;;  %1234 = vmatmul.mubr.bf16.gmra.mrb[8].mxu1 %v10963_v59 }
 0x14d   :  { %2053 = vmatpush1.bf16.msra.mxu0 %v8878_v60  ;;  %2175 = vmatpush1.bf16.msra.mxu1 %v8880_v61  ;;  %v1328_v60 = vld [vmem:[#allocation2 + $0x9d0] sm:$0xff] }
 0x14e   :  { %2054 = vmatprep.subr.bf16.mxu0 %v8883_v62  ;;  %2176 = vmatprep.subr.bf16.mxu1 %v8885_v2  ;;  %v1330_v61 = vld [vmem:[#allocation2 + $0xa30] sm:$0xff]  ;;  %v1329_v62 = vld [vmem:[#allocation2 + $0x9d8] sm:$0xff]  ;;  %v8912_v2 = vcombine.low %v1325_v53, %v1327_v55 }
 0x14f   :  { %2076 = vmatprep.mubr.bf16.mxu0 %v10455_v12  ;;  %2198 = vmatprep.mubr.bf16.mxu1 %v10455_v12  ;;  %v8915_v3 = vcombine.high %v1328_v60, %v1330_v61  ;;  %v8917_v7 = vcombine.high %v1329_v62, %v1331_v0  ;;  %v8914_v9 = vcombine.low %v1328_v60, %v1330_v61  ;;  %v1336_v12 = vld [vmem:[#allocation2 + $0xb50] sm:$0xff]  ;;  %v1357_v60 = vld [vmem:[#allocation2 + $0xf18] sm:$0xff] }
 0x150   :  { %v10980_v53 = vld [vmem:[%s11300_s0 + $0x24] ss:$16 sps:$4 sm:$0xff]  }
 0x151   :  { %2055 = vmatpush1.bf16.msra.mxu0 %v8882_v4  ;;  %2177 = vmatpush1.bf16.msra.mxu1 %v8884_v5  ;;  %v1332_v4 = vld [vmem:[#allocation2 + $0xa90] sm:$0xff] }
 0x152   :  { %2056 = vmatprep.subr.bf16.mxu0 %v8887_v6  ;;  %2178 = vmatprep.subr.bf16.mxu1 %v8889_v10  ;;  %v1334_v5 = vld [vmem:[#allocation2 + $0xaf0] sm:$0xff]  ;;  %v1333_v6 = vld [vmem:[#allocation2 + $0xa98] sm:$0xff]  ;;  %v8916_v10 = vcombine.low %v1329_v62, %v1331_v0 }
 0x153   :  { %v8919_v11 = vcombine.high %v1332_v4, %v1334_v5  ;;  %v8918_v17 = vcombine.low %v1332_v4, %v1334_v5  ;;  %v8920_v18 = vcombine.low %v1333_v6, %v1335_v8  ;;  %v1359_v62 = vld [vmem:[#allocation2 + $0xf78] sm:$0xff]  ;;  %v1362_v4 = vld [vmem:[#allocation2 + $0x1030] sm:$0xff] }
 0x154   :  { %v1361_v5 = vld [vmem:[#allocation2 + $0xfd8] sm:$0xff] }
 0x155   :  { %2057 = vmatpush1.bf16.msra.mxu0 %v8886_v13  ;;  %2179 = vmatpush1.bf16.msra.mxu1 %v8888_v14  ;;  %v1338_v13 = vld [vmem:[#allocation2 + $0xbb0] sm:$0xff]  ;;  %v1337_v14 = vld [vmem:[#allocation2 + $0xb58] sm:$0xff] }
 0x156   :  { %2058 = vmatprep.subr.bf16.mxu0 %v8891_v15  ;;  %2180 = vmatprep.subr.bf16.mxu1 %v8893_v19  ;;  %v8921_v15 = vcombine.high %v1333_v6, %v1335_v8  ;;  %v8923_v19 = vcombine.high %v1336_v12, %v1338_v13  ;;  %v8922_v25 = vcombine.low %v1336_v12, %v1338_v13  ;;  %v1366_v12 = vld [vmem:[#allocation2 + $0x10f0] sm:$0xff]  ;;  %v1365_v13 = vld [vmem:[#allocation2 + $0x1098] sm:$0xff] }
 0x157   :  { %v8924_v26 = vcombine.low %v1337_v14, %v1339_v16  ;;  %v8945_v6 = vcombine.high %v1357_v60, %v1359_v62 }
 0x159   :  { %2059 = vmatpush1.bf16.msra.mxu0 %v8890_v21  ;;  %2181 = vmatpush1.bf16.msra.mxu1 %v8892_v22  ;;  %v1342_v21 = vld [vmem:[#allocation2 + $0xc70] sm:$0xff]  ;;  %v1341_v22 = vld [vmem:[#allocation2 + $0xc18] sm:$0xff] }
 0x15a   :  { %2060 = vmatprep.subr.bf16.mxu0 %v8895_v23  ;;  %2182 = vmatprep.subr.bf16.mxu1 %v8897_v27  ;;  %v8925_v23 = vcombine.high %v1337_v14, %v1339_v16  ;;  %v8927_v27 = vcombine.high %v1340_v20, %v1342_v21  ;;  %v8926_v33 = vcombine.low %v1340_v20, %v1342_v21  ;;  %v1370_v20 = vld [vmem:[#allocation2 + $0x11b0] sm:$0xff]  ;;  %v1369_v21 = vld [vmem:[#allocation2 + $0x1158] sm:$0xff] }
 0x15b   :  { %v8928_v34 = vcombine.low %v1341_v22, %v1343_v24 }
 0x15d   :  { %2061 = vmatpush1.bf16.msra.mxu0 %v8894_v29  ;;  %2183 = vmatpush1.bf16.msra.mxu1 %v8896_v30  ;;  %v1346_v29 = vld [vmem:[#allocation2 + $0xd30] sm:$0xff]  ;;  %v1345_v30 = vld [vmem:[#allocation2 + $0xcd8] sm:$0xff] }
 0x15e   :  { %2062 = vmatprep.subr.bf16.mxu0 %v8899_v31  ;;  %2184 = vmatprep.subr.bf16.mxu1 %v8901_v35  ;;  %v8929_v31 = vcombine.high %v1341_v22, %v1343_v24  ;;  %v8931_v35 = vcombine.high %v1344_v28, %v1346_v29  ;;  %v8930_v43 = vcombine.low %v1344_v28, %v1346_v29  ;;  %v10998_v24 = vld [vmem:[%s11300_s0 + $0xc] ss:$16 sps:$4 sm:$0xff]   ;;  %v1372_v28 = vld [vmem:[#allocation2 + $0x1210] sm:$0xff] }
 0x15f   :  { %v1374_v29 = vld [vmem:[#allocation2 + $0x1270] sm:$0xff] }
 0x161   :  { %2063 = vmatpush1.bf16.msra.mxu0 %v8898_v37  ;;  %2185 = vmatpush1.bf16.msra.mxu1 %v8900_v38  ;;  %v1350_v37 = vld [vmem:[#allocation2 + $0xdf0] sm:$0xff]  ;;  %v1349_v38 = vld [vmem:[#allocation2 + $0xd98] sm:$0xff] }
 0x162   :  { %2064 = vmatprep.subr.bf16.mxu0 %v8903_v40  ;;  %2186 = vmatprep.subr.bf16.mxu1 %v8905_v44  ;;  %v8933_v40 = vcombine.high %v1345_v30, %v1347_v32  ;;  %v8932_v44 = vcombine.low %v1345_v30, %v1347_v32  ;;  %v8935_v45 = vcombine.high %v1348_v36, %v1350_v37  ;;  %v1373_v30 = vld [vmem:[#allocation2 + $0x1218] sm:$0xff] }
 0x163   :  { %v8937_v51 = vcombine.high %v1349_v38, %v1351_v41  ;;  %v8936_v55 = vcombine.low %v1349_v38, %v1351_v41  ;;  %v1375_v32 = vld [vmem:[#allocation2 + $0x1278] sm:$0xff] }
 0x164   :  { %v1377_v38 = vld [vmem:[#allocation2 + $0x12d8] sm:$0xff] }
 0x165   :  { %2065 = vmatpush1.bf16.msra.mxu0 %v8902_v46  ;;  %2187 = vmatpush1.bf16.msra.mxu1 %v8904_v47  ;;  %v1352_v46 = vld [vmem:[#allocation2 + $0xe50] sm:$0xff]  ;;  %v1379_v41 = vld [vmem:[#allocation2 + $0x1338] sm:$0xff] }
 0x166   :  { %2066 = vmatprep.subr.bf16.mxu0 %v8907_v50  ;;  %2188 = vmatprep.subr.bf16.mxu1 %v8909_v54  ;;  %v1354_v47 = vld [vmem:[#allocation2 + $0xeb0] sm:$0xff]  ;;  %v1353_v50 = vld [vmem:[#allocation2 + $0xe58] sm:$0xff]  ;;  %v8934_v54 = vcombine.low %v1348_v36, %v1350_v37 }
 0x167   :  { %v8941_v61 = vcombine.high %v1353_v50, %v1355_v52  ;;  %v8938_v0 = vcombine.low %v1352_v46, %v1354_v47  ;;  %v1376_v36 = vld [vmem:[#allocation2 + $0x12d0] sm:$0xff] }
 0x168   :  { %v1378_v37 = vld [vmem:[#allocation2 + $0x1330] sm:$0xff] }
 0x169   :  { %2067 = vmatpush1.bf16.msra.mxu0 %v8906_v56  ;;  %2189 = vmatpush1.bf16.msra.mxu1 %v8908_v57  ;;  %v8939_v56 = vcombine.high %v1352_v46, %v1354_v47  ;;  %v1356_v57 = vld [vmem:[#allocation2 + $0xf10] sm:$0xff]  ;;  %v8965_v46 = vcombine.high %v1377_v38, %v1379_v41 }
 0x16a   :  { %2068 = vmatprep.subr.bf16.mxu0 %v8911_v58  ;;  %2190 = vmatprep.subr.bf16.mxu1 %v8913_v63  ;;  %v1358_v58 = vld [vmem:[#allocation2 + $0xf70] sm:$0xff] }
 0x16b   :  { %v10987_v63 = vld [vmem:[%s11300_s0 + $0x20] ss:$16 sps:$4 sm:$0xff]   ;;  %v8942_v8 = vcombine.low %v1356_v57, %v1358_v58 }
 0x16c   :  { %v1380_v47 = vld [vmem:[#allocation2 + $0x1390] sm:$0xff] }
 0x16d   :  { %2069 = vmatpush1.bf16.msra.mxu0 %v8910_v1  ;;  %2191 = vmatpush1.bf16.msra.mxu1 %v8912_v2  ;;  %v8940_v1 = vcombine.low %v1353_v50, %v1355_v52  ;;  %v8943_v2 = vcombine.high %v1356_v57, %v1358_v58  ;;  %v1382_v50 = vld [vmem:[#allocation2 + $0x13f0] sm:$0xff]  ;;  %v1383_v52 = vld [vmem:[#allocation2 + $0x13f8] sm:$0xff] }
 0x16e   :  { %2070 = vmatprep.subr.bf16.mxu0 %v8915_v3  ;;  %2192 = vmatprep.subr.bf16.mxu1 %v8917_v7  ;;  %v1360_v3 = vld [vmem:[#allocation2 + $0xfd0] sm:$0xff]  ;;  %v1363_v7 = vld [vmem:[#allocation2 + $0x1038] sm:$0xff] }
 0x16f   :  { %v8949_v14 = vcombine.high %v1361_v5, %v1363_v7  ;;  %v8946_v16 = vcombine.low %v1360_v3, %v1362_v4  ;;  %v1384_v58 = vld [vmem:[#allocation2 + $0x1450] sm:$0xff] }
 0x171   :  { %2071 = vmatpush1.bf16.msra.mxu0 %v8914_v9  ;;  %2193 = vmatpush1.bf16.msra.mxu1 %v8916_v10  ;;  %v8944_v9 = vcombine.low %v1357_v60, %v1359_v62  ;;  %v8947_v10 = vcombine.high %v1360_v3, %v1362_v4  ;;  %v1386_v60 = vld [vmem:[#allocation2 + $0x14b0] sm:$0xff]  ;;  %v1387_v62 = vld [vmem:[#allocation2 + $0x14b8] sm:$0xff] }
 0x172   :  { %2072 = vmatprep.subr.bf16.mxu0 %v8919_v11  ;;  %2194 = vmatprep.subr.bf16.mxu1 %v8921_v15  ;;  %v1364_v11 = vld [vmem:[#allocation2 + $0x1090] sm:$0xff]  ;;  %v1367_v15 = vld [vmem:[#allocation2 + $0x10f8] sm:$0xff] }
 0x173   :  { %v8953_v22 = vcombine.high %v1365_v13, %v1367_v15  ;;  %v1388_v4 = vld [vmem:[#allocation2 + $0x1510] sm:$0xff] }
 0x175   :  { %2073 = vmatpush1.bf16.msra.mxu0 %v8918_v17  ;;  %2195 = vmatpush1.bf16.msra.mxu1 %v8920_v18  ;;  %v8948_v17 = vcombine.low %v1361_v5, %v1363_v7  ;;  %v8951_v18 = vcombine.high %v1364_v11, %v1366_v12  ;;  %v1390_v5 = vld [vmem:[#allocation2 + $0x1570] sm:$0xff]  ;;  %v1391_v7 = vld [vmem:[#allocation2 + $0x1578] sm:$0xff] }
 0x176   :  { %2074 = vmatprep.subr.bf16.mxu0 %v8923_v19  ;;  %2196 = vmatprep.subr.bf16.mxu1 %v8925_v23  ;;  %v1368_v19 = vld [vmem:[#allocation2 + $0x1150] sm:$0xff]  ;;  %v1371_v23 = vld [vmem:[#allocation2 + $0x11b8] sm:$0xff] }
 0x179   :  { %2075 = vmatpush1.bf16.msra.mxu0 %v8922_v25  ;;  %2197 = vmatpush1.bf16.msra.mxu1 %v8924_v26  ;;  %v8950_v25 = vcombine.low %v1364_v11, %v1366_v12  ;;  %v8952_v26 = vcombine.low %v1365_v13, %v1367_v15  ;;  %v1392_v12 = vld [vmem:[#allocation2 + $0x15d0] sm:$0xff]  ;;  %v1395_v15 = vld [vmem:[#allocation2 + $0x1638] sm:$0xff] }
 0x17a   :  { %2105 = vmatprep.subr.bf16.mxu0 %v8927_v27  ;;  %2227 = vmatprep.subr.bf16.mxu1 %v8929_v31  ;;  %v8955_v27 = vcombine.high %v1368_v19, %v1370_v20  ;;  %v8957_v31 = vcombine.high %v1369_v21, %v1371_v23  ;;  %v1394_v13 = vld [vmem:[#allocation2 + $0x1630] sm:$0xff] }
 0x17c   :  { %2077 = vmatmul.mubr.bf16.vlgmr.msra.gmra.mrb[12].mxu0 %v10973_v42  ;;  %2199 = vmatmul.mubr.bf16.vlgmr.msra.gmra.mrb[12].mxu1 %v10973_v42 }
 0x17d   :  { %2106 = vmatpush1.bf16.msra.mxu0 %v8926_v33  ;;  %2228 = vmatpush1.bf16.msra.mxu1 %v8928_v34  ;;  %v8954_v33 = vcombine.low %v1368_v19, %v1370_v20  ;;  %v8956_v34 = vcombine.low %v1369_v21, %v1371_v23  ;;  %v1396_v20 = vld [vmem:[#allocation2 + $0x1690] sm:$0xff]  ;;  %v1399_v23 = vld [vmem:[#allocation2 + $0x16f8] sm:$0xff] }
 0x17e   :  { %2107 = vmatprep.subr.bf16.mxu0 %v8931_v35  ;;  %2229 = vmatprep.subr.bf16.mxu1 %v8933_v40  ;;  %v8959_v35 = vcombine.high %v1372_v28, %v1374_v29  ;;  %v8961_v40 = vcombine.high %v1373_v30, %v1375_v32  ;;  %v1398_v21 = vld [vmem:[#allocation2 + $0x16f0] sm:$0xff] }
 0x17f   :  { %2086 = vmatprep.mubr.bf16.mxu0 %v10980_v53  ;;  %2208 = vmatprep.mubr.bf16.mxu1 %v10980_v53 }
 0x181   :  { %2108 = vmatpush1.bf16.msra.mxu0 %v8930_v43  ;;  %2230 = vmatpush1.bf16.msra.mxu1 %v8932_v44  ;;  %v8958_v43 = vcombine.low %v1372_v28, %v1374_v29  ;;  %v8960_v44 = vcombine.low %v1373_v30, %v1375_v32  ;;  %v1400_v29 = vld [vmem:[#allocation2 + $0x1750] sm:$0xff]  ;;  %v1403_v32 = vld [vmem:[#allocation2 + $0x17b8] sm:$0xff] }
 0x182   :  { %2109 = vmatprep.subr.bf16.mxu0 %v8935_v45  ;;  %2231 = vmatprep.subr.bf16.mxu1 %v8937_v51  ;;  %v8963_v45 = vcombine.high %v1376_v36, %v1378_v37  ;;  %v1381_v51 = vld [vmem:[#allocation2 + $0x1398] sm:$0xff]  ;;  %v1402_v30 = vld [vmem:[#allocation2 + $0x17b0] sm:$0xff] }
 0x183   :  { %v8969_v57 = vcombine.high %v1381_v51, %v1383_v52 }
 0x184   :  { %2087 = vmatmul.mubr.bf16.gmra.mrb[16].mxu0 %v10987_v63  ;;  %2209 = vmatmul.mubr.bf16.gmra.mrb[16].mxu1 %v10987_v63 }
 0x185   :  { %2110 = vmatpush1.bf16.msra.mxu0 %v8934_v54  ;;  %2232 = vmatpush1.bf16.msra.mxu1 %v8936_v55  ;;  %v8962_v54 = vcombine.low %v1376_v36, %v1378_v37  ;;  %v8964_v55 = vcombine.low %v1377_v38, %v1379_v41  ;;  %v2316_v37 = vld [vmem:[#allocation2 + $0x20] sm:$0xff]  ;;  %v2319_v41 = vld [vmem:[#allocation2 + $0x88] sm:$0xff] }
 0x186   :  { %2111 = vmatprep.subr.bf16.mxu0 %v8939_v56  ;;  %2233 = vmatprep.subr.bf16.mxu1 %v8941_v61  ;;  %v8967_v56 = vcombine.high %v1380_v47, %v1382_v50  ;;  %v1385_v61 = vld [vmem:[#allocation2 + $0x1458] sm:$0xff]  ;;  %v2318_v38 = vld [vmem:[#allocation2 + $0x80] sm:$0xff] }
 0x187   :  { %2096 = vmatprep.mubr.bf16.mxu0 %v10936_v39  ;;  %2218 = vmatprep.mubr.bf16.mxu1 %v10936_v39  ;;  %v8973_v3 = vcombine.high %v1385_v61, %v1387_v62 }
 0x189   :  { %2112 = vmatpush1.bf16.msra.mxu0 %v8938_v0  ;;  %2234 = vmatpush1.bf16.msra.mxu1 %v8940_v1  ;;  %v8966_v0 = vcombine.low %v1380_v47, %v1382_v50  ;;  %v8968_v1 = vcombine.low %v1381_v51, %v1383_v52  ;;  %v2320_v47 = vld [vmem:[#allocation2 + $0xe0] sm:$0xff]  ;;  %v2321_v51 = vld [vmem:[#allocation2 + $0xe8] sm:$0xff] }
 0x18a   :  { %2113 = vmatprep.subr.bf16.mxu0 %v8943_v2  ;;  %2235 = vmatprep.subr.bf16.mxu1 %v8945_v6  ;;  %v8971_v2 = vcombine.high %v1384_v58, %v1386_v60  ;;  %v1389_v6 = vld [vmem:[#allocation2 + $0x1518] sm:$0xff]  ;;  %v2322_v50 = vld [vmem:[#allocation2 + $0x140] sm:$0xff]  ;;  %v2323_v52 = vld [vmem:[#allocation2 + $0x148] sm:$0xff] }
 0x18b   :  { %v8977_v11 = vcombine.high %v1389_v6, %v1391_v7 }
 0x18c   :  { %2097 = vmatmul.mubr.bf16.gmra.mrb[20].mxu0 %v10940_v48  ;;  %2219 = vmatmul.mubr.bf16.gmra.mrb[20].mxu1 %v10940_v48 }
 0x18d   :  { %2114 = vmatpush1.bf16.msra.mxu0 %v8942_v8  ;;  %2236 = vmatpush1.bf16.msra.mxu1 %v8944_v9  ;;  %v8970_v8 = vcombine.low %v1384_v58, %v1386_v60  ;;  %v8972_v9 = vcombine.low %v1385_v61, %v1387_v62  ;;  %v2324_v58 = vld [vmem:[#allocation2 + $0x1a0] sm:$0xff]  ;;  %v11005_v61 = vld [vmem:[%s11300_s0 + $0x8] ss:$16 sps:$4 sm:$0xff]  }
 0x18e   :  { %2115 = vmatprep.subr.bf16.mxu0 %v8947_v10  ;;  %2237 = vmatprep.subr.bf16.mxu1 %v8949_v14  ;;  %v8975_v10 = vcombine.high %v1388_v4, %v1390_v5  ;;  %v1393_v14 = vld [vmem:[#allocation2 + $0x15d8] sm:$0xff]  ;;  %v2326_v60 = vld [vmem:[#allocation2 + $0x200] sm:$0xff]  ;;  %v2325_v62 = vld [vmem:[#allocation2 + $0x1a8] sm:$0xff] }
 0x18f   :  { %2137 = vmatprep.mubr.bf16.mxu0 %v10998_v24  ;;  %2259 = vmatprep.mubr.bf16.mxu1 %v10998_v24  ;;  %v8981_v19 = vcombine.high %v1393_v14, %v1395_v15 }
 0x191   :  { %2116 = vmatpush1.bf16.msra.mxu0 %v8946_v16  ;;  %2238 = vmatpush1.bf16.msra.mxu1 %v8948_v17  ;;  %v8974_v16 = vcombine.low %v1388_v4, %v1390_v5  ;;  %v8976_v17 = vcombine.low %v1389_v6, %v1391_v7  ;;  %v11012_v4 = vld [vmem:[%s11300_s0 + $0x2c] ss:$16 sps:$4 sm:$0xff]   ;;  %v2328_v6 = vld [vmem:[#allocation2 + $0x260] sm:$0xff] }
 0x192   :  { %2117 = vmatprep.subr.bf16.mxu0 %v8951_v18  ;;  %2239 = vmatprep.subr.bf16.mxu1 %v8953_v22  ;;  %v8979_v18 = vcombine.high %v1392_v12, %v1394_v13  ;;  %v1397_v22 = vld [vmem:[#allocation2 + $0x1698] sm:$0xff]  ;;  %v2330_v7 = vld [vmem:[#allocation2 + $0x2c0] sm:$0xff] }
 0x193   :  { %v8985_v28 = vcombine.high %v1397_v22, %v1399_v23 }
 0x195   :  { %2118 = vmatpush1.bf16.msra.mxu0 %v8950_v25  ;;  %2240 = vmatpush1.bf16.msra.mxu1 %v8952_v26  ;;  %v8978_v25 = vcombine.low %v1392_v12, %v1394_v13  ;;  %v8980_v26 = vcombine.low %v1393_v14, %v1395_v15  ;;  %v9003_v12 = vcombine.high %v2328_v6, %v2330_v7  ;;  %v2332_v14 = vld [vmem:[#allocation2 + $0x320] sm:$0xff] }
 0x196   :  { %2119 = vmatprep.subr.bf16.mxu0 %v8955_v27  ;;  %2241 = vmatprep.subr.bf16.mxu1 %v8957_v31  ;;  %v8983_v27 = vcombine.high %v1396_v20, %v1398_v21  ;;  %v1401_v31 = vld [vmem:[#allocation2 + $0x1758] sm:$0xff]  ;;  %v2334_v15 = vld [vmem:[#allocation2 + $0x380] sm:$0xff] }
 0x197   :  { %v8989_v36 = vcombine.high %v1401_v31, %v1403_v32 }
 0x199   :  { %2120 = vmatpush1.bf16.msra.mxu0 %v8954_v33  ;;  %2242 = vmatpush1.bf16.msra.mxu1 %v8956_v34  ;;  %v8982_v33 = vcombine.low %v1396_v20, %v1398_v21  ;;  %v8984_v34 = vcombine.low %v1397_v22, %v1399_v23  ;;  %v9007_v21 = vcombine.high %v2332_v14, %v2334_v15  ;;  %v2336_v23 = vld [vmem:[#allocation2 + $0x3e0] sm:$0xff] }
 0x19a   :  { %2121 = vmatprep.subr.bf16.mxu0 %v8959_v35  ;;  %2243 = vmatprep.subr.bf16.mxu1 %v8961_v40  ;;  %v8987_v35 = vcombine.high %v1400_v29, %v1402_v30  ;;  %v2317_v40 = vld [vmem:[#allocation2 + $0x28] sm:$0xff] }
 0x19d   :  { %2122 = vmatpush1.bf16.msra.mxu0 %v8958_v43  ;;  %2244 = vmatpush1.bf16.msra.mxu1 %v8960_v44  ;;  %v8986_v43 = vcombine.low %v1400_v29, %v1402_v30  ;;  %v8988_v44 = vcombine.low %v1401_v31, %v1403_v32  ;;  %v2340_v32 = vld [vmem:[#allocation2 + $0x4a0] sm:$0xff] }
 0x19e   :  { %2123 = vmatprep.subr.bf16.mxu0 %v8963_v45  ;;  %2245 = vmatprep.subr.bf16.mxu1 %v8965_v46  ;;  %v8991_v45 = vcombine.high %v2316_v37, %v2318_v38  ;;  %v8993_v46 = vcombine.high %v2317_v40, %v2319_v41 }
 0x1a1   :  { %2124 = vmatpush1.bf16.msra.mxu0 %v8962_v54  ;;  %2246 = vmatpush1.bf16.msra.mxu1 %v8964_v55  ;;  %v8990_v54 = vcombine.low %v2316_v37, %v2318_v38  ;;  %v8992_v55 = vcombine.low %v2317_v40, %v2319_v41  ;;  %v2344_v41 = vld [vmem:[#allocation2 + $0x560] sm:$0xff] }
 0x1a2   :  { %2125 = vmatprep.subr.bf16.mxu0 %v8967_v56  ;;  %2247 = vmatprep.subr.bf16.mxu1 %v8969_v57  ;;  %v8995_v56 = vcombine.high %v2320_v47, %v2322_v50  ;;  %v8997_v57 = vcombine.high %v2321_v51, %v2323_v52 }
 0x1a5   :  { %2126 = vmatpush1.bf16.msra.mxu0 %v8966_v0  ;;  %2248 = vmatpush1.bf16.msra.mxu1 %v8968_v1  ;;  %v2327_v0 = vld [vmem:[#allocation2 + $0x208] sm:$0xff]  ;;  %v8994_v1 = vcombine.low %v2320_v47, %v2322_v50 }
 0x1a6   :  { %2127 = vmatprep.subr.bf16.mxu0 %v8971_v2  ;;  %2249 = vmatprep.subr.bf16.mxu1 %v8973_v3  ;;  %v8996_v2 = vcombine.low %v2321_v51, %v2323_v52  ;;  %v8999_v3 = vcombine.high %v2324_v58, %v2326_v60  ;;  %v9001_v5 = vcombine.high %v2325_v62, %v2327_v0 }
 0x1a9   :  { %2128 = vmatpush1.bf16.msra.mxu0 %v8970_v8  ;;  %2250 = vmatpush1.bf16.msra.mxu1 %v8972_v9  ;;  %v2329_v8 = vld [vmem:[#allocation2 + $0x268] sm:$0xff] }
 0x1aa   :  { %2129 = vmatprep.subr.bf16.mxu0 %v8975_v10  ;;  %2251 = vmatprep.subr.bf16.mxu1 %v8977_v11  ;;  %v2331_v9 = vld [vmem:[#allocation2 + $0x2c8] sm:$0xff]  ;;  %v8998_v10 = vcombine.low %v2324_v58, %v2326_v60  ;;  %v9000_v11 = vcombine.low %v2325_v62, %v2327_v0 }
 0x1ab   :  { %v9005_v13 = vcombine.high %v2329_v8, %v2331_v9  ;;  %v9004_v20 = vcombine.low %v2329_v8, %v2331_v9 }
 0x1ad   :  { %2130 = vmatpush1.bf16.msra.mxu0 %v8974_v16  ;;  %2252 = vmatpush1.bf16.msra.mxu1 %v8976_v17  ;;  %v11019_v16 = vld [vmem:[%s11300_s0 + $0x28] ss:$16 sps:$4 sm:$0xff]  }
 0x1ae   :  { %2131 = vmatprep.subr.bf16.mxu0 %v8979_v18  ;;  %2253 = vmatprep.subr.bf16.mxu1 %v8981_v19  ;;  %v2333_v17 = vld [vmem:[#allocation2 + $0x328] sm:$0xff]  ;;  %v9002_v19 = vcombine.low %v2328_v6, %v2330_v7 }
 0x1af   :  { %v2335_v18 = vld [vmem:[#allocation2 + $0x388] sm:$0xff] }
 0x1b0   :  { %v9009_v22 = vcombine.high %v2333_v17, %v2335_v18  ;;  %v9008_v29 = vcombine.low %v2333_v17, %v2335_v18 }
 0x1b1   :  { %2132 = vmatpush1.bf16.msra.mxu0 %v8978_v25  ;;  %2254 = vmatpush1.bf16.msra.mxu1 %v8980_v26  ;;  %v2338_v25 = vld [vmem:[#allocation2 + $0x440] sm:$0xff]  ;;  %v2337_v26 = vld [vmem:[#allocation2 + $0x3e8] sm:$0xff] }
 0x1b2   :  { %2133 = vmatprep.subr.bf16.mxu0 %v8983_v27  ;;  %2255 = vmatprep.subr.bf16.mxu1 %v8985_v28  ;;  %v2339_v27 = vld [vmem:[#allocation2 + $0x448] sm:$0xff]  ;;  %v9006_v28 = vcombine.low %v2332_v14, %v2334_v15  ;;  %v9011_v30 = vcombine.high %v2336_v23, %v2338_v25 }
 0x1b3   :  { %v9013_v31 = vcombine.high %v2337_v26, %v2339_v27  ;;  %v9012_v37 = vcombine.low %v2337_v26, %v2339_v27 }
 0x1b5   :  { %2134 = vmatpush1.bf16.msra.mxu0 %v8982_v33  ;;  %2256 = vmatpush1.bf16.msra.mxu1 %v8984_v34  ;;  %v2342_v33 = vld [vmem:[#allocation2 + $0x500] sm:$0xff]  ;;  %v2341_v34 = vld [vmem:[#allocation2 + $0x4a8] sm:$0xff] }
 0x1b6   :  { %2135 = vmatprep.subr.bf16.mxu0 %v8987_v35  ;;  %2257 = vmatprep.subr.bf16.mxu1 %v8989_v36  ;;  %v2343_v35 = vld [vmem:[#allocation2 + $0x508] sm:$0xff]  ;;  %v9010_v36 = vcombine.low %v2336_v23, %v2338_v25  ;;  %v9015_v38 = vcombine.high %v2340_v32, %v2342_v33  ;;  %v9014_v47 = vcombine.low %v2340_v32, %v2342_v33 }
 0x1b7   :  { %v9017_v40 = vcombine.high %v2341_v34, %v2343_v35  ;;  %v9016_v50 = vcombine.low %v2341_v34, %v2343_v35 }
 0x1b9   :  { %2136 = vmatpush1.bf16.msra.mxu0 %v8986_v43  ;;  %2258 = vmatpush1.bf16.msra.mxu1 %v8988_v44  ;;  %v2346_v43 = vld [vmem:[#allocation2 + $0x5c0] sm:$0xff] }
 0x1ba   :  { %3084 = vmatprep.subr.bf16.mxu0 %v8991_v45  ;;  %3206 = vmatprep.subr.bf16.mxu1 %v8993_v46  ;;  %v11030_v44 = vld [vmem:[%s11300_s0 + $0x4] ss:$16 sps:$4 sm:$0xff]   ;;  %v2345_v45 = vld [vmem:[#allocation2 + $0x568] sm:$0xff]  ;;  %v9019_v51 = vcombine.high %v2344_v41, %v2346_v43  ;;  %v9018_v58 = vcombine.low %v2344_v41, %v2346_v43 }
 0x1bb   :  { %v2347_v46 = vld [vmem:[#allocation2 + $0x5c8] sm:$0xff] }
 0x1bc   :  { %2138 = vmatmul.mubr.bf16.vlgmr.msra.gmra.mrb[12].mxu0 %v11005_v61  ;;  %2260 = vmatmul.mubr.bf16.vlgmr.msra.gmra.mrb[12].mxu1 %v11005_v61  ;;  %v9021_v52 = vcombine.high %v2345_v45, %v2347_v46  ;;  %v9020_v60 = vcombine.low %v2345_v45, %v2347_v46 }
 0x1bd   :  { %3085 = vmatpush1.bf16.msra.mxu0 %v8990_v54  ;;  %3207 = vmatpush1.bf16.msra.mxu1 %v8992_v55  ;;  %v2348_v54 = vld [vmem:[#allocation2 + $0x620] sm:$0xff] }
 0x1be   :  { %3086 = vmatprep.subr.bf16.mxu0 %v8995_v56  ;;  %3208 = vmatprep.subr.bf16.mxu1 %v8997_v57  ;;  %v2350_v55 = vld [vmem:[#allocation2 + $0x680] sm:$0xff]  ;;  %v2349_v56 = vld [vmem:[#allocation2 + $0x628] sm:$0xff] }
 0x1bf   :  { %2147 = vmatprep.mubr.bf16.mxu0 %v11012_v4  ;;  %2269 = vmatprep.mubr.bf16.mxu1 %v11012_v4  ;;  %v2351_v57 = vld [vmem:[#allocation2 + $0x688] sm:$0xff]  ;;  %v9023_v62 = vcombine.high %v2348_v54, %v2350_v55  ;;  %v9022_v6 = vcombine.low %v2348_v54, %v2350_v55 }
 0x1c0   :  { %v9025_v0 = vcombine.high %v2349_v56, %v2351_v57  ;;  %v9024_v7 = vcombine.low %v2349_v56, %v2351_v57 }
 0x1c1   :  { %3087 = vmatpush1.bf16.msra.mxu0 %v8994_v1  ;;  %3209 = vmatpush1.bf16.msra.mxu1 %v8996_v2  ;;  %v2352_v1 = vld [vmem:[#allocation2 + $0x6e0] sm:$0xff] }
 0x1c2   :  { %3088 = vmatprep.subr.bf16.mxu0 %v8999_v3  ;;  %3210 = vmatprep.subr.bf16.mxu1 %v9001_v5  ;;  %v2354_v2 = vld [vmem:[#allocation2 + $0x740] sm:$0xff]  ;;  %v2353_v3 = vld [vmem:[#allocation2 + $0x6e8] sm:$0xff] }
 0x1c3   :  { %v2355_v5 = vld [vmem:[#allocation2 + $0x748] sm:$0xff]  ;;  %v9027_v8 = vcombine.high %v2352_v1, %v2354_v2  ;;  %v9026_v14 = vcombine.low %v2352_v1, %v2354_v2 }
 0x1c4   :  { %2148 = vmatmul.mubr.bf16.gmra.mrb[16].mxu0 %v11019_v16  ;;  %2270 = vmatmul.mubr.bf16.gmra.mrb[16].mxu1 %v11019_v16  ;;  %v9029_v9 = vcombine.high %v2353_v3, %v2355_v5  ;;  %v9028_v15 = vcombine.low %v2353_v3, %v2355_v5 }
 0x1c5   :  { %3089 = vmatpush1.bf16.msra.mxu0 %v8998_v10  ;;  %3211 = vmatpush1.bf16.msra.mxu1 %v9000_v11  ;;  %v2356_v10 = vld [vmem:[#allocation2 + $0x7a0] sm:$0xff] }
 0x1c6   :  { %3090 = vmatprep.subr.bf16.mxu0 %v9003_v12  ;;  %3212 = vmatprep.subr.bf16.mxu1 %v9005_v13  ;;  %v2358_v11 = vld [vmem:[#allocation2 + $0x800] sm:$0xff]  ;;  %v2357_v12 = vld [vmem:[#allocation2 + $0x7a8] sm:$0xff] }
 0x1c7   :  { %2157 = vmatprep.mubr.bf16.mxu0 %v10959_v49  ;;  %2279 = vmatprep.mubr.bf16.mxu1 %v10959_v49  ;;  %v2359_v13 = vld [vmem:[#allocation2 + $0x808] sm:$0xff]  ;;  %v9031_v17 = vcombine.high %v2356_v10, %v2358_v11  ;;  %v9030_v23 = vcombine.low %v2356_v10, %v2358_v11 }
 0x1c8   :  { %v9033_v18 = vcombine.high %v2357_v12, %v2359_v13  ;;  %v9032_v25 = vcombine.low %v2357_v12, %v2359_v13 }
 0x1c9   :  { %3091 = vmatpush1.bf16.msra.mxu0 %v9002_v19  ;;  %3213 = vmatpush1.bf16.msra.mxu1 %v9004_v20  ;;  %v2360_v19 = vld [vmem:[#allocation2 + $0x860] sm:$0xff] }
 0x1ca   :  { %3092 = vmatprep.subr.bf16.mxu0 %v9007_v21  ;;  %3214 = vmatprep.subr.bf16.mxu1 %v9009_v22  ;;  %v2362_v20 = vld [vmem:[#allocation2 + $0x8c0] sm:$0xff]  ;;  %v2361_v21 = vld [vmem:[#allocation2 + $0x868] sm:$0xff] }
 0x1cb   :  { %v2363_v22 = vld [vmem:[#allocation2 + $0x8c8] sm:$0xff]  ;;  %v9035_v26 = vcombine.high %v2360_v19, %v2362_v20  ;;  %v9034_v32 = vcombine.low %v2360_v19, %v2362_v20 }
 0x1cc   :  { %2158 = vmatmul.mubr.bf16.gmra.mrb[20].mxu0 %v10963_v59  ;;  %2280 = vmatmul.mubr.bf16.gmra.mrb[20].mxu1 %v10963_v59  ;;  %v9037_v27 = vcombine.high %v2361_v21, %v2363_v22  ;;  %v9036_v33 = vcombine.low %v2361_v21, %v2363_v22 }
 0x1cd   :  { %3093 = vmatpush1.bf16.msra.mxu0 %v9006_v28  ;;  %3215 = vmatpush1.bf16.msra.mxu1 %v9008_v29  ;;  %v2364_v28 = vld [vmem:[#allocation2 + $0x920] sm:$0xff] }
 0x1ce   :  { %3094 = vmatprep.subr.bf16.mxu0 %v9011_v30  ;;  %3216 = vmatprep.subr.bf16.mxu1 %v9013_v31  ;;  %v2366_v29 = vld [vmem:[#allocation2 + $0x980] sm:$0xff]  ;;  %v2365_v30 = vld [vmem:[#allocation2 + $0x928] sm:$0xff] }
 0x1cf   :  { %3116 = vmatprep.mubr.bf16.mxu0 %v11030_v44  ;;  %3238 = vmatprep.mubr.bf16.mxu1 %v11030_v44  ;;  %v2367_v31 = vld [vmem:[#allocation2 + $0x988] sm:$0xff]  ;;  %v9039_v34 = vcombine.high %v2364_v28, %v2366_v29  ;;  %v9038_v41 = vcombine.low %v2364_v28, %v2366_v29 }
 0x1d0   :  { %v9041_v35 = vcombine.high %v2365_v30, %v2367_v31  ;;  %v9040_v43 = vcombine.low %v2365_v30, %v2367_v31 }
 0x1d1   :  { %3095 = vmatpush1.bf16.msra.mxu0 %v9010_v36  ;;  %3217 = vmatpush1.bf16.msra.mxu1 %v9012_v37  ;;  %v2368_v36 = vld [vmem:[#allocation2 + $0x9e0] sm:$0xff] }
 0x1d2   :  { %3096 = vmatprep.subr.bf16.mxu0 %v9015_v38  ;;  %3218 = vmatprep.subr.bf16.mxu1 %v9017_v40  ;;  %v2370_v37 = vld [vmem:[#allocation2 + $0xa40] sm:$0xff]  ;;  %v2369_v38 = vld [vmem:[#allocation2 + $0x9e8] sm:$0xff] }
 0x1d3   :  { %v2371_v40 = vld [vmem:[#allocation2 + $0xa48] sm:$0xff]  ;;  %v9043_v45 = vcombine.high %v2368_v36, %v2370_v37  ;;  %v9042_v54 = vcombine.low %v2368_v36, %v2370_v37 }
 0x1d4   :  { %v9045_v46 = vcombine.high %v2369_v38, %v2371_v40  ;;  %v9044_v55 = vcombine.low %v2369_v38, %v2371_v40  ;;  %v2396_v40 = vld [vmem:[#allocation2 + $0xf20] sm:$0xff] }
 0x1d5   :  { %3097 = vmatpush1.bf16.msra.mxu0 %v9014_v47  ;;  %3219 = vmatpush1.bf16.msra.mxu1 %v9016_v50  ;;  %v2372_v47 = vld [vmem:[#allocation2 + $0xaa0] sm:$0xff] }
 0x1d6   :  { %3098 = vmatprep.subr.bf16.mxu0 %v9019_v51  ;;  %3220 = vmatprep.subr.bf16.mxu1 %v9021_v52  ;;  %v2374_v50 = vld [vmem:[#allocation2 + $0xb00] sm:$0xff]  ;;  %v2373_v51 = vld [vmem:[#allocation2 + $0xaa8] sm:$0xff] }
 0x1d7   :  { %v2375_v52 = vld [vmem:[#allocation2 + $0xb08] sm:$0xff]  ;;  %v9047_v56 = vcombine.high %v2372_v47, %v2374_v50  ;;  %v9046_v1 = vcombine.low %v2372_v47, %v2374_v50 }
 0x1d8   :  { %v9049_v57 = vcombine.high %v2373_v51, %v2375_v52  ;;  %v9048_v2 = vcombine.low %v2373_v51, %v2375_v52  ;;  %v2400_v51 = vld [vmem:[#allocation2 + $0xfe0] sm:$0xff] }
 0x1d9   :  { %3099 = vmatpush1.bf16.msra.mxu0 %v9018_v58  ;;  %3221 = vmatpush1.bf16.msra.mxu1 %v9020_v60  ;;  %v2376_v58 = vld [vmem:[#allocation2 + $0xb60] sm:$0xff] }
 0x1da   :  { %3100 = vmatprep.subr.bf16.mxu0 %v9023_v62  ;;  %3222 = vmatprep.subr.bf16.mxu1 %v9025_v0  ;;  %v2378_v60 = vld [vmem:[#allocation2 + $0xbc0] sm:$0xff]  ;;  %v2377_v62 = vld [vmem:[#allocation2 + $0xb68] sm:$0xff] }
 0x1db   :  { %v2379_v0 = vld [vmem:[#allocation2 + $0xbc8] sm:$0xff]  ;;  %v9051_v3 = vcombine.high %v2376_v58, %v2378_v60  ;;  %v9050_v10 = vcombine.low %v2376_v58, %v2378_v60  ;;  %v2402_v52 = vld [vmem:[#allocation2 + $0x1040] sm:$0xff] }
 0x1dc   :  { %v9053_v5 = vcombine.high %v2377_v62, %v2379_v0  ;;  %v9052_v11 = vcombine.low %v2377_v62, %v2379_v0  ;;  %v2404_v60 = vld [vmem:[#allocation2 + $0x10a0] sm:$0xff]  ;;  %v2405_v0 = vld [vmem:[#allocation2 + $0x10a8] sm:$0xff] }
 0x1dd   :  { %3101 = vmatpush1.bf16.msra.mxu0 %v9022_v6  ;;  %3223 = vmatpush1.bf16.msra.mxu1 %v9024_v7  ;;  %v2380_v6 = vld [vmem:[#allocation2 + $0xc20] sm:$0xff] }
 0x1de   :  { %3102 = vmatprep.subr.bf16.mxu0 %v9027_v8  ;;  %3224 = vmatprep.subr.bf16.mxu1 %v9029_v9  ;;  %v2382_v7 = vld [vmem:[#allocation2 + $0xc80] sm:$0xff]  ;;  %v2381_v8 = vld [vmem:[#allocation2 + $0xc28] sm:$0xff] }
 0x1df   :  { %v2383_v9 = vld [vmem:[#allocation2 + $0xc88] sm:$0xff]  ;;  %v9055_v12 = vcombine.high %v2380_v6, %v2382_v7  ;;  %v9054_v19 = vcombine.low %v2380_v6, %v2382_v7  ;;  %v2406_v62 = vld [vmem:[#allocation2 + $0x1100] sm:$0xff] }
 0x1e0   :  { %v9057_v13 = vcombine.high %v2381_v8, %v2383_v9  ;;  %v9056_v20 = vcombine.low %v2381_v8, %v2383_v9  ;;  %v2408_v8 = vld [vmem:[#allocation2 + $0x1160] sm:$0xff] }
 0x1e1   :  { %3103 = vmatpush1.bf16.msra.mxu0 %v9026_v14  ;;  %3225 = vmatpush1.bf16.msra.mxu1 %v9028_v15  ;;  %v2384_v14 = vld [vmem:[#allocation2 + $0xce0] sm:$0xff] }
 0x1e2   :  { %3104 = vmatprep.subr.bf16.mxu0 %v9031_v17  ;;  %3226 = vmatprep.subr.bf16.mxu1 %v9033_v18  ;;  %v2386_v15 = vld [vmem:[#allocation2 + $0xd40] sm:$0xff]  ;;  %v2385_v17 = vld [vmem:[#allocation2 + $0xce8] sm:$0xff] }
 0x1e3   :  { %v2387_v18 = vld [vmem:[#allocation2 + $0xd48] sm:$0xff]  ;;  %v9059_v21 = vcombine.high %v2384_v14, %v2386_v15  ;;  %v9058_v28 = vcombine.low %v2384_v14, %v2386_v15  ;;  %v2410_v9 = vld [vmem:[#allocation2 + $0x11c0] sm:$0xff] }
 0x1e4   :  { %v9061_v22 = vcombine.high %v2385_v17, %v2387_v18  ;;  %v9060_v29 = vcombine.low %v2385_v17, %v2387_v18  ;;  %v9078_v18 = vcombine.low %v2404_v60, %v2406_v62 }
 0x1e5   :  { %3105 = vmatpush1.bf16.msra.mxu0 %v9030_v23  ;;  %3227 = vmatpush1.bf16.msra.mxu1 %v9032_v25  ;;  %v2388_v23 = vld [vmem:[#allocation2 + $0xda0] sm:$0xff] }
 0x1e6   :  { %3106 = vmatprep.subr.bf16.mxu0 %v9035_v26  ;;  %3228 = vmatprep.subr.bf16.mxu1 %v9037_v27  ;;  %v2390_v25 = vld [vmem:[#allocation2 + $0xe00] sm:$0xff]  ;;  %v2389_v26 = vld [vmem:[#allocation2 + $0xda8] sm:$0xff] }
 0x1e7   :  { %v2391_v27 = vld [vmem:[#allocation2 + $0xe08] sm:$0xff]  ;;  %v9063_v30 = vcombine.high %v2388_v23, %v2390_v25  ;;  %v9062_v36 = vcombine.low %v2388_v23, %v2390_v25  ;;  %v9083_v23 = vcombine.high %v2408_v8, %v2410_v9  ;;  %v11046_v25 = vld [vmem:[#allocation4] ss:$0 sm:$0xff] }
 0x1e8   :  { %v9065_v31 = vcombine.high %v2389_v26, %v2391_v27 }
 0x1e9   :  { %3107 = vmatpush1.bf16.msra.mxu0 %v9034_v32  ;;  %3229 = vmatpush1.bf16.msra.mxu1 %v9036_v33  ;;  %v2392_v32 = vld [vmem:[#allocation2 + $0xe60] sm:$0xff] }
 0x1ea   :  { %3108 = vmatprep.subr.bf16.mxu0 %v9039_v34  ;;  %3230 = vmatprep.subr.bf16.mxu1 %v9041_v35  ;;  %v2394_v33 = vld [vmem:[#allocation2 + $0xec0] sm:$0xff]  ;;  %v2393_v34 = vld [vmem:[#allocation2 + $0xe68] sm:$0xff] }
 0x1eb   :  { %v2395_v35 = vld [vmem:[#allocation2 + $0xec8] sm:$0xff]  ;;  %v9067_v37 = vcombine.high %v2392_v32, %v2394_v33 }
 0x1ec   :  { %v9069_v38 = vcombine.high %v2393_v34, %v2395_v35 }
 0x1ed   :  { %3109 = vmatpush1.bf16.msra.mxu0 %v9038_v41  ;;  %3231 = vmatpush1.bf16.msra.mxu1 %v9040_v43  ;;  %v2398_v41 = vld [vmem:[#allocation2 + $0xf80] sm:$0xff]  ;;  %v2397_v43 = vld [vmem:[#allocation2 + $0xf28] sm:$0xff] }
 0x1ee   :  { %3110 = vmatprep.subr.bf16.mxu0 %v9043_v45  ;;  %3232 = vmatprep.subr.bf16.mxu1 %v9045_v46  ;;  %v2399_v45 = vld [vmem:[#allocation2 + $0xf88] sm:$0xff]  ;;  %v9066_v46 = vcombine.low %v2392_v32, %v2394_v33  ;;  %v9071_v47 = vcombine.high %v2396_v40, %v2398_v41 }
 0x1ef   :  { %v9073_v50 = vcombine.high %v2397_v43, %v2399_v45  ;;  %v2413_v32 = vld [vmem:[#allocation2 + $0x1228] sm:$0xff] }
 0x1f0   :  { %v2415_v33 = vld [vmem:[#allocation2 + $0x1288] sm:$0xff] }
 0x1f1   :  { %3111 = vmatpush1.bf16.msra.mxu0 %v9042_v54  ;;  %3233 = vmatpush1.bf16.msra.mxu1 %v9044_v55  ;;  %v2401_v54 = vld [vmem:[#allocation2 + $0xfe8] sm:$0xff] }
 0x1f2   :  { %3112 = vmatprep.subr.bf16.mxu0 %v9047_v56  ;;  %3234 = vmatprep.subr.bf16.mxu1 %v9049_v57  ;;  %v2403_v55 = vld [vmem:[#allocation2 + $0x1048] sm:$0xff]  ;;  %v9070_v56 = vcombine.low %v2396_v40, %v2398_v41  ;;  %v9072_v57 = vcombine.low %v2397_v43, %v2399_v45  ;;  %v9089_v40 = vcombine.high %v2413_v32, %v2415_v33  ;;  %v2416_v41 = vld [vmem:[#allocation2 + $0x12e0] sm:$0xff] }
 0x1f3   :  { %v9077_v58 = vcombine.high %v2401_v54, %v2403_v55  ;;  %v2418_v43 = vld [vmem:[#allocation2 + $0x1340] sm:$0xff] }
 0x1f5   :  { %3113 = vmatpush1.bf16.msra.mxu0 %v9046_v1  ;;  %3235 = vmatpush1.bf16.msra.mxu1 %v9048_v2  ;;  %v2407_v1 = vld [vmem:[#allocation2 + $0x1108] sm:$0xff]  ;;  %v9074_v2 = vcombine.low %v2400_v51, %v2402_v52 }
 0x1f6   :  { %3114 = vmatprep.subr.bf16.mxu0 %v9051_v3  ;;  %3236 = vmatprep.subr.bf16.mxu1 %v9053_v5  ;;  %v9076_v3 = vcombine.low %v2401_v54, %v2403_v55  ;;  %v9079_v5 = vcombine.high %v2404_v60, %v2406_v62  ;;  %v9081_v7 = vcombine.high %v2405_v0, %v2407_v1 }
 0x1f9   :  { %3115 = vmatpush1.bf16.msra.mxu0 %v9050_v10  ;;  %3237 = vmatpush1.bf16.msra.mxu1 %v9052_v11 }
 0x1fa   :  { %3145 = vmatprep.subr.bf16.mxu0 %v9055_v12  ;;  %3267 = vmatprep.subr.bf16.mxu1 %v9057_v13  ;;  %v2409_v12 = vld [vmem:[#allocation2 + $0x1168] sm:$0xff] }
 0x1fb   :  { %v2411_v13 = vld [vmem:[#allocation2 + $0x11c8] sm:$0xff] }
 0x1fc   :  { %3117 = vmatmul.mubr.bf16.vlgmr.msra.gmra.mrb[24].mxu0 %v10973_v42  ;;  %3239 = vmatmul.mubr.bf16.vlgmr.msra.gmra.mrb[24].mxu1 %v10973_v42  ;;  %v9064_v42 = vcombine.low %v2389_v26, %v2391_v27 }
 0x1fd   :  { %3146 = vmatpush1.bf16.msra.mxu0 %v9054_v19  ;;  %3268 = vmatpush1.bf16.msra.mxu1 %v9056_v20 }
 0x1fe   :  { %3147 = vmatprep.subr.bf16.mxu0 %v9059_v21  ;;  %3269 = vmatprep.subr.bf16.mxu1 %v9061_v22  ;;  %v9080_v22 = vcombine.low %v2405_v0, %v2407_v1  ;;  %v9091_v0 = vcombine.high %v2416_v41, %v2418_v43 }
 0x1ff   :  { %3126 = vmatprep.mubr.bf16.mxu0 %v10980_v53  ;;  %3248 = vmatprep.mubr.bf16.mxu1 %v10980_v53  ;;  %v9068_v53 = vcombine.low %v2393_v34, %v2395_v35  ;;  %v9082_v34 = vcombine.low %v2408_v8, %v2410_v9  ;;  %v9084_v35 = vcombine.low %v2409_v12, %v2411_v13 }
 0x201   :  { %3148 = vmatpush1.bf16.msra.mxu0 %v9058_v28  ;;  %3270 = vmatpush1.bf16.msra.mxu1 %v9060_v29  ;;  %v9085_v28 = vcombine.high %v2409_v12, %v2411_v13  ;;  %v2412_v29 = vld [vmem:[#allocation2 + $0x1220] sm:$0xff]  ;;  %v9090_v12 = vcombine.low %v2416_v41, %v2418_v43 }
 0x202   :  { %3149 = vmatprep.subr.bf16.mxu0 %v9063_v30  ;;  %3271 = vmatprep.subr.bf16.mxu1 %v9065_v31  ;;  %v2428_v41 = vld [vmem:[#allocation2 + $0x1520] sm:$0xff] }
 0x203   :  { %v2430_v43 = vld [vmem:[#allocation2 + $0x1580] sm:$0xff] }
 0x204   :  { %3127 = vmatmul.mubr.bf16.gmra.mrb[28].mxu0 %v10987_v63  ;;  %3249 = vmatmul.mubr.bf16.gmra.mrb[28].mxu1 %v10987_v63  ;;  %v9075_v63 = vcombine.high %v2400_v51, %v2402_v52 }
 0x205   :  { %3150 = vmatpush1.bf16.msra.mxu0 %v9062_v36  ;;  %3272 = vmatpush1.bf16.msra.mxu1 %v9064_v42 }
 0x206   :  { %3151 = vmatprep.subr.bf16.mxu0 %v9067_v37  ;;  %3273 = vmatprep.subr.bf16.mxu1 %v9069_v38 }
 0x207   :  { %3136 = vmatprep.mubr.bf16.mxu0 %v10936_v39  ;;  %3258 = vmatprep.mubr.bf16.mxu1 %v10936_v39 }
 0x209   :  { %3152 = vmatpush1.bf16.msra.mxu0 %v9066_v46  ;;  %3274 = vmatpush1.bf16.msra.mxu1 %v9068_v53 }
 0x20a   :  { %3153 = vmatprep.subr.bf16.mxu0 %v9071_v47  ;;  %3275 = vmatprep.subr.bf16.mxu1 %v9073_v50  ;;  %v2417_v47 = vld [vmem:[#allocation2 + $0x12e8] sm:$0xff] }
 0x20b   :  { %v2419_v50 = vld [vmem:[#allocation2 + $0x1348] sm:$0xff] }
 0x20c   :  { %3137 = vmatmul.mubr.bf16.gmra.mrb[32].mxu0 %v10940_v48  ;;  %3259 = vmatmul.mubr.bf16.gmra.mrb[32].mxu1 %v10940_v48 }
 0x20d   :  { %3154 = vmatpush1.bf16.msra.mxu0 %v9070_v56  ;;  %3276 = vmatpush1.bf16.msra.mxu1 %v9072_v57  ;;  %v9088_v56 = vcombine.low %v2413_v32, %v2415_v33 }
 0x20e   :  { %3155 = vmatprep.subr.bf16.mxu0 %v9075_v63  ;;  %3277 = vmatprep.subr.bf16.mxu1 %v9077_v58 }
 0x20f   :  { %v1093_v6 = vpop.f32.mrb[0].mxu0  ;;  %3177 = vmatprep.mubr.bf16.mxu0 %v10998_v24  ;;  %v1215_v10 = vpop.f32.mrb[0].mxu1  ;;  %3299 = vmatprep.mubr.bf16.mxu1 %v10998_v24  ;;  %v2414_v24 = vld [vmem:[#allocation2 + $0x1280] sm:$0xff] }
 0x210   :  { %v1095_v11 = vpop.f32.mrb[1].mxu0  ;;  %v1217_v15 = vpop.f32.mrb[1].mxu1  ;;  %v9087_v37 = vcombine.high %v2412_v29, %v2414_v24  ;;  %v9086_v55 = vcombine.low %v2412_v29, %v2414_v24 }
 0x211   :  { %v1242_v14 = vmax.f32 %v1093_v6, %v1095_v11  ;;  %v1097_v17 = vpop.f32.mrb[2].mxu0  ;;  %3156 = vmatpush1.bf16.msra.mxu0 %v9074_v2  ;;  %v1247_v19 = vmax.f32 %v1215_v10, %v1217_v15  ;;  %v1219_v20 = vpop.f32.mrb[2].mxu1  ;;  %3278 = vmatpush1.bf16.msra.mxu1 %v9076_v3  ;;  %v9093_v3 = vcombine.high %v2417_v47, %v2419_v50  ;;  %v2422_v6 = vld [vmem:[#allocation2 + $0x1400] sm:$0xff]  ;;  %v2421_v10 = vld [vmem:[#allocation2 + $0x13a8] sm:$0xff] }
 0x212   :  { %v1099_v21 = vpop.f32.mrb[3].mxu0  ;;  %3157 = vmatprep.subr.bf16.mxu0 %v9079_v5  ;;  %v1221_v27 = vpop.f32.mrb[3].mxu1  ;;  %3279 = vmatprep.subr.bf16.mxu1 %v9081_v7  ;;  %v2420_v5 = vld [vmem:[#allocation2 + $0x13a0] sm:$0xff]  ;;  %v2423_v11 = vld [vmem:[#allocation2 + $0x1408] sm:$0xff] }
 0x213   :  { %v1243_v26 = vmax.f32 %v1097_v17, %v1099_v21  ;;  %v1252_v30 = vmax.f32 %v1242_v14, %v1247_v19  ;;  %v1248_v31 = vmax.f32 %v1219_v20, %v1221_v27  ;;  %v9092_v14 = vcombine.low %v2417_v47, %v2419_v50  ;;  %v2424_v20 = vld [vmem:[#allocation2 + $0x1460] sm:$0xff]  ;;  %v2425_v27 = vld [vmem:[#allocation2 + $0x1468] sm:$0xff] }
 0x214   :  { %v9095_v15 = vcombine.high %v2420_v5, %v2422_v6  ;;  %v9097_v19 = vcombine.high %v2421_v10, %v2423_v11  ;;  %v2426_v21 = vld [vmem:[#allocation2 + $0x14c0] sm:$0xff] }
 0x215   :  { %3158 = vmatpush1.bf16.msra.mxu0 %v9078_v18  ;;  %v1263_v36 = vadd.f32 %v11046_v25, %v1252_v30  ;;  %v1253_v42 = vmax.f32 %v1243_v26, %v1248_v31  ;;  %3280 = vmatpush1.bf16.msra.mxu1 %v9080_v22  ;;  %v9094_v31 = vcombine.low %v2420_v5, %v2422_v6  ;;  %v2439_v5 = vld [vmem:[#allocation2 + $0x1708] sm:$0xff] }
 0x216   :  { %3159 = vmatprep.subr.bf16.mxu0 %v9083_v23  ;;  %3281 = vmatprep.subr.bf16.mxu1 %v9085_v28  ;;  %v2427_v28 = vld [vmem:[#allocation2 + $0x14c8] sm:$0xff]  ;;  %v9098_v47 = vcombine.low %v2424_v20, %v2426_v21 }
 0x217   :  { %v1103_v38 = vpop.f32.mrb[4].mxu0  ;;  %v1264_v45 = vadd.f32 %v11046_v25, %v1253_v42  ;;  %v1225_v46 = vpop.f32.mrb[4].mxu1  ;;  %v1268_v57 = vmax.f32 %v1263_v36, 0.0  ;;  %v9096_v36 = vcombine.low %v2421_v10, %v2423_v11  ;;  %v9099_v42 = vcombine.high %v2424_v20, %v2426_v21  ;;  %v2440_v11 = vld [vmem:[#allocation2 + $0x1760] sm:$0xff]  ;;  %v3356_v20 = vld [vmem:[#allocation2 + $0x30] sm:$0xff] }
 0x218   :  { %v1105_v53 = vpop.f32.mrb[5].mxu0  ;;  %v1227_v52 = vpop.f32.mrb[5].mxu1  ;;  %v3358_v21 = vld [vmem:[#allocation2 + $0x90] sm:$0xff] }
 0x219   :  { %v1244_v51 = vmax.f32 %v1103_v38, %v1105_v53  ;;  %v1107_v54 = vpop.f32.mrb[6].mxu0  ;;  %3160 = vmatpush1.bf16.msra.mxu0 %v9082_v34  ;;  %v1269_v63 = vmax.f32 %v1264_v45, 0.0  ;;  %v1249_v58 = vmax.f32 %v1225_v46, %v1227_v52  ;;  %v1229_v60 = vpop.f32.mrb[6].mxu1  ;;  %3282 = vmatpush1.bf16.msra.mxu1 %v9084_v35  ;;  %v2429_v46 = vld [vmem:[#allocation2 + $0x1528] sm:$0xff]  ;;  %v9103_v52 = vcombine.high %v2428_v41, %v2430_v43 }
 0x21a   :  { %v1109_v62 = vpop.f32.mrb[7].mxu0  ;;  %3161 = vmatprep.subr.bf16.mxu0 %v9087_v37  ;;  %v1231_v2 = vpop.f32.mrb[7].mxu1  ;;  %3283 = vmatprep.subr.bf16.mxu1 %v9089_v40  ;;  %v9101_v40 = vcombine.high %v2425_v27, %v2427_v28  ;;  %v2431_v53 = vld [vmem:[#allocation2 + $0x1588] sm:$0xff] }
 0x21b   :  { %v1245_v1 = vmax.f32 %v1107_v54, %v1109_v62  ;;  %v11050_v7 = vpack.c.bf16 %v1269_v63, %v1268_v57  ;;  %v1254_v8 = vmax.f32 %v1244_v51, %v1249_v58  ;;  %v1250_v9 = vmax.f32 %v1229_v60, %v1231_v2  ;;  %v2433_v57 = vld [vmem:[#allocation2 + $0x15e8] sm:$0xff]  ;;  %v2438_v2 = vld [vmem:[#allocation2 + $0x1700] sm:$0xff] }
 0x21c   :  { %v9100_v51 = vcombine.low %v2425_v27, %v2427_v28  ;;  %v9105_v54 = vcombine.high %v2429_v46, %v2431_v53  ;;  %v2435_v63 = vld [vmem:[#allocation2 + $0x1648] sm:$0xff]  ;;  %v9102_v58 = vcombine.low %v2428_v41, %v2430_v43  ;;  %v9104_v60 = vcombine.low %v2429_v46, %v2431_v53 }
 0x21d   :  { %3162 = vmatpush1.bf16.msra.mxu0 %v9086_v55  ;;  %v1255_v13 = vmax.f32 %v1245_v1, %v1250_v9  ;;  %3284 = vmatpush1.bf16.msra.mxu1 %v9088_v56  ;;  %v1265_v17 = vadd.f32 %v11046_v25, %v1254_v8  ;;  %v2432_v55 = vld [vmem:[#allocation2 + $0x15e0] sm:$0xff]  ;;  %v9108_v8 = vcombine.low %v2433_v57, %v2435_v63 }
 0x21e   :  { %3163 = vmatprep.subr.bf16.mxu0 %v9091_v0  ;;  %3285 = vmatprep.subr.bf16.mxu1 %v9093_v3  ;;  %v2434_v56 = vld [vmem:[#allocation2 + $0x1640] sm:$0xff]  ;;  %v9109_v0 = vcombine.high %v2433_v57, %v2435_v63  ;;  %v2437_v3 = vld [vmem:[#allocation2 + $0x16a8] sm:$0xff]  ;;  %v9119_v28 = vcombine.high %v3356_v20, %v3358_v21  ;;  %v3372_v63 = vld [vmem:[#allocation2 + $0x330] sm:$0xff] }
 0x21f   :  { %v1113_v18 = vpop.f32.mrb[8].mxu0  ;;  %v1266_v22 = vadd.f32 %v11046_v25, %v1255_v13  ;;  %v1235_v23 = vpop.f32.mrb[8].mxu1  ;;  %v1270_v37 = vmax.f32 %v1265_v17, 0.0  ;;  %v9107_v62 = vcombine.high %v2432_v55, %v2434_v56  ;;  %v2436_v1 = vld [vmem:[#allocation2 + $0x16a0] sm:$0xff]  ;;  %v9106_v6 = vcombine.low %v2432_v55, %v2434_v56  ;;  %v2441_v13 = vld [vmem:[#allocation2 + $0x1768] sm:$0xff] }
 0x220   :  { %v1115_v26 = vpop.f32.mrb[9].mxu0  ;;  %v1237_v24 = vpop.f32.mrb[9].mxu1  ;;  %v9111_v9 = vcombine.high %v2436_v1, %v2438_v2  ;;  %v9113_v10 = vcombine.high %v2437_v3, %v2439_v5  ;;  %v9112_v17 = vcombine.low %v2437_v3, %v2439_v5  ;;  %v3376_v3 = vld [vmem:[#allocation2 + $0x3f0] sm:$0xff] }
 0x221   :  { %v1246_v29 = vmax.f32 %v1113_v18, %v1115_v26  ;;  %v1117_v30 = vpop.f32.mrb[10].mxu0  ;;  %3164 = vmatpush1.bf16.msra.mxu0 %v9090_v12  ;;  %v1271_v32 = vmax.f32 %v1266_v22, 0.0  ;;  %v1251_v33 = vmax.f32 %v1235_v23, %v1237_v24  ;;  %v1239_v34 = vpop.f32.mrb[10].mxu1  ;;  %3286 = vmatpush1.bf16.msra.mxu1 %v9092_v14  ;;  %v2442_v12 = vld [vmem:[#allocation2 + $0x17c0] sm:$0xff]  ;;  %v2443_v14 = vld [vmem:[#allocation2 + $0x17c8] sm:$0xff]  ;;  %v3357_v22 = vld [vmem:[#allocation2 + $0x38] sm:$0xff] }
 0x222   :  { %v1118_v35 = vpop.f32.mrb[11].mxu0  ;;  %3165 = vmatprep.subr.bf16.mxu0 %v9095_v15  ;;  %v1240_v38 = vpop.f32.mrb[11].mxu1  ;;  %3287 = vmatprep.subr.bf16.mxu1 %v9097_v19  ;;  %v9110_v15 = vcombine.low %v2436_v1, %v2438_v2  ;;  %v9115_v18 = vcombine.high %v2440_v11, %v2442_v12  ;;  %v9117_v19 = vcombine.high %v2441_v13, %v2443_v14  ;;  %v3359_v23 = vld [vmem:[#allocation2 + $0x98] sm:$0xff]  ;;  %v3360_v24 = vld [vmem:[#allocation2 + $0xf0] sm:$0xff] }
 0x223   :  { %v11054_v45 = vmax.f32 %v1246_v29, %v1251_v33  ;;  %v11056_v50 = vpack.c.bf16 %v1271_v32, %v1270_v37  ;;  %v9114_v26 = vcombine.low %v2440_v11, %v2442_v12  ;;  %v9116_v27 = vcombine.low %v2441_v13, %v2443_v14  ;;  %v3362_v30 = vld [vmem:[#allocation2 + $0x150] sm:$0xff]  ;;  %v3363_v32 = vld [vmem:[#allocation2 + $0x158] sm:$0xff] }
 0x224   :  { %v9121_v29 = vcombine.high %v3357_v22, %v3359_v23  ;;  %v9118_v33 = vcombine.low %v3356_v20, %v3358_v21  ;;  %v9120_v34 = vcombine.low %v3357_v22, %v3359_v23  ;;  %v9123_v35 = vcombine.high %v3360_v24, %v3362_v30  ;;  %v3366_v37 = vld [vmem:[#allocation2 + $0x210] sm:$0xff]  ;;  %v3365_v38 = vld [vmem:[#allocation2 + $0x1b8] sm:$0xff] }
 0x225   :  { %3166 = vmatpush1.bf16.msra.mxu0 %v9094_v31  ;;  %3288 = vmatpush1.bf16.msra.mxu1 %v9096_v36  ;;  %v3361_v31 = vld [vmem:[#allocation2 + $0xf8] sm:$0xff]  ;;  %v9122_v41 = vcombine.low %v3360_v24, %v3362_v30  ;;  %v3378_v5 = vld [vmem:[#allocation2 + $0x450] sm:$0xff] }
 0x226   :  { %3167 = vmatprep.subr.bf16.mxu0 %v9099_v42  ;;  %3289 = vmatprep.subr.bf16.mxu1 %v9101_v40  ;;  %v9125_v36 = vcombine.high %v3361_v31, %v3363_v32  ;;  %v3364_v42 = vld [vmem:[#allocation2 + $0x1b0] sm:$0xff]  ;;  %v3367_v40 = vld [vmem:[#allocation2 + $0x218] sm:$0xff]  ;;  %v9124_v43 = vcombine.low %v3361_v31, %v3363_v32 }
 0x227   :  { %v9127_v46 = vcombine.high %v3364_v42, %v3366_v37  ;;  %v9129_v53 = vcombine.high %v3365_v38, %v3367_v40  ;;  %v9126_v55 = vcombine.low %v3364_v42, %v3366_v37  ;;  %v3380_v12 = vld [vmem:[#allocation2 + $0x4b0] sm:$0xff]  ;;  %v3381_v14 = vld [vmem:[#allocation2 + $0x4b8] sm:$0xff] }
 0x228   :  { %v3382_v13 = vld [vmem:[#allocation2 + $0x510] sm:$0xff]  ;;  %v3385_v23 = vld [vmem:[#allocation2 + $0x578] sm:$0xff] }
 0x229   :  { %3168 = vmatpush1.bf16.msra.mxu0 %v9098_v47  ;;  %3290 = vmatpush1.bf16.msra.mxu1 %v9100_v51  ;;  %v3368_v47 = vld [vmem:[#allocation2 + $0x270] sm:$0xff]  ;;  %v3389_v32 = vld [vmem:[#allocation2 + $0x638] sm:$0xff] }
 0x22a   :  { %3169 = vmatprep.subr.bf16.mxu0 %v9103_v52  ;;  %3291 = vmatprep.subr.bf16.mxu1 %v9105_v54  ;;  %v3370_v51 = vld [vmem:[#allocation2 + $0x2d0] sm:$0xff]  ;;  %v3369_v52 = vld [vmem:[#allocation2 + $0x278] sm:$0xff] }
 0x22b   :  { %v3371_v54 = vld [vmem:[#allocation2 + $0x2d8] sm:$0xff]  ;;  %v9131_v56 = vcombine.high %v3368_v47, %v3370_v51  ;;  %v3384_v21 = vld [vmem:[#allocation2 + $0x570] sm:$0xff] }
 0x22c   :  { %v9133_v57 = vcombine.high %v3369_v52, %v3371_v54  ;;  %v3386_v22 = vld [vmem:[#allocation2 + $0x5d0] sm:$0xff] }
 0x22d   :  { %3170 = vmatpush1.bf16.msra.mxu0 %v9102_v58  ;;  %3292 = vmatpush1.bf16.msra.mxu1 %v9104_v60  ;;  %v3374_v58 = vld [vmem:[#allocation2 + $0x390] sm:$0xff]  ;;  %v3373_v60 = vld [vmem:[#allocation2 + $0x338] sm:$0xff] }
 0x22e   :  { %3171 = vmatprep.subr.bf16.mxu0 %v9107_v62  ;;  %3293 = vmatprep.subr.bf16.mxu1 %v9109_v0  ;;  %v3375_v62 = vld [vmem:[#allocation2 + $0x398] sm:$0xff]  ;;  %v9132_v0 = vcombine.low %v3369_v52, %v3371_v54  ;;  %v9135_v1 = vcombine.high %v3372_v63, %v3374_v58  ;;  %v3388_v30 = vld [vmem:[#allocation2 + $0x630] sm:$0xff] }
 0x22f   :  { %v9137_v2 = vcombine.high %v3373_v60, %v3375_v62  ;;  %v3390_v31 = vld [vmem:[#allocation2 + $0x690] sm:$0xff]  ;;  %v3397_v52 = vld [vmem:[#allocation2 + $0x7b8] sm:$0xff] }
 0x230   :  { %v3392_v42 = vld [vmem:[#allocation2 + $0x6f0] sm:$0xff]  ;;  %v3399_v54 = vld [vmem:[#allocation2 + $0x818] sm:$0xff] }
 0x231   :  { %3172 = vmatpush1.bf16.msra.mxu0 %v9106_v6  ;;  %3294 = vmatpush1.bf16.msra.mxu1 %v9108_v8  ;;  %v3377_v6 = vld [vmem:[#allocation2 + $0x3f8] sm:$0xff]  ;;  %v3394_v37 = vld [vmem:[#allocation2 + $0x750] sm:$0xff] }
 0x232   :  { %3173 = vmatprep.subr.bf16.mxu0 %v9111_v9  ;;  %3295 = vmatprep.subr.bf16.mxu1 %v9113_v10  ;;  %v3379_v8 = vld [vmem:[#allocation2 + $0x458] sm:$0xff]  ;;  %v9134_v9 = vcombine.low %v3372_v63, %v3374_v58  ;;  %v9139_v10 = vcombine.high %v3376_v3, %v3378_v5  ;;  %v3400_v63 = vld [vmem:[#allocation2 + $0x870] sm:$0xff] }
 0x233   :  { %v9141_v11 = vcombine.high %v3377_v6, %v3379_v8  ;;  %v3402_v58 = vld [vmem:[#allocation2 + $0x8d0] sm:$0xff] }
 0x235   :  { %3174 = vmatpush1.bf16.msra.mxu0 %v9110_v15  ;;  %3296 = vmatpush1.bf16.msra.mxu1 %v9112_v17  ;;  %v3383_v15 = vld [vmem:[#allocation2 + $0x518] sm:$0xff]  ;;  %v9138_v17 = vcombine.low %v3376_v3, %v3378_v5  ;;  %v3404_v3 = vld [vmem:[#allocation2 + $0x930] sm:$0xff] }
 0x236   :  { %3175 = vmatprep.subr.bf16.mxu0 %v9115_v18  ;;  %3297 = vmatprep.subr.bf16.mxu1 %v9117_v19  ;;  %v9140_v18 = vcombine.low %v3377_v6, %v3379_v8  ;;  %v9143_v19 = vcombine.high %v3380_v12, %v3382_v13  ;;  %v9145_v20 = vcombine.high %v3381_v14, %v3383_v15  ;;  %v3406_v5 = vld [vmem:[#allocation2 + $0x990] sm:$0xff]  ;;  %v3405_v6 = vld [vmem:[#allocation2 + $0x938] sm:$0xff] }
 0x237   :  { %v3407_v8 = vld [vmem:[#allocation2 + $0x998] sm:$0xff] }
 0x239   :  { %3176 = vmatpush1.bf16.msra.mxu0 %v9114_v26  ;;  %3298 = vmatpush1.bf16.msra.mxu1 %v9116_v27  ;;  %v3387_v26 = vld [vmem:[#allocation2 + $0x5d8] sm:$0xff]  ;;  %v9142_v27 = vcombine.low %v3380_v12, %v3382_v13  ;;  %v3408_v12 = vld [vmem:[#allocation2 + $0x9f0] sm:$0xff] }
 0x23a   :  { %4124 = vmatprep.subr.bf16.mxu0 %v9119_v28  ;;  %4246 = vmatprep.subr.bf16.mxu1 %v9121_v29  ;;  %v9144_v28 = vcombine.low %v3381_v14, %v3383_v15  ;;  %v9147_v29 = vcombine.high %v3384_v21, %v3386_v22  ;;  %v9149_v24 = vcombine.high %v3385_v23, %v3387_v26  ;;  %v3410_v13 = vld [vmem:[#allocation2 + $0xa50] sm:$0xff]  ;;  %v3409_v14 = vld [vmem:[#allocation2 + $0x9f8] sm:$0xff] }
 0x23b   :  { %v3411_v15 = vld [vmem:[#allocation2 + $0xa58] sm:$0xff] }
 0x23c   :  { %3178 = vmatmul.mubr.bf16.vlgmr.msra.gmra.mrb[24].mxu0 %v11005_v61  ;;  %3300 = vmatmul.mubr.bf16.vlgmr.msra.gmra.mrb[24].mxu1 %v11005_v61  ;;  %v9128_v61 = vcombine.low %v3365_v38, %v3367_v40  ;;  %v3393_v38 = vld [vmem:[#allocation2 + $0x6f8] sm:$0xff] }
 0x23d   :  { %4125 = vmatpush1.bf16.msra.mxu0 %v9118_v33  ;;  %4247 = vmatpush1.bf16.msra.mxu1 %v9120_v34  ;;  %v3391_v33 = vld [vmem:[#allocation2 + $0x698] sm:$0xff]  ;;  %v9146_v34 = vcombine.low %v3384_v21, %v3386_v22  ;;  %v3412_v21 = vld [vmem:[#allocation2 + $0xab0] sm:$0xff] }
 0x23e   :  { %4126 = vmatprep.subr.bf16.mxu0 %v9123_v35  ;;  %4248 = vmatprep.subr.bf16.mxu1 %v9125_v36  ;;  %v9148_v35 = vcombine.low %v3385_v23, %v3387_v26  ;;  %v9151_v36 = vcombine.high %v3388_v30, %v3390_v31  ;;  %v3395_v40 = vld [vmem:[#allocation2 + $0x758] sm:$0xff]  ;;  %v3414_v22 = vld [vmem:[#allocation2 + $0xb10] sm:$0xff] }
 0x23f   :  { %3187 = vmatprep.mubr.bf16.mxu0 %v11012_v4  ;;  %3309 = vmatprep.mubr.bf16.mxu1 %v11012_v4  ;;  %v9130_v4 = vcombine.low %v3368_v47, %v3370_v51  ;;  %v3396_v47 = vld [vmem:[#allocation2 + $0x7b0] sm:$0xff]  ;;  %v3413_v23 = vld [vmem:[#allocation2 + $0xab8] sm:$0xff] }
 0x240   :  { %v3398_v51 = vld [vmem:[#allocation2 + $0x810] sm:$0xff]  ;;  %v3415_v26 = vld [vmem:[#allocation2 + $0xb18] sm:$0xff] }
 0x241   :  { %4127 = vmatpush1.bf16.msra.mxu0 %v9122_v41  ;;  %4249 = vmatpush1.bf16.msra.mxu1 %v9124_v43  ;;  %v9150_v41 = vcombine.low %v3388_v30, %v3390_v31  ;;  %v9152_v43 = vcombine.low %v3389_v32, %v3391_v33  ;;  %v3416_v30 = vld [vmem:[#allocation2 + $0xb70] sm:$0xff] }
 0x242   :  { %4128 = vmatprep.subr.bf16.mxu0 %v9127_v46  ;;  %4250 = vmatprep.subr.bf16.mxu1 %v9129_v53  ;;  %v9155_v46 = vcombine.high %v3392_v42, %v3394_v37  ;;  %v9157_v53 = vcombine.high %v3393_v38, %v3395_v40  ;;  %v3418_v31 = vld [vmem:[#allocation2 + $0xbd0] sm:$0xff] }
 0x244   :  { %3188 = vmatmul.mubr.bf16.gmra.mrb[28].mxu0 %v11019_v16  ;;  %3310 = vmatmul.mubr.bf16.gmra.mrb[28].mxu1 %v11019_v16  ;;  %v9136_v16 = vcombine.low %v3373_v60, %v3375_v62  ;;  %v3401_v60 = vld [vmem:[#allocation2 + $0x878] sm:$0xff] }
 0x245   :  { %4129 = vmatpush1.bf16.msra.mxu0 %v9126_v55  ;;  %4251 = vmatpush1.bf16.msra.mxu1 %v9128_v61  ;;  %v9154_v55 = vcombine.low %v3392_v42, %v3394_v37  ;;  %v9156_v61 = vcombine.low %v3393_v38, %v3395_v40  ;;  %v3403_v62 = vld [vmem:[#allocation2 + $0x8d8] sm:$0xff]  ;;  %v3420_v42 = vld [vmem:[#allocation2 + $0xc30] sm:$0xff] }
 0x246   :  { %4130 = vmatprep.subr.bf16.mxu0 %v9131_v56  ;;  %4252 = vmatprep.subr.bf16.mxu1 %v9133_v57  ;;  %v9159_v56 = vcombine.high %v3396_v47, %v3398_v51  ;;  %v9161_v57 = vcombine.high %v3397_v52, %v3399_v54  ;;  %v3422_v37 = vld [vmem:[#allocation2 + $0xc90] sm:$0xff]  ;;  %v3421_v38 = vld [vmem:[#allocation2 + $0xc38] sm:$0xff] }
 0x247   :  { %3197 = vmatprep.mubr.bf16.mxu0 %v10959_v49  ;;  %3319 = vmatprep.mubr.bf16.mxu1 %v10959_v49  ;;  %v3423_v40 = vld [vmem:[#allocation2 + $0xc98] sm:$0xff] }
 0x249   :  { %4131 = vmatpush1.bf16.msra.mxu0 %v9130_v4  ;;  %4253 = vmatpush1.bf16.msra.mxu1 %v9132_v0  ;;  %v9158_v4 = vcombine.low %v3396_v47, %v3398_v51  ;;  %v9160_v0 = vcombine.low %v3397_v52, %v3399_v54  ;;  %v3424_v47 = vld [vmem:[#allocation2 + $0xcf0] sm:$0xff]  ;;  %v3425_v52 = vld [vmem:[#allocation2 + $0xcf8] sm:$0xff] }
 0x24a   :  { %4132 = vmatprep.subr.bf16.mxu0 %v9135_v1  ;;  %4254 = vmatprep.subr.bf16.mxu1 %v9137_v2  ;;  %v9163_v1 = vcombine.high %v3400_v63, %v3402_v58  ;;  %v9165_v2 = vcombine.high %v3401_v60, %v3403_v62  ;;  %v3426_v51 = vld [vmem:[#allocation2 + $0xd50] sm:$0xff]  ;;  %v3427_v54 = vld [vmem:[#allocation2 + $0xd58] sm:$0xff] }
 0x24c   :  { %3198 = vmatmul.mubr.bf16.gmra.mrb[32].mxu0 %v10963_v59  ;;  %3320 = vmatmul.mubr.bf16.gmra.mrb[32].mxu1 %v10963_v59 }
 0x24d   :  { %4133 = vmatpush1.bf16.msra.mxu0 %v9134_v9  ;;  %4255 = vmatpush1.bf16.msra.mxu1 %v9136_v16  ;;  %v9162_v9 = vcombine.low %v3400_v63, %v3402_v58  ;;  %v9164_v16 = vcombine.low %v3401_v60, %v3403_v62  ;;  %v3428_v63 = vld [vmem:[#allocation2 + $0xdb0] sm:$0xff]  ;;  %v3429_v62 = vld [vmem:[#allocation2 + $0xdb8] sm:$0xff] }
 0x24e   :  { %4134 = vmatprep.subr.bf16.mxu0 %v9139_v10  ;;  %4256 = vmatprep.subr.bf16.mxu1 %v9141_v11  ;;  %v9167_v10 = vcombine.high %v3404_v3, %v3406_v5  ;;  %v9169_v11 = vcombine.high %v3405_v6, %v3407_v8  ;;  %v3430_v58 = vld [vmem:[#allocation2 + $0xe10] sm:$0xff] }
 0x24f   :  { %4156 = vmatprep.mubr.bf16.mxu0 %v11030_v44  ;;  %4278 = vmatprep.mubr.bf16.mxu1 %v11030_v44  ;;  %v9153_v44 = vcombine.high %v3389_v32, %v3391_v33  ;;  %v3417_v32 = vld [vmem:[#allocation2 + $0xb78] sm:$0xff]  ;;  %v11073_v60 = vld [vmem:[%s11300_s0] ss:$16 sps:$4 sm:$0xff]  }
 0x250   :  { %v3419_v33 = vld [vmem:[#allocation2 + $0xbd8] sm:$0xff] }
 0x251   :  { %4135 = vmatpush1.bf16.msra.mxu0 %v9138_v17  ;;  %4257 = vmatpush1.bf16.msra.mxu1 %v9140_v18  ;;  %v9166_v17 = vcombine.low %v3404_v3, %v3406_v5  ;;  %v9168_v18 = vcombine.low %v3405_v6, %v3407_v8  ;;  %v3432_v5 = vld [vmem:[#allocation2 + $0xe70] sm:$0xff] }
 0x252   :  { %4136 = vmatprep.subr.bf16.mxu0 %v9143_v19  ;;  %4258 = vmatprep.subr.bf16.mxu1 %v9145_v20  ;;  %v9171_v19 = vcombine.high %v3408_v12, %v3410_v13  ;;  %v9173_v20 = vcombine.high %v3409_v14, %v3411_v15  ;;  %v3434_v6 = vld [vmem:[#allocation2 + $0xed0] sm:$0xff] }
 0x253   :  { %v11080_v8 = vld [vmem:[%s11300_s0 + $0x24] ss:$16 sps:$4 sm:$0xff]  }
 0x255   :  { %4137 = vmatpush1.bf16.msra.mxu0 %v9142_v27  ;;  %4259 = vmatpush1.bf16.msra.mxu1 %v9144_v28  ;;  %v9170_v27 = vcombine.low %v3408_v12, %v3410_v13  ;;  %v9172_v28 = vcombine.low %v3409_v14, %v3411_v15  ;;  %v9195_v12 = vcombine.high %v3432_v5, %v3434_v6  ;;  %v3436_v14 = vld [vmem:[#allocation2 + $0xf30] sm:$0xff] }
 0x256   :  { %4138 = vmatprep.subr.bf16.mxu0 %v9147_v29  ;;  %4260 = vmatprep.subr.bf16.mxu1 %v9149_v24  ;;  %v9175_v29 = vcombine.high %v3412_v21, %v3414_v22  ;;  %v9177_v24 = vcombine.high %v3413_v23, %v3415_v26  ;;  %v3438_v15 = vld [vmem:[#allocation2 + $0xf90] sm:$0xff] }
 0x259   :  { %4139 = vmatpush1.bf16.msra.mxu0 %v9146_v34  ;;  %4261 = vmatpush1.bf16.msra.mxu1 %v9148_v35  ;;  %v9174_v34 = vcombine.low %v3412_v21, %v3414_v22  ;;  %v9176_v35 = vcombine.low %v3413_v23, %v3415_v26  ;;  %v9199_v22 = vcombine.high %v3436_v14, %v3438_v15  ;;  %v3440_v26 = vld [vmem:[#allocation2 + $0xff0] sm:$0xff] }
 0x25a   :  { %4140 = vmatprep.subr.bf16.mxu0 %v9151_v36  ;;  %4262 = vmatprep.subr.bf16.mxu1 %v9153_v44  ;;  %v9179_v36 = vcombine.high %v3416_v30, %v3418_v31  ;;  %v9181_v44 = vcombine.high %v3417_v32, %v3419_v33 }
 0x25d   :  { %4141 = vmatpush1.bf16.msra.mxu0 %v9150_v41  ;;  %4263 = vmatpush1.bf16.msra.mxu1 %v9152_v43  ;;  %v9178_v41 = vcombine.low %v3416_v30, %v3418_v31  ;;  %v9180_v43 = vcombine.low %v3417_v32, %v3419_v33  ;;  %v3444_v33 = vld [vmem:[#allocation2 + $0x10b0] sm:$0xff] }
 0x25e   :  { %4142 = vmatprep.subr.bf16.mxu0 %v9155_v46  ;;  %4264 = vmatprep.subr.bf16.mxu1 %v9157_v53  ;;  %v9183_v46 = vcombine.high %v3420_v42, %v3422_v37  ;;  %v9185_v53 = vcombine.high %v3421_v38, %v3423_v40 }
 0x261   :  { %4143 = vmatpush1.bf16.msra.mxu0 %v9154_v55  ;;  %4265 = vmatpush1.bf16.msra.mxu1 %v9156_v61  ;;  %v9182_v55 = vcombine.low %v3420_v42, %v3422_v37  ;;  %v9184_v61 = vcombine.low %v3421_v38, %v3423_v40 }
 0x262   :  { %4144 = vmatprep.subr.bf16.mxu0 %v9159_v56  ;;  %4266 = vmatprep.subr.bf16.mxu1 %v9161_v57  ;;  %v9187_v56 = vcombine.high %v3424_v47, %v3426_v51  ;;  %v9189_v57 = vcombine.high %v3425_v52, %v3427_v54 }
 0x265   :  { %4145 = vmatpush1.bf16.msra.mxu0 %v9158_v4  ;;  %4267 = vmatpush1.bf16.msra.mxu1 %v9160_v0  ;;  %v3431_v4 = vld [vmem:[#allocation2 + $0xe18] sm:$0xff]  ;;  %v9186_v0 = vcombine.low %v3424_v47, %v3426_v51 }
 0x266   :  { %4146 = vmatprep.subr.bf16.mxu0 %v9163_v1  ;;  %4268 = vmatprep.subr.bf16.mxu1 %v9165_v2  ;;  %v9188_v1 = vcombine.low %v3425_v52, %v3427_v54  ;;  %v9191_v2 = vcombine.high %v3428_v63, %v3430_v58  ;;  %v9193_v3 = vcombine.high %v3429_v62, %v3431_v4  ;;  %v3449_v51 = vld [vmem:[#allocation2 + $0x1178] sm:$0xff] }
 0x267   :  { %v3451_v52 = vld [vmem:[#allocation2 + $0x11d8] sm:$0xff] }
 0x269   :  { %4147 = vmatpush1.bf16.msra.mxu0 %v9162_v9  ;;  %4269 = vmatpush1.bf16.msra.mxu1 %v9164_v16  ;;  %v3433_v9 = vld [vmem:[#allocation2 + $0xe78] sm:$0xff] }
 0x26a   :  { %4148 = vmatprep.subr.bf16.mxu0 %v9167_v10  ;;  %4270 = vmatprep.subr.bf16.mxu1 %v9169_v11  ;;  %v3435_v16 = vld [vmem:[#allocation2 + $0xed8] sm:$0xff]  ;;  %v9190_v10 = vcombine.low %v3428_v63, %v3430_v58  ;;  %v9192_v11 = vcombine.low %v3429_v62, %v3431_v4 }
 0x26b   :  { %v9197_v13 = vcombine.high %v3433_v9, %v3435_v16  ;;  %v9196_v21 = vcombine.low %v3433_v9, %v3435_v16  ;;  %v3453_v16 = vld [vmem:[#allocation2 + $0x1238] sm:$0xff] }
 0x26d   :  { %4149 = vmatpush1.bf16.msra.mxu0 %v9166_v17  ;;  %4271 = vmatpush1.bf16.msra.mxu1 %v9168_v18  ;;  %v3437_v17 = vld [vmem:[#allocation2 + $0xf38] sm:$0xff] }
 0x26e   :  { %4150 = vmatprep.subr.bf16.mxu0 %v9171_v19  ;;  %4272 = vmatprep.subr.bf16.mxu1 %v9173_v20  ;;  %v3439_v18 = vld [vmem:[#allocation2 + $0xf98] sm:$0xff]  ;;  %v11087_v19 = vld [vmem:[%s11300_s0 + $0x20] ss:$16 sps:$4 sm:$0xff]   ;;  %v9194_v20 = vcombine.low %v3432_v5, %v3434_v6 }
 0x26f   :  { %v9201_v23 = vcombine.high %v3437_v17, %v3439_v18  ;;  %v9200_v30 = vcombine.low %v3437_v17, %v3439_v18  ;;  %v3454_v5 = vld [vmem:[#allocation2 + $0x1290] sm:$0xff] }
 0x271   :  { %4151 = vmatpush1.bf16.msra.mxu0 %v9170_v27  ;;  %4273 = vmatpush1.bf16.msra.mxu1 %v9172_v28  ;;  %v3442_v27 = vld [vmem:[#allocation2 + $0x1050] sm:$0xff]  ;;  %v3441_v28 = vld [vmem:[#allocation2 + $0xff8] sm:$0xff] }
 0x272   :  { %4152 = vmatprep.subr.bf16.mxu0 %v9175_v29  ;;  %4274 = vmatprep.subr.bf16.mxu1 %v9177_v24  ;;  %v3443_v29 = vld [vmem:[#allocation2 + $0x1058] sm:$0xff]  ;;  %v9198_v24 = vcombine.low %v3436_v14, %v3438_v15  ;;  %v9203_v31 = vcombine.high %v3440_v26, %v3442_v27 }
 0x273   :  { %v9205_v32 = vcombine.high %v3441_v28, %v3443_v29  ;;  %v9204_v42 = vcombine.low %v3441_v28, %v3443_v29  ;;  %v3459_v28 = vld [vmem:[#allocation2 + $0x1358] sm:$0xff] }
 0x275   :  { %4153 = vmatpush1.bf16.msra.mxu0 %v9174_v34  ;;  %4275 = vmatpush1.bf16.msra.mxu1 %v9176_v35  ;;  %v3446_v34 = vld [vmem:[#allocation2 + $0x1110] sm:$0xff]  ;;  %v3445_v35 = vld [vmem:[#allocation2 + $0x10b8] sm:$0xff] }
 0x276   :  { %4154 = vmatprep.subr.bf16.mxu0 %v9179_v36  ;;  %4276 = vmatprep.subr.bf16.mxu1 %v9181_v44  ;;  %v3447_v36 = vld [vmem:[#allocation2 + $0x1118] sm:$0xff]  ;;  %v9202_v44 = vcombine.low %v3440_v26, %v3442_v27  ;;  %v9207_v37 = vcombine.high %v3444_v33, %v3446_v34 }
 0x277   :  { %v9209_v40 = vcombine.high %v3445_v35, %v3447_v36  ;;  %v9208_v62 = vcombine.low %v3445_v35, %v3447_v36  ;;  %v3457_v27 = vld [vmem:[#allocation2 + $0x12f8] sm:$0xff] }
 0x279   :  { %4155 = vmatpush1.bf16.msra.mxu0 %v9178_v41  ;;  %4277 = vmatpush1.bf16.msra.mxu1 %v9180_v43  ;;  %v3448_v41 = vld [vmem:[#allocation2 + $0x1170] sm:$0xff] }
 0x27a   :  { %4185 = vmatprep.subr.bf16.mxu0 %v9183_v46  ;;  %4307 = vmatprep.subr.bf16.mxu1 %v9185_v53  ;;  %v3450_v43 = vld [vmem:[#allocation2 + $0x11d0] sm:$0xff]  ;;  %v11098_v46 = vld [vmem:[%s11300_s0 + $0xc] ss:$16 sps:$4 sm:$0xff]  }
 0x27b   :  { %v9211_v4 = vcombine.high %v3448_v41, %v3450_v43 }
 0x27c   :  { %4157 = vmatmul.mubr.bf16.vlgmr.msra.gmra.mrb[36].mxu0 %v11073_v60  ;;  %4279 = vmatmul.mubr.bf16.vlgmr.msra.gmra.mrb[36].mxu1 %v11073_v60 }
 0x27d   :  { %4186 = vmatpush1.bf16.msra.mxu0 %v9182_v55  ;;  %4308 = vmatpush1.bf16.msra.mxu1 %v9184_v61 }
 0x27e   :  { %4187 = vmatprep.subr.bf16.mxu0 %v9187_v56  ;;  %4309 = vmatprep.subr.bf16.mxu1 %v9189_v57  ;;  %v9206_v56 = vcombine.low %v3444_v33, %v3446_v34 }
 0x27f   :  { %4166 = vmatprep.mubr.bf16.mxu0 %v11080_v8  ;;  %4288 = vmatprep.mubr.bf16.mxu1 %v11080_v8 }
 0x281   :  { %4188 = vmatpush1.bf16.msra.mxu0 %v9186_v0  ;;  %4310 = vmatpush1.bf16.msra.mxu1 %v9188_v1 }
 0x282   :  { %4189 = vmatprep.subr.bf16.mxu0 %v9191_v2  ;;  %4311 = vmatprep.subr.bf16.mxu1 %v9193_v3  ;;  %v9213_v2 = vcombine.high %v3449_v51, %v3451_v52  ;;  %v3452_v3 = vld [vmem:[#allocation2 + $0x1230] sm:$0xff] }
 0x283   :  { %v9215_v14 = vcombine.high %v3452_v3, %v3454_v5 }
 0x284   :  { %4167 = vmatmul.mubr.bf16.gmra.mrb[40].mxu0 %v11087_v19  ;;  %4289 = vmatmul.mubr.bf16.gmra.mrb[40].mxu1 %v11087_v19 }
 0x285   :  { %4190 = vmatpush1.bf16.msra.mxu0 %v9190_v10  ;;  %4312 = vmatpush1.bf16.msra.mxu1 %v9192_v11  ;;  %v3455_v10 = vld [vmem:[#allocation2 + $0x1298] sm:$0xff]  ;;  %v9210_v11 = vcombine.low %v3448_v41, %v3450_v43  ;;  %v3462_v41 = vld [vmem:[#allocation2 + $0x1410] sm:$0xff] }
 0x286   :  { %4191 = vmatprep.subr.bf16.mxu0 %v9195_v12  ;;  %4313 = vmatprep.subr.bf16.mxu1 %v9197_v13  ;;  %v9212_v13 = vcombine.low %v3449_v51, %v3451_v52  ;;  %v9217_v18 = vcombine.high %v3453_v16, %v3455_v10  ;;  %v9216_v36 = vcombine.low %v3453_v16, %v3455_v10  ;;  %v3463_v51 = vld [vmem:[#allocation2 + $0x1418] sm:$0xff] }
 0x287   :  { %4176 = vmatprep.mubr.bf16.mxu0 %v10936_v39  ;;  %4298 = vmatprep.mubr.bf16.mxu1 %v10936_v39 }
 0x289   :  { %4192 = vmatpush1.bf16.msra.mxu0 %v9194_v20  ;;  %4314 = vmatpush1.bf16.msra.mxu1 %v9196_v21  ;;  %v3456_v20 = vld [vmem:[#allocation2 + $0x12f0] sm:$0xff] }
 0x28a   :  { %4193 = vmatprep.subr.bf16.mxu0 %v9199_v22  ;;  %4315 = vmatprep.subr.bf16.mxu1 %v9201_v23  ;;  %v3458_v21 = vld [vmem:[#allocation2 + $0x1350] sm:$0xff] }
 0x28b   :  { %v9218_v52 = vcombine.low %v3456_v20, %v3458_v21 }
 0x28c   :  { %4177 = vmatmul.mubr.bf16.gmra.mrb[44].mxu0 %v10940_v48  ;;  %4299 = vmatmul.mubr.bf16.gmra.mrb[44].mxu1 %v10940_v48 }
 0x28d   :  { %4194 = vmatpush1.bf16.msra.mxu0 %v9198_v24  ;;  %4316 = vmatpush1.bf16.msra.mxu1 %v9200_v30 }
 0x28e   :  { %4195 = vmatprep.subr.bf16.mxu0 %v9203_v31  ;;  %4317 = vmatprep.subr.bf16.mxu1 %v9205_v32  ;;  %v9214_v31 = vcombine.low %v3452_v3, %v3454_v5  ;;  %v3465_v5 = vld [vmem:[#allocation2 + $0x1478] sm:$0xff] }
 0x28f   :  { %v2139_v38 = vpop.f32.mrb[12].mxu0  ;;  %4217 = vmatprep.mubr.bf16.mxu0 %v11098_v46  ;;  %v2261_v53 = vpop.f32.mrb[12].mxu1  ;;  %4339 = vmatprep.mubr.bf16.mxu1 %v11098_v46 }
 0x290   :  { %v2141_v47 = vpop.f32.mrb[13].mxu0  ;;  %v2263_v55 = vpop.f32.mrb[13].mxu1 }
 0x291   :  { %v2288_v54 = vmax.f32 %v2139_v38, %v2141_v47  ;;  %v2143_v61 = vpop.f32.mrb[14].mxu0  ;;  %4196 = vmatpush1.bf16.msra.mxu0 %v9202_v44  ;;  %v2293_v57 = vmax.f32 %v2261_v53, %v2263_v55  ;;  %v2265_v63 = vpop.f32.mrb[14].mxu1  ;;  %4318 = vmatpush1.bf16.msra.mxu1 %v9204_v42  ;;  %v9219_v44 = vcombine.high %v3456_v20, %v3458_v21  ;;  %v3461_v47 = vld [vmem:[#allocation2 + $0x13b8] sm:$0xff] }
 0x292   :  { %v2145_v58 = vpop.f32.mrb[15].mxu0  ;;  %4197 = vmatprep.subr.bf16.mxu0 %v9207_v37  ;;  %v2267_v1 = vpop.f32.mrb[15].mxu1  ;;  %4319 = vmatprep.subr.bf16.mxu1 %v9209_v40  ;;  %v9221_v38 = vcombine.high %v3457_v27, %v3459_v28  ;;  %v3460_v40 = vld [vmem:[#allocation2 + $0x13b0] sm:$0xff] }
 0x293   :  { %v2289_v0 = vmax.f32 %v2143_v61, %v2145_v58  ;;  %v2298_v6 = vmax.f32 %v2288_v54, %v2293_v57  ;;  %v2294_v9 = vmax.f32 %v2265_v63, %v2267_v1  ;;  %v9220_v61 = vcombine.low %v3457_v27, %v3459_v28  ;;  %v11106_v57 = vld [vmem:[#allocation4] ss:$0 sm:$0xff]  ;;  %v3469_v28 = vld [vmem:[#allocation2 + $0x1538] sm:$0xff] }
 0x295   :  { %4198 = vmatpush1.bf16.msra.mxu0 %v9206_v56  ;;  %v2299_v12 = vmax.f32 %v2289_v0, %v2294_v9  ;;  %4320 = vmatpush1.bf16.msra.mxu1 %v9208_v62  ;;  %v2303_v15 = vadd.f32 %v11046_v25, %v2298_v6  ;;  %v9223_v56 = vcombine.high %v3460_v40, %v3462_v41  ;;  %v3466_v0 = vld [vmem:[#allocation2 + $0x14d0] sm:$0xff]  ;;  %v3467_v6 = vld [vmem:[#allocation2 + $0x14d8] sm:$0xff] }
 0x296   :  { %4199 = vmatprep.subr.bf16.mxu0 %v9211_v4  ;;  %4321 = vmatprep.subr.bf16.mxu1 %v9213_v2  ;;  %v9225_v62 = vcombine.high %v3461_v47, %v3463_v51  ;;  %v3464_v4 = vld [vmem:[#allocation2 + $0x1470] sm:$0xff] }
 0x297   :  { %v2149_v17 = vpop.f32.mrb[16].mxu0  ;;  %v2304_v22 = vadd.f32 %v11046_v25, %v2299_v12  ;;  %v2271_v23 = vpop.f32.mrb[16].mxu1  ;;  %v2308_v42 = vmax.f32 %v2303_v15, 0.0 }
 0x298   :  { %v2151_v26 = vpop.f32.mrb[17].mxu0  ;;  %v2273_v24 = vpop.f32.mrb[17].mxu1 }
 0x299   :  { %v2290_v29 = vmax.f32 %v2149_v17, %v2151_v26  ;;  %v2153_v30 = vpop.f32.mrb[18].mxu0  ;;  %4200 = vmatpush1.bf16.msra.mxu0 %v9210_v11  ;;  %v2309_v32 = vmax.f32 %v2304_v22, 0.0  ;;  %v2295_v33 = vmax.f32 %v2271_v23, %v2273_v24  ;;  %v2275_v34 = vpop.f32.mrb[18].mxu1  ;;  %4322 = vmatpush1.bf16.msra.mxu1 %v9212_v13  ;;  %v9222_v11 = vcombine.low %v3460_v40, %v3462_v41  ;;  %v3468_v23 = vld [vmem:[#allocation2 + $0x1530] sm:$0xff] }
 0x29a   :  { %v2155_v35 = vpop.f32.mrb[19].mxu0  ;;  %4201 = vmatprep.subr.bf16.mxu0 %v9215_v14  ;;  %v2277_v25 = vpop.f32.mrb[19].mxu1  ;;  %4323 = vmatprep.subr.bf16.mxu1 %v9217_v18  ;;  %v9224_v17 = vcombine.low %v3461_v47, %v3463_v51  ;;  %v9227_v18 = vcombine.high %v3464_v4, %v3466_v0  ;;  %v9229_v22 = vcombine.high %v3465_v5, %v3467_v6  ;;  %v3470_v26 = vld [vmem:[#allocation2 + $0x1590] sm:$0xff] }
 0x29b   :  { %v2291_v37 = vmax.f32 %v2153_v30, %v2155_v35  ;;  %v2300_v43 = vmax.f32 %v2290_v29, %v2295_v33  ;;  %v2296_v53 = vmax.f32 %v2275_v34, %v2277_v25  ;;  %v11104_v54 = vpack.c.bf16 %v2309_v32, %v2308_v42  ;;  %v3471_v29 = vld [vmem:[#allocation2 + $0x1598] sm:$0xff]  ;;  %v3472_v34 = vld [vmem:[#allocation2 + $0x15f0] sm:$0xff] }
 0x29c   :  { %v9226_v24 = vcombine.low %v3464_v4, %v3466_v0  ;;  %v9231_v32 = vcombine.high %v3468_v23, %v3470_v26  ;;  %v9233_v33 = vcombine.high %v3469_v28, %v3471_v29  ;;  %v3474_v35 = vld [vmem:[#allocation2 + $0x1650] sm:$0xff]  ;;  %v9230_v42 = vcombine.low %v3468_v23, %v3470_v26  ;;  %v4406_v23 = vld [vmem:[#allocation2 + $0x220] sm:$0xff]  ;;  %v11117_v26 = vld [vmem:[%s11300_s0 + $0x8] ss:$16 sps:$4 sm:$0xff]  }
 0x29d   :  { %4202 = vmatpush1.bf16.msra.mxu0 %v9214_v31  ;;  %v2301_v55 = vmax.f32 %v2291_v37, %v2296_v53  ;;  %4324 = vmatpush1.bf16.msra.mxu1 %v9216_v36  ;;  %v2305_v63 = vadd.f32 %v11106_v57, %v2300_v43  ;;  %v9228_v31 = vcombine.low %v3465_v5, %v3467_v6  ;;  %v3473_v36 = vld [vmem:[#allocation2 + $0x15f8] sm:$0xff]  ;;  %v3476_v40 = vld [vmem:[#allocation2 + $0x16b0] sm:$0xff]  ;;  %v4397_v5 = vld [vmem:[#allocation2 + $0x48] sm:$0xff] }
 0x29e   :  { %4203 = vmatprep.subr.bf16.mxu0 %v9219_v44  ;;  %4325 = vmatprep.subr.bf16.mxu1 %v9221_v38  ;;  %v3475_v44 = vld [vmem:[#allocation2 + $0x1658] sm:$0xff]  ;;  %v9232_v37 = vcombine.low %v3469_v28, %v3471_v29  ;;  %v9235_v25 = vcombine.high %v3472_v34, %v3474_v35  ;;  %v3478_v41 = vld [vmem:[#allocation2 + $0x1710] sm:$0xff]  ;;  %v9234_v47 = vcombine.low %v3472_v34, %v3474_v35  ;;  %v4399_v6 = vld [vmem:[#allocation2 + $0xa8] sm:$0xff] }
 0x29f   :  { %v2159_v58 = vpop.f32.mrb[20].mxu0  ;;  %v2306_v1 = vadd.f32 %v11106_v57, %v2301_v55  ;;  %v2281_v2 = vpop.f32.mrb[20].mxu1  ;;  %v2310_v20 = vmax.f32 %v2305_v63, 0.0  ;;  %v9237_v38 = vcombine.high %v3473_v36, %v3475_v44  ;;  %v3477_v43 = vld [vmem:[#allocation2 + $0x16b8] sm:$0xff]  ;;  %v9236_v51 = vcombine.low %v3473_v36, %v3475_v44  ;;  %v4405_v28 = vld [vmem:[#allocation2 + $0x1c8] sm:$0xff]  ;;  %v4408_v35 = vld [vmem:[#allocation2 + $0x280] sm:$0xff] }
 0x2a0   :  { %v2161_v3 = vpop.f32.mrb[21].mxu0  ;;  %v2283_v16 = vpop.f32.mrb[21].mxu1  ;;  %v3479_v53 = vld [vmem:[#allocation2 + $0x1718] sm:$0xff]  ;;  %v4407_v29 = vld [vmem:[#allocation2 + $0x228] sm:$0xff]  ;;  %v4410_v36 = vld [vmem:[#allocation2 + $0x2e0] sm:$0xff] }
 0x2a1   :  { %v2292_v9 = vmax.f32 %v2159_v58, %v2161_v3  ;;  %v2163_v10 = vpop.f32.mrb[22].mxu0  ;;  %4204 = vmatpush1.bf16.msra.mxu0 %v9218_v52  ;;  %v2311_v12 = vmax.f32 %v2306_v1, 0.0  ;;  %v2297_v13 = vmax.f32 %v2281_v2, %v2283_v16  ;;  %v2285_v14 = vpop.f32.mrb[22].mxu1  ;;  %4326 = vmatpush1.bf16.msra.mxu1 %v9220_v61  ;;  %v9239_v52 = vcombine.high %v3476_v40, %v3478_v41  ;;  %v3480_v61 = vld [vmem:[#allocation2 + $0x1770] sm:$0xff]  ;;  %v3481_v63 = vld [vmem:[#allocation2 + $0x1778] sm:$0xff]  ;;  %v4396_v2 = vld [vmem:[#allocation2 + $0x40] sm:$0xff] }
 0x2a2   :  { %v2164_v15 = vpop.f32.mrb[23].mxu0  ;;  %4205 = vmatprep.subr.bf16.mxu0 %v9223_v56  ;;  %v2286_v21 = vpop.f32.mrb[23].mxu1  ;;  %4327 = vmatprep.subr.bf16.mxu1 %v9225_v62  ;;  %v9241_v55 = vcombine.high %v3477_v43, %v3479_v53  ;;  %v3482_v56 = vld [vmem:[#allocation2 + $0x17d0] sm:$0xff]  ;;  %v3483_v58 = vld [vmem:[#allocation2 + $0x17d8] sm:$0xff]  ;;  %v9238_v62 = vcombine.low %v3476_v40, %v3478_v41  ;;  %v9240_v4 = vcombine.low %v3477_v43, %v3479_v53  ;;  %v4398_v3 = vld [vmem:[#allocation2 + $0xa0] sm:$0xff] }
 0x2a3   :  { %v11110_v27 = vmax.f32 %v2292_v9, %v2297_v13  ;;  %v11112_v30 = vpack.c.bf16 %v2311_v12, %v2310_v20  ;;  %v9243_v0 = vcombine.high %v3480_v61, %v3482_v56  ;;  %v9245_v1 = vcombine.high %v3481_v63, %v3483_v58  ;;  %v4400_v12 = vld [vmem:[#allocation2 + $0x100] sm:$0xff]  ;;  %v4401_v14 = vld [vmem:[#allocation2 + $0x108] sm:$0xff] }
 0x2a4   :  { %v9242_v9 = vcombine.low %v3480_v61, %v3482_v56  ;;  %v9244_v16 = vcombine.low %v3481_v63, %v3483_v58  ;;  %v9247_v10 = vcombine.high %v4396_v2, %v4398_v3  ;;  %v4402_v13 = vld [vmem:[#allocation2 + $0x160] sm:$0xff]  ;;  %v4403_v15 = vld [vmem:[#allocation2 + $0x168] sm:$0xff]  ;;  %v9257_v34 = vcombine.high %v4405_v28, %v4407_v29 }
 0x2a5   :  { %4206 = vmatpush1.bf16.msra.mxu0 %v9222_v11  ;;  %4328 = vmatpush1.bf16.msra.mxu1 %v9224_v17  ;;  %v9249_v11 = vcombine.high %v4397_v5, %v4399_v6  ;;  %v9246_v17 = vcombine.low %v4396_v2, %v4398_v3  ;;  %v9251_v20 = vcombine.high %v4400_v12, %v4402_v13  ;;  %v4409_v44 = vld [vmem:[#allocation2 + $0x288] sm:$0xff]  ;;  %v4412_v41 = vld [vmem:[#allocation2 + $0x340] sm:$0xff] }
 0x2a6   :  { %4207 = vmatprep.subr.bf16.mxu0 %v9227_v18  ;;  %4329 = vmatprep.subr.bf16.mxu1 %v9229_v22  ;;  %v9248_v18 = vcombine.low %v4397_v5, %v4399_v6  ;;  %v9253_v21 = vcombine.high %v4401_v14, %v4403_v15  ;;  %v4404_v22 = vld [vmem:[#allocation2 + $0x1c0] sm:$0xff]  ;;  %v11131_v53 = vld [vmem:[%s11300_s0 + $0x28] ss:$16 sps:$4 sm:$0xff]  }
 0x2a7   :  { %v4414_v43 = vld [vmem:[#allocation2 + $0x3a0] sm:$0xff] }
 0x2a8   :  { %v9263_v61 = vcombine.high %v4412_v41, %v4414_v43  ;;  %v4416_v63 = vld [vmem:[#allocation2 + $0x400] sm:$0xff] }
 0x2a9   :  { %4208 = vmatpush1.bf16.msra.mxu0 %v9226_v24  ;;  %4330 = vmatpush1.bf16.msra.mxu1 %v9228_v31  ;;  %v9250_v24 = vcombine.low %v4400_v12, %v4402_v13  ;;  %v9252_v31 = vcombine.low %v4401_v14, %v4403_v15  ;;  %v4418_v58 = vld [vmem:[#allocation2 + $0x460] sm:$0xff] }
 0x2aa   :  { %4209 = vmatprep.subr.bf16.mxu0 %v9231_v32  ;;  %4331 = vmatprep.subr.bf16.mxu1 %v9233_v33  ;;  %v9255_v32 = vcombine.high %v4404_v22, %v4406_v23  ;;  %v11124_v33 = vld [vmem:[%s11300_s0 + $0x2c] ss:$16 sps:$4 sm:$0xff]   ;;  %v9267_v2 = vcombine.high %v4416_v63, %v4418_v58  ;;  %v4420_v5 = vld [vmem:[#allocation2 + $0x4c0] sm:$0xff] }
 0x2ab   :  { %v4422_v6 = vld [vmem:[#allocation2 + $0x520] sm:$0xff] }
 0x2ac   :  { %v9271_v12 = vcombine.high %v4420_v5, %v4422_v6  ;;  %v4424_v14 = vld [vmem:[#allocation2 + $0x580] sm:$0xff] }
 0x2ad   :  { %4210 = vmatpush1.bf16.msra.mxu0 %v9230_v42  ;;  %4332 = vmatpush1.bf16.msra.mxu1 %v9232_v37  ;;  %v4411_v42 = vld [vmem:[#allocation2 + $0x2e8] sm:$0xff]  ;;  %v9254_v37 = vcombine.low %v4404_v22, %v4406_v23  ;;  %v4426_v15 = vld [vmem:[#allocation2 + $0x5e0] sm:$0xff] }
 0x2ae   :  { %4211 = vmatprep.subr.bf16.mxu0 %v9235_v25  ;;  %4333 = vmatprep.subr.bf16.mxu1 %v9237_v38  ;;  %v9256_v25 = vcombine.low %v4405_v28, %v4407_v29  ;;  %v9259_v38 = vcombine.high %v4408_v35, %v4410_v36  ;;  %v9261_v40 = vcombine.high %v4409_v44, %v4411_v42  ;;  %v4428_v29 = vld [vmem:[#allocation2 + $0x640] sm:$0xff] }
 0x2af   :  { %v9275_v23 = vcombine.high %v4424_v14, %v4426_v15 }
 0x2b1   :  { %4212 = vmatpush1.bf16.msra.mxu0 %v9234_v47  ;;  %4334 = vmatpush1.bf16.msra.mxu1 %v9236_v51  ;;  %v4413_v47 = vld [vmem:[#allocation2 + $0x348] sm:$0xff] }
 0x2b2   :  { %4213 = vmatprep.subr.bf16.mxu0 %v9239_v52  ;;  %4335 = vmatprep.subr.bf16.mxu1 %v9241_v55  ;;  %v4415_v51 = vld [vmem:[#allocation2 + $0x3a8] sm:$0xff]  ;;  %v9258_v52 = vcombine.low %v4408_v35, %v4410_v36  ;;  %v9260_v55 = vcombine.low %v4409_v44, %v4411_v42  ;;  %v4432_v42 = vld [vmem:[#allocation2 + $0x700] sm:$0xff] }
 0x2b3   :  { %v9265_v56 = vcombine.high %v4413_v47, %v4415_v51 }
 0x2b5   :  { %4214 = vmatpush1.bf16.msra.mxu0 %v9238_v62  ;;  %4336 = vmatpush1.bf16.msra.mxu1 %v9240_v4  ;;  %v4417_v62 = vld [vmem:[#allocation2 + $0x408] sm:$0xff] }
 0x2b6   :  { %4215 = vmatprep.subr.bf16.mxu0 %v9243_v0  ;;  %4337 = vmatprep.subr.bf16.mxu1 %v9245_v1  ;;  %v4419_v4 = vld [vmem:[#allocation2 + $0x468] sm:$0xff]  ;;  %v9262_v0 = vcombine.low %v4412_v41, %v4414_v43  ;;  %v9264_v1 = vcombine.low %v4413_v47, %v4415_v51  ;;  %v4436_v51 = vld [vmem:[#allocation2 + $0x7c0] sm:$0xff] }
 0x2b7   :  { %v9269_v3 = vcombine.high %v4417_v62, %v4419_v4 }
 0x2b9   :  { %4216 = vmatpush1.bf16.msra.mxu0 %v9242_v9  ;;  %4338 = vmatpush1.bf16.msra.mxu1 %v9244_v16  ;;  %v4421_v9 = vld [vmem:[#allocation2 + $0x4c8] sm:$0xff] }
 0x2ba   :  { %5164 = vmatprep.subr.bf16.mxu0 %v9247_v10  ;;  %5286 = vmatprep.subr.bf16.mxu1 %v9249_v11  ;;  %v4423_v16 = vld [vmem:[#allocation2 + $0x528] sm:$0xff]  ;;  %v9266_v10 = vcombine.low %v4416_v63, %v4418_v58  ;;  %v9268_v11 = vcombine.low %v4417_v62, %v4419_v4  ;;  %v4440_v4 = vld [vmem:[#allocation2 + $0x880] sm:$0xff] }
 0x2bb   :  { %v9273_v13 = vcombine.high %v4421_v9, %v4423_v16  ;;  %v9272_v22 = vcombine.low %v4421_v9, %v4423_v16  ;;  %v4444_v16 = vld [vmem:[#allocation2 + $0x940] sm:$0xff] }
 0x2bc   :  { %4218 = vmatmul.mubr.bf16.vlgmr.msra.gmra.mrb[36].mxu0 %v11117_v26  ;;  %4340 = vmatmul.mubr.bf16.vlgmr.msra.gmra.mrb[36].mxu1 %v11117_v26 }
 0x2bd   :  { %5165 = vmatpush1.bf16.msra.mxu0 %v9246_v17  ;;  %5287 = vmatpush1.bf16.msra.mxu1 %v9248_v18  ;;  %v11142_v17 = vld [vmem:[%s11300_s0 + $0x4] ss:$16 sps:$4 sm:$0xff]   ;;  %v4425_v18 = vld [vmem:[#allocation2 + $0x588] sm:$0xff] }
 0x2be   :  { %5166 = vmatprep.subr.bf16.mxu0 %v9251_v20  ;;  %5288 = vmatprep.subr.bf16.mxu1 %v9253_v21  ;;  %v4427_v20 = vld [vmem:[#allocation2 + $0x5e8] sm:$0xff]  ;;  %v9270_v21 = vcombine.low %v4420_v5, %v4422_v6 }
 0x2bf   :  { %4227 = vmatprep.mubr.bf16.mxu0 %v11124_v33  ;;  %4349 = vmatprep.mubr.bf16.mxu1 %v11124_v33  ;;  %v9277_v28 = vcombine.high %v4425_v18, %v4427_v20  ;;  %v9276_v35 = vcombine.low %v4425_v18, %v4427_v20  ;;  %v4448_v20 = vld [vmem:[#allocation2 + $0xa00] sm:$0xff] }
 0x2c1   :  { %5167 = vmatpush1.bf16.msra.mxu0 %v9250_v24  ;;  %5289 = vmatpush1.bf16.msra.mxu1 %v9252_v31  ;;  %v4430_v24 = vld [vmem:[#allocation2 + $0x6a0] sm:$0xff]  ;;  %v4429_v31 = vld [vmem:[#allocation2 + $0x648] sm:$0xff] }
 0x2c2   :  { %5168 = vmatprep.subr.bf16.mxu0 %v9255_v32  ;;  %5290 = vmatprep.subr.bf16.mxu1 %v9257_v34  ;;  %v4431_v32 = vld [vmem:[#allocation2 + $0x6a8] sm:$0xff]  ;;  %v9274_v34 = vcombine.low %v4424_v14, %v4426_v15  ;;  %v9279_v36 = vcombine.high %v4428_v29, %v4430_v24 }
 0x2c3   :  { %v9281_v44 = vcombine.high %v4429_v31, %v4431_v32  ;;  %v9280_v41 = vcombine.low %v4429_v31, %v4431_v32  ;;  %v4452_v32 = vld [vmem:[#allocation2 + $0xac0] sm:$0xff] }
 0x2c4   :  { %4228 = vmatmul.mubr.bf16.gmra.mrb[40].mxu0 %v11131_v53  ;;  %4350 = vmatmul.mubr.bf16.gmra.mrb[40].mxu1 %v11131_v53 }
 0x2c5   :  { %5169 = vmatpush1.bf16.msra.mxu0 %v9254_v37  ;;  %5291 = vmatpush1.bf16.msra.mxu1 %v9256_v25  ;;  %v4434_v37 = vld [vmem:[#allocation2 + $0x760] sm:$0xff]  ;;  %v4433_v25 = vld [vmem:[#allocation2 + $0x708] sm:$0xff] }
 0x2c6   :  { %5170 = vmatprep.subr.bf16.mxu0 %v9259_v38  ;;  %5292 = vmatprep.subr.bf16.mxu1 %v9261_v40  ;;  %v4435_v38 = vld [vmem:[#allocation2 + $0x768] sm:$0xff]  ;;  %v9278_v40 = vcombine.low %v4428_v29, %v4430_v24  ;;  %v9283_v43 = vcombine.high %v4432_v42, %v4434_v37 }
 0x2c7   :  { %4237 = vmatprep.mubr.bf16.mxu0 %v10959_v49  ;;  %4359 = vmatprep.mubr.bf16.mxu1 %v10959_v49  ;;  %v9285_v47 = vcombine.high %v4433_v25, %v4435_v38  ;;  %v9284_v63 = vcombine.low %v4433_v25, %v4435_v38  ;;  %v4456_v38 = vld [vmem:[#allocation2 + $0xb80] sm:$0xff] }
 0x2c9   :  { %5171 = vmatpush1.bf16.msra.mxu0 %v9258_v52  ;;  %5293 = vmatpush1.bf16.msra.mxu1 %v9260_v55  ;;  %v4438_v52 = vld [vmem:[#allocation2 + $0x820] sm:$0xff]  ;;  %v4437_v55 = vld [vmem:[#allocation2 + $0x7c8] sm:$0xff] }
 0x2ca   :  { %5172 = vmatprep.subr.bf16.mxu0 %v9263_v61  ;;  %5294 = vmatprep.subr.bf16.mxu1 %v9265_v56  ;;  %v4439_v61 = vld [vmem:[#allocation2 + $0x828] sm:$0xff]  ;;  %v9282_v56 = vcombine.low %v4432_v42, %v4434_v37  ;;  %v9287_v58 = vcombine.high %v4436_v51, %v4438_v52 }
 0x2cb   :  { %v9289_v62 = vcombine.high %v4437_v55, %v4439_v61  ;;  %v9288_v5 = vcombine.low %v4437_v55, %v4439_v61  ;;  %v4460_v61 = vld [vmem:[#allocation2 + $0xc40] sm:$0xff] }
 0x2cc   :  { %4238 = vmatmul.mubr.bf16.gmra.mrb[44].mxu0 %v10963_v59  ;;  %4360 = vmatmul.mubr.bf16.gmra.mrb[44].mxu1 %v10963_v59 }
 0x2cd   :  { %5173 = vmatpush1.bf16.msra.mxu0 %v9262_v0  ;;  %5295 = vmatpush1.bf16.msra.mxu1 %v9264_v1  ;;  %v4442_v0 = vld [vmem:[#allocation2 + $0x8e0] sm:$0xff]  ;;  %v4441_v1 = vld [vmem:[#allocation2 + $0x888] sm:$0xff] }
 0x2ce   :  { %5174 = vmatprep.subr.bf16.mxu0 %v9267_v2  ;;  %5296 = vmatprep.subr.bf16.mxu1 %v9269_v3  ;;  %v4443_v2 = vld [vmem:[#allocation2 + $0x8e8] sm:$0xff]  ;;  %v9286_v3 = vcombine.low %v4436_v51, %v4438_v52  ;;  %v9291_v6 = vcombine.high %v4440_v4, %v4442_v0 }
 0x2cf   :  { %5196 = vmatprep.mubr.bf16.mxu0 %v11142_v17  ;;  %5318 = vmatprep.mubr.bf16.mxu1 %v11142_v17  ;;  %v9293_v9 = vcombine.high %v4441_v1, %v4443_v2  ;;  %v9292_v14 = vcombine.low %v4441_v1, %v4443_v2  ;;  %v4464_v2 = vld [vmem:[#allocation2 + $0xd00] sm:$0xff] }
 0x2d1   :  { %5175 = vmatpush1.bf16.msra.mxu0 %v9266_v10  ;;  %5297 = vmatpush1.bf16.msra.mxu1 %v9268_v11  ;;  %v4446_v10 = vld [vmem:[#allocation2 + $0x9a0] sm:$0xff]  ;;  %v4445_v11 = vld [vmem:[#allocation2 + $0x948] sm:$0xff] }
 0x2d2   :  { %5176 = vmatprep.subr.bf16.mxu0 %v9271_v12  ;;  %5298 = vmatprep.subr.bf16.mxu1 %v9273_v13  ;;  %v4447_v12 = vld [vmem:[#allocation2 + $0x9a8] sm:$0xff]  ;;  %v9290_v13 = vcombine.low %v4440_v4, %v4442_v0  ;;  %v9295_v15 = vcombine.high %v4444_v16, %v4446_v10 }
 0x2d3   :  { %v9297_v18 = vcombine.high %v4445_v11, %v4447_v12  ;;  %v9296_v29 = vcombine.low %v4445_v11, %v4447_v12  ;;  %v4468_v12 = vld [vmem:[#allocation2 + $0xdc0] sm:$0xff] }
 0x2d5   :  { %5177 = vmatpush1.bf16.msra.mxu0 %v9270_v21  ;;  %5299 = vmatpush1.bf16.msra.mxu1 %v9272_v22  ;;  %v4450_v21 = vld [vmem:[#allocation2 + $0xa60] sm:$0xff]  ;;  %v4449_v22 = vld [vmem:[#allocation2 + $0xa08] sm:$0xff] }
 0x2d6   :  { %5178 = vmatprep.subr.bf16.mxu0 %v9275_v23  ;;  %5300 = vmatprep.subr.bf16.mxu1 %v9277_v28  ;;  %v4451_v23 = vld [vmem:[#allocation2 + $0xa68] sm:$0xff]  ;;  %v9294_v28 = vcombine.low %v4444_v16, %v4446_v10  ;;  %v9299_v24 = vcombine.high %v4448_v20, %v4450_v21 }
 0x2d7   :  { %v9301_v31 = vcombine.high %v4449_v22, %v4451_v23  ;;  %v9300_v42 = vcombine.low %v4449_v22, %v4451_v23  ;;  %v4472_v23 = vld [vmem:[#allocation2 + $0xe80] sm:$0xff] }
 0x2d9   :  { %5179 = vmatpush1.bf16.msra.mxu0 %v9274_v34  ;;  %5301 = vmatpush1.bf16.msra.mxu1 %v9276_v35  ;;  %v4454_v34 = vld [vmem:[#allocation2 + $0xb20] sm:$0xff]  ;;  %v4453_v35 = vld [vmem:[#allocation2 + $0xac8] sm:$0xff] }
 0x2da   :  { %5180 = vmatprep.subr.bf16.mxu0 %v9279_v36  ;;  %5302 = vmatprep.subr.bf16.mxu1 %v9281_v44  ;;  %v4455_v36 = vld [vmem:[#allocation2 + $0xb28] sm:$0xff]  ;;  %v9298_v44 = vcombine.low %v4448_v20, %v4450_v21  ;;  %v9303_v37 = vcombine.high %v4452_v32, %v4454_v34 }
 0x2db   :  { %v9305_v25 = vcombine.high %v4453_v35, %v4455_v36  ;;  %v9304_v51 = vcombine.low %v4453_v35, %v4455_v36  ;;  %v4476_v35 = vld [vmem:[#allocation2 + $0xf40] sm:$0xff] }
 0x2dc   :  { %v4478_v36 = vld [vmem:[#allocation2 + $0xfa0] sm:$0xff] }
 0x2dd   :  { %5181 = vmatpush1.bf16.msra.mxu0 %v9278_v40  ;;  %5303 = vmatpush1.bf16.msra.mxu1 %v9280_v41  ;;  %v4458_v40 = vld [vmem:[#allocation2 + $0xbe0] sm:$0xff]  ;;  %v4457_v41 = vld [vmem:[#allocation2 + $0xb88] sm:$0xff] }
 0x2de   :  { %5182 = vmatprep.subr.bf16.mxu0 %v9283_v43  ;;  %5304 = vmatprep.subr.bf16.mxu1 %v9285_v47  ;;  %v4459_v43 = vld [vmem:[#allocation2 + $0xbe8] sm:$0xff]  ;;  %v9302_v47 = vcombine.low %v4452_v32, %v4454_v34  ;;  %v9307_v52 = vcombine.high %v4456_v38, %v4458_v40 }
 0x2df   :  { %v9309_v55 = vcombine.high %v4457_v41, %v4459_v43  ;;  %v9308_v4 = vcombine.low %v4457_v41, %v4459_v43  ;;  %v4482_v41 = vld [vmem:[#allocation2 + $0x1060] sm:$0xff]  ;;  %v4481_v43 = vld [vmem:[#allocation2 + $0x1008] sm:$0xff] }
 0x2e1   :  { %5183 = vmatpush1.bf16.msra.mxu0 %v9282_v56  ;;  %5305 = vmatpush1.bf16.msra.mxu1 %v9284_v63  ;;  %v4462_v56 = vld [vmem:[#allocation2 + $0xca0] sm:$0xff]  ;;  %v4461_v63 = vld [vmem:[#allocation2 + $0xc48] sm:$0xff] }
 0x2e2   :  { %5184 = vmatprep.subr.bf16.mxu0 %v9287_v58  ;;  %5306 = vmatprep.subr.bf16.mxu1 %v9289_v62  ;;  %v4463_v58 = vld [vmem:[#allocation2 + $0xca8] sm:$0xff]  ;;  %v9306_v62 = vcombine.low %v4456_v38, %v4458_v40  ;;  %v9311_v0 = vcombine.high %v4460_v61, %v4462_v56  ;;  %v4480_v40 = vld [vmem:[#allocation2 + $0x1000] sm:$0xff] }
 0x2e3   :  { %v9313_v1 = vcombine.high %v4461_v63, %v4463_v58  ;;  %v9312_v16 = vcombine.low %v4461_v63, %v4463_v58  ;;  %v4485_v63 = vld [vmem:[#allocation2 + $0x10c8] sm:$0xff] }
 0x2e4   :  { %v4487_v58 = vld [vmem:[#allocation2 + $0x1128] sm:$0xff] }
 0x2e5   :  { %5185 = vmatpush1.bf16.msra.mxu0 %v9286_v3  ;;  %5307 = vmatpush1.bf16.msra.mxu1 %v9288_v5  ;;  %v4466_v3 = vld [vmem:[#allocation2 + $0xd60] sm:$0xff]  ;;  %v4465_v5 = vld [vmem:[#allocation2 + $0xd08] sm:$0xff] }
 0x2e6   :  { %5186 = vmatprep.subr.bf16.mxu0 %v9291_v6  ;;  %5308 = vmatprep.subr.bf16.mxu1 %v9293_v9  ;;  %v4467_v6 = vld [vmem:[#allocation2 + $0xd68] sm:$0xff]  ;;  %v9310_v9 = vcombine.low %v4460_v61, %v4462_v56  ;;  %v9315_v10 = vcombine.high %v4464_v2, %v4466_v3  ;;  %v4484_v61 = vld [vmem:[#allocation2 + $0x10c0] sm:$0xff] }
 0x2e7   :  { %v9317_v11 = vcombine.high %v4465_v5, %v4467_v6  ;;  %v9316_v20 = vcombine.low %v4465_v5, %v4467_v6  ;;  %v4486_v56 = vld [vmem:[#allocation2 + $0x1120] sm:$0xff] }
 0x2e8   :  { %v4490_v5 = vld [vmem:[#allocation2 + $0x11e0] sm:$0xff] }
 0x2e9   :  { %5187 = vmatpush1.bf16.msra.mxu0 %v9290_v13  ;;  %5309 = vmatpush1.bf16.msra.mxu1 %v9292_v14  ;;  %v4470_v13 = vld [vmem:[#allocation2 + $0xe20] sm:$0xff]  ;;  %v4469_v14 = vld [vmem:[#allocation2 + $0xdc8] sm:$0xff] }
 0x2ea   :  { %5188 = vmatprep.subr.bf16.mxu0 %v9295_v15  ;;  %5310 = vmatprep.subr.bf16.mxu1 %v9297_v18  ;;  %v4471_v15 = vld [vmem:[#allocation2 + $0xe28] sm:$0xff]  ;;  %v9314_v18 = vcombine.low %v4464_v2, %v4466_v3  ;;  %v9319_v21 = vcombine.high %v4468_v12, %v4470_v13  ;;  %v9337_v2 = vcombine.high %v4485_v63, %v4487_v58  ;;  %v4488_v3 = vld [vmem:[#allocation2 + $0x1180] sm:$0xff] }
 0x2eb   :  { %v9321_v22 = vcombine.high %v4469_v14, %v4471_v15 }
 0x2ed   :  { %5189 = vmatpush1.bf16.msra.mxu0 %v9294_v28  ;;  %5311 = vmatpush1.bf16.msra.mxu1 %v9296_v29  ;;  %v4474_v28 = vld [vmem:[#allocation2 + $0xee0] sm:$0xff]  ;;  %v4473_v29 = vld [vmem:[#allocation2 + $0xe88] sm:$0xff] }
 0x2ee   :  { %5190 = vmatprep.subr.bf16.mxu0 %v9299_v24  ;;  %5312 = vmatprep.subr.bf16.mxu1 %v9301_v31  ;;  %v4475_v24 = vld [vmem:[#allocation2 + $0xee8] sm:$0xff]  ;;  %v9318_v31 = vcombine.low %v4468_v12, %v4470_v13  ;;  %v9323_v32 = vcombine.high %v4472_v23, %v4474_v28 }
 0x2ef   :  { %v9325_v34 = vcombine.high %v4473_v29, %v4475_v24 }
 0x2f1   :  { %5191 = vmatpush1.bf16.msra.mxu0 %v9298_v44  ;;  %5313 = vmatpush1.bf16.msra.mxu1 %v9300_v42  ;;  %v4477_v44 = vld [vmem:[#allocation2 + $0xf48] sm:$0xff] }
 0x2f2   :  { %5192 = vmatprep.subr.bf16.mxu0 %v9303_v37  ;;  %5314 = vmatprep.subr.bf16.mxu1 %v9305_v25  ;;  %v4479_v42 = vld [vmem:[#allocation2 + $0xfa8] sm:$0xff]  ;;  %v9322_v37 = vcombine.low %v4472_v23, %v4474_v28  ;;  %v9327_v25 = vcombine.high %v4476_v35, %v4478_v36 }
 0x2f3   :  { %v9329_v38 = vcombine.high %v4477_v44, %v4479_v42 }
 0x2f5   :  { %5193 = vmatpush1.bf16.msra.mxu0 %v9302_v47  ;;  %5315 = vmatpush1.bf16.msra.mxu1 %v9304_v51  ;;  %v4483_v47 = vld [vmem:[#allocation2 + $0x1068] sm:$0xff]  ;;  %v9326_v51 = vcombine.low %v4476_v35, %v4478_v36  ;;  %v9338_v35 = vcombine.low %v4488_v3, %v4490_v5 }
 0x2f6   :  { %5194 = vmatprep.subr.bf16.mxu0 %v9307_v52  ;;  %5316 = vmatprep.subr.bf16.mxu1 %v9309_v55  ;;  %v9328_v52 = vcombine.low %v4477_v44, %v4479_v42  ;;  %v9333_v55 = vcombine.high %v4481_v43, %v4483_v47 }
 0x2f9   :  { %5195 = vmatpush1.bf16.msra.mxu0 %v9306_v62  ;;  %5317 = vmatpush1.bf16.msra.mxu1 %v9308_v4  ;;  %v9330_v62 = vcombine.low %v4480_v40, %v4482_v41  ;;  %v9332_v4 = vcombine.low %v4481_v43, %v4483_v47 }
 0x2fa   :  { %5225 = vmatprep.subr.bf16.mxu0 %v9311_v0  ;;  %5347 = vmatprep.subr.bf16.mxu1 %v9313_v1  ;;  %v9335_v0 = vcombine.high %v4484_v61, %v4486_v56 }
 0x2fc   :  { %5197 = vmatmul.mubr.bf16.vlgmr.msra.gmra.mrb[48].mxu0 %v11073_v60  ;;  %5319 = vmatmul.mubr.bf16.vlgmr.msra.gmra.mrb[48].mxu1 %v11073_v60  ;;  %v9320_v60 = vcombine.low %v4469_v14, %v4471_v15  ;;  %v9334_v14 = vcombine.low %v4484_v61, %v4486_v56 }
 0x2fd   :  { %5226 = vmatpush1.bf16.msra.mxu0 %v9310_v9  ;;  %5348 = vmatpush1.bf16.msra.mxu1 %v9312_v16  ;;  %v4489_v16 = vld [vmem:[#allocation2 + $0x1188] sm:$0xff] }
 0x2fe   :  { %5227 = vmatprep.subr.bf16.mxu0 %v9315_v10  ;;  %5349 = vmatprep.subr.bf16.mxu1 %v9317_v11  ;;  %v4491_v10 = vld [vmem:[#allocation2 + $0x11e8] sm:$0xff] }
 0x2ff   :  { %5206 = vmatprep.mubr.bf16.mxu0 %v11080_v8  ;;  %5328 = vmatprep.mubr.bf16.mxu1 %v11080_v8  ;;  %v9324_v8 = vcombine.low %v4473_v29, %v4475_v24  ;;  %v9341_v29 = vcombine.high %v4489_v16, %v4491_v10  ;;  %v4492_v24 = vld [vmem:[#allocation2 + $0x1240] sm:$0xff]  ;;  %v9340_v36 = vcombine.low %v4489_v16, %v4491_v10 }
 0x300   :  { %v4502_v16 = vld [vmem:[#allocation2 + $0x1420] sm:$0xff] }
 0x301   :  { %5228 = vmatpush1.bf16.msra.mxu0 %v9314_v18  ;;  %5350 = vmatpush1.bf16.msra.mxu1 %v9316_v20 }
 0x302   :  { %5229 = vmatprep.subr.bf16.mxu0 %v9319_v21  ;;  %5351 = vmatprep.subr.bf16.mxu1 %v9321_v22  ;;  %v9336_v21 = vcombine.low %v4485_v63, %v4487_v58  ;;  %v9339_v22 = vcombine.high %v4488_v3, %v4490_v5 }
 0x304   :  { %5207 = vmatmul.mubr.bf16.gmra.mrb[52].mxu0 %v11087_v19  ;;  %5329 = vmatmul.mubr.bf16.gmra.mrb[52].mxu1 %v11087_v19  ;;  %v9331_v19 = vcombine.high %v4480_v40, %v4482_v41  ;;  %v4498_v40 = vld [vmem:[#allocation2 + $0x1360] sm:$0xff] }
 0x305   :  { %5230 = vmatpush1.bf16.msra.mxu0 %v9318_v31  ;;  %5352 = vmatpush1.bf16.msra.mxu1 %v9320_v60  ;;  %v4494_v31 = vld [vmem:[#allocation2 + $0x12a0] sm:$0xff] }
 0x306   :  { %5231 = vmatprep.subr.bf16.mxu0 %v9323_v32  ;;  %5353 = vmatprep.subr.bf16.mxu1 %v9325_v34  ;;  %v4493_v32 = vld [vmem:[#allocation2 + $0x1248] sm:$0xff]  ;;  %v9342_v56 = vcombine.low %v4492_v24, %v4494_v31 }
 0x307   :  { %5216 = vmatprep.mubr.bf16.mxu0 %v10936_v39  ;;  %5338 = vmatprep.mubr.bf16.mxu1 %v10936_v39  ;;  %v4495_v34 = vld [vmem:[#allocation2 + $0x12a8] sm:$0xff] }
 0x308   :  { %v9344_v63 = vcombine.low %v4493_v32, %v4495_v34 }
 0x309   :  { %5232 = vmatpush1.bf16.msra.mxu0 %v9322_v37  ;;  %5354 = vmatpush1.bf16.msra.mxu1 %v9324_v8  ;;  %v9343_v37 = vcombine.high %v4492_v24, %v4494_v31  ;;  %v4506_v24 = vld [vmem:[#allocation2 + $0x14e0] sm:$0xff] }
 0x30a   :  { %5233 = vmatprep.subr.bf16.mxu0 %v9327_v25  ;;  %5355 = vmatprep.subr.bf16.mxu1 %v9329_v38  ;;  %v9345_v25 = vcombine.high %v4493_v32, %v4495_v34  ;;  %v4496_v38 = vld [vmem:[#allocation2 + $0x1300] sm:$0xff]  ;;  %v4505_v32 = vld [vmem:[#allocation2 + $0x1488] sm:$0xff] }
 0x30b   :  { %v4507_v34 = vld [vmem:[#allocation2 + $0x14e8] sm:$0xff] }
 0x30c   :  { %5217 = vmatmul.mubr.bf16.gmra.mrb[56].mxu0 %v10940_v48  ;;  %5339 = vmatmul.mubr.bf16.gmra.mrb[56].mxu1 %v10940_v48 }
 0x30d   :  { %5234 = vmatpush1.bf16.msra.mxu0 %v9326_v51  ;;  %5356 = vmatpush1.bf16.msra.mxu1 %v9328_v52  ;;  %v4497_v51 = vld [vmem:[#allocation2 + $0x1308] sm:$0xff] }
 0x30e   :  { %5235 = vmatprep.subr.bf16.mxu0 %v9331_v19  ;;  %5357 = vmatprep.subr.bf16.mxu1 %v9333_v55  ;;  %v4499_v52 = vld [vmem:[#allocation2 + $0x1368] sm:$0xff] }
 0x30f   :  { %v3179_v1 = vpop.f32.mrb[24].mxu0  ;;  %5257 = vmatprep.mubr.bf16.mxu0 %v11098_v46  ;;  %v3301_v6 = vpop.f32.mrb[24].mxu1  ;;  %5379 = vmatprep.mubr.bf16.mxu1 %v11098_v46 }
 0x310   :  { %v3181_v9 = vpop.f32.mrb[25].mxu0  ;;  %v3303_v12 = vpop.f32.mrb[25].mxu1 }
 0x311   :  { %v3328_v11 = vmax.f32 %v3179_v1, %v3181_v9  ;;  %v3183_v13 = vpop.f32.mrb[26].mxu0  ;;  %5236 = vmatpush1.bf16.msra.mxu0 %v9330_v62  ;;  %v3333_v15 = vmax.f32 %v3301_v6, %v3303_v12  ;;  %v3305_v18 = vpop.f32.mrb[26].mxu1  ;;  %5358 = vmatpush1.bf16.msra.mxu1 %v9332_v4  ;;  %v9349_v6 = vcombine.high %v4497_v51, %v4499_v52  ;;  %v4500_v9 = vld [vmem:[#allocation2 + $0x13c0] sm:$0xff] }
 0x312   :  { %v3185_v20 = vpop.f32.mrb[27].mxu0  ;;  %5237 = vmatprep.subr.bf16.mxu0 %v9335_v0  ;;  %v3307_v28 = vpop.f32.mrb[27].mxu1  ;;  %5359 = vmatprep.subr.bf16.mxu1 %v9337_v2  ;;  %v9347_v2 = vcombine.high %v4496_v38, %v4498_v40 }
 0x313   :  { %v3329_v23 = vmax.f32 %v3183_v13, %v3185_v20  ;;  %v3338_v60 = vmax.f32 %v3328_v11, %v3333_v15  ;;  %v3334_v46 = vmax.f32 %v3305_v18, %v3307_v28  ;;  %v4501_v13 = vld [vmem:[#allocation2 + $0x13c8] sm:$0xff]  ;;  %v9346_v15 = vcombine.low %v4496_v38, %v4498_v40 }
 0x314   :  { %v9348_v20 = vcombine.low %v4497_v51, %v4499_v52  ;;  %v4508_v51 = vld [vmem:[#allocation2 + $0x1540] sm:$0xff] }
 0x315   :  { %5238 = vmatpush1.bf16.msra.mxu0 %v9334_v14  ;;  %v3343_v44 = vadd.f32 %v11106_v57, %v3338_v60  ;;  %v3339_v42 = vmax.f32 %v3329_v23, %v3334_v46  ;;  %5360 = vmatpush1.bf16.msra.mxu1 %v9336_v21  ;;  %v4503_v14 = vld [vmem:[#allocation2 + $0x1428] sm:$0xff]  ;;  %v9351_v21 = vcombine.high %v4500_v9, %v4502_v16  ;;  %v4510_v52 = vld [vmem:[#allocation2 + $0x15a0] sm:$0xff] }
 0x316   :  { %5239 = vmatprep.subr.bf16.mxu0 %v9339_v22  ;;  %5361 = vmatprep.subr.bf16.mxu1 %v9341_v29  ;;  %v9353_v28 = vcombine.high %v4501_v13, %v4503_v14  ;;  %v4504_v29 = vld [vmem:[#allocation2 + $0x1480] sm:$0xff]  ;;  %v9352_v40 = vcombine.low %v4501_v13, %v4503_v14  ;;  %v4517_v13 = vld [vmem:[#allocation2 + $0x16c8] sm:$0xff] }
 0x317   :  { %v3189_v8 = vpop.f32.mrb[28].mxu0  ;;  %v3344_v41 = vadd.f32 %v11106_v57, %v3339_v42  ;;  %v3311_v43 = vpop.f32.mrb[28].mxu1  ;;  %v3348_v58 = vmax.f32 %v3343_v44, 0.0  ;;  %v9350_v42 = vcombine.low %v4500_v9, %v4502_v16  ;;  %v4519_v14 = vld [vmem:[#allocation2 + $0x1728] sm:$0xff] }
 0x318   :  { %v3191_v47 = vpop.f32.mrb[29].mxu0  ;;  %v3313_v55 = vpop.f32.mrb[29].mxu1 }
 0x319   :  { %v3330_v19 = vmax.f32 %v3189_v8, %v3191_v47  ;;  %v3193_v61 = vpop.f32.mrb[30].mxu0  ;;  %5240 = vmatpush1.bf16.msra.mxu0 %v9338_v35  ;;  %v3349_v62 = vmax.f32 %v3344_v41, 0.0  ;;  %v3335_v4 = vmax.f32 %v3311_v43, %v3313_v55  ;;  %v3315_v0 = vpop.f32.mrb[30].mxu1  ;;  %5362 = vmatpush1.bf16.msra.mxu1 %v9340_v36  ;;  %v9355_v41 = vcombine.high %v4504_v29, %v4506_v24  ;;  %v4509_v55 = vld [vmem:[#allocation2 + $0x1548] sm:$0xff] }
 0x31a   :  { %v3195_v1 = vpop.f32.mrb[31].mxu0  ;;  %5241 = vmatprep.subr.bf16.mxu0 %v9343_v37  ;;  %v3317_v5 = vpop.f32.mrb[31].mxu1  ;;  %5363 = vmatprep.subr.bf16.mxu1 %v9345_v25 }
 0x31b   :  { %v3331_v3 = vmax.f32 %v3193_v61, %v3195_v1  ;;  %v11160_v10 = vpack.c.bf16 %v3349_v62, %v3348_v58  ;;  %v3340_v11 = vmax.f32 %v3330_v19, %v3335_v4  ;;  %v3336_v12 = vmax.f32 %v3315_v0, %v3317_v5  ;;  %v4511_v61 = vld [vmem:[#allocation2 + $0x15a8] sm:$0xff]  ;;  %v4512_v0 = vld [vmem:[#allocation2 + $0x1600] sm:$0xff] }
 0x31c   :  { %v9356_v58 = vcombine.low %v4505_v32, %v4507_v34  ;;  %v9359_v62 = vcombine.high %v4508_v51, %v4510_v52  ;;  %v9361_v4 = vcombine.high %v4509_v55, %v4511_v61  ;;  %v4514_v1 = vld [vmem:[#allocation2 + $0x1660] sm:$0xff]  ;;  %v9358_v5 = vcombine.low %v4508_v51, %v4510_v52  ;;  %v5444_v52 = vld [vmem:[#allocation2 + $0x1d0] sm:$0xff] }
 0x31d   :  { %5242 = vmatpush1.bf16.msra.mxu0 %v9342_v56  ;;  %v3341_v18 = vmax.f32 %v3331_v3, %v3336_v12  ;;  %5364 = vmatpush1.bf16.msra.mxu1 %v9344_v63  ;;  %v3345_v22 = vadd.f32 %v11106_v57, %v3340_v11  ;;  %v9354_v56 = vcombine.low %v4504_v29, %v4506_v24  ;;  %v4515_v3 = vld [vmem:[#allocation2 + $0x1668] sm:$0xff]  ;;  %v4516_v11 = vld [vmem:[#allocation2 + $0x16c0] sm:$0xff] }
 0x31e   :  { %5243 = vmatprep.subr.bf16.mxu0 %v9347_v2  ;;  %5365 = vmatprep.subr.bf16.mxu1 %v9349_v6  ;;  %v4513_v2 = vld [vmem:[#allocation2 + $0x1608] sm:$0xff]  ;;  %v9360_v6 = vcombine.low %v4509_v55, %v4511_v61  ;;  %v9363_v9 = vcombine.high %v4512_v0, %v4514_v1  ;;  %v4518_v12 = vld [vmem:[#allocation2 + $0x1720] sm:$0xff]  ;;  %v5446_v55 = vld [vmem:[#allocation2 + $0x230] sm:$0xff] }
 0x31f   :  { %v3199_v23 = vpop.f32.mrb[32].mxu0  ;;  %v3346_v31 = vadd.f32 %v11106_v57, %v3341_v18  ;;  %v3321_v60 = vpop.f32.mrb[32].mxu1  ;;  %v3350_v43 = vmax.f32 %v3345_v22, 0.0  ;;  %v9357_v57 = vcombine.high %v4505_v32, %v4507_v34  ;;  %v9365_v16 = vcombine.high %v4513_v2, %v4515_v3  ;;  %v4520_v22 = vld [vmem:[#allocation2 + $0x1780] sm:$0xff]  ;;  %v4523_v29 = vld [vmem:[#allocation2 + $0x17e8] sm:$0xff]  ;;  %v5436_v32 = vld [vmem:[#allocation2 + $0x50] sm:$0xff] }
 0x320   :  { %v3201_v46 = vpop.f32.mrb[33].mxu0  ;;  %v3323_v36 = vpop.f32.mrb[33].mxu1  ;;  %v9364_v18 = vcombine.low %v4513_v2, %v4515_v3  ;;  %v9366_v24 = vcombine.low %v4516_v11, %v4518_v12  ;;  %v5438_v34 = vld [vmem:[#allocation2 + $0xb0] sm:$0xff]  ;;  %v5445_v61 = vld [vmem:[#allocation2 + $0x1d8] sm:$0xff] }
 0x321   :  { %v3332_v35 = vmax.f32 %v3199_v23, %v3201_v46  ;;  %v3203_v44 = vpop.f32.mrb[34].mxu0  ;;  %5244 = vmatpush1.bf16.msra.mxu0 %v9346_v15  ;;  %v3351_v37 = vmax.f32 %v3346_v31, 0.0  ;;  %v3337_v8 = vmax.f32 %v3321_v60, %v3323_v36  ;;  %v3325_v25 = vpop.f32.mrb[34].mxu1  ;;  %5366 = vmatpush1.bf16.msra.mxu1 %v9348_v20  ;;  %v9362_v15 = vcombine.low %v4512_v0, %v4514_v1  ;;  %v4522_v23 = vld [vmem:[#allocation2 + $0x17e0] sm:$0xff]  ;;  %v5439_v36 = vld [vmem:[#allocation2 + $0xb8] sm:$0xff]  ;;  %v5448_v1 = vld [vmem:[#allocation2 + $0x290] sm:$0xff] }
 0x322   :  { %v3204_v38 = vpop.f32.mrb[35].mxu0  ;;  %5245 = vmatprep.subr.bf16.mxu0 %v9351_v21  ;;  %v3326_v47 = vpop.f32.mrb[35].mxu1  ;;  %5367 = vmatprep.subr.bf16.mxu1 %v9353_v28  ;;  %v9367_v20 = vcombine.high %v4516_v11, %v4518_v12  ;;  %v9369_v21 = vcombine.high %v4517_v13, %v4519_v14  ;;  %v4521_v28 = vld [vmem:[#allocation2 + $0x1788] sm:$0xff]  ;;  %v9368_v31 = vcombine.low %v4517_v13, %v4519_v14  ;;  %v5440_v25 = vld [vmem:[#allocation2 + $0x110] sm:$0xff]  ;;  %v5449_v3 = vld [vmem:[#allocation2 + $0x298] sm:$0xff] }
 0x323   :  { %v11164_v19 = vmax.f32 %v3332_v35, %v3337_v8  ;;  %v11166_v63 = vpack.c.bf16 %v3351_v37, %v3350_v43  ;;  %v9371_v60 = vcombine.high %v4520_v22, %v4522_v23  ;;  %v9373_v46 = vcombine.high %v4521_v28, %v4523_v29  ;;  %v5437_v35 = vld [vmem:[#allocation2 + $0x58] sm:$0xff]  ;;  %v5442_v38 = vld [vmem:[#allocation2 + $0x170] sm:$0xff] }
 0x324   :  { %v9370_v44 = vcombine.low %v4520_v22, %v4522_v23  ;;  %v9375_v37 = vcombine.high %v5436_v32, %v5438_v34  ;;  %v9377_v8 = vcombine.high %v5437_v35, %v5439_v36  ;;  %v9374_v43 = vcombine.low %v5436_v32, %v5438_v34  ;;  %v5450_v2 = vld [vmem:[#allocation2 + $0x2f0] sm:$0xff]  ;;  %v5453_v13 = vld [vmem:[#allocation2 + $0x358] sm:$0xff] }
 0x325   :  { %5246 = vmatpush1.bf16.msra.mxu0 %v9350_v42  ;;  %5368 = vmatpush1.bf16.msra.mxu1 %v9352_v40  ;;  %v9372_v42 = vcombine.low %v4521_v28, %v4523_v29  ;;  %v5441_v40 = vld [vmem:[#allocation2 + $0x118] sm:$0xff]  ;;  %v9376_v47 = vcombine.low %v5437_v35, %v5439_v36  ;;  %v5452_v11 = vld [vmem:[#allocation2 + $0x350] sm:$0xff] }
 0x326   :  { %5247 = vmatprep.subr.bf16.mxu0 %v9355_v41  ;;  %5369 = vmatprep.subr.bf16.mxu1 %v9357_v57  ;;  %v5443_v41 = vld [vmem:[#allocation2 + $0x178] sm:$0xff]  ;;  %v9379_v57 = vcombine.high %v5440_v25, %v5442_v38  ;;  %v5454_v12 = vld [vmem:[#allocation2 + $0x3b0] sm:$0xff] }
 0x327   :  { %v9381_v51 = vcombine.high %v5441_v40, %v5443_v41  ;;  %v5455_v14 = vld [vmem:[#allocation2 + $0x3b8] sm:$0xff]  ;;  %v5458_v22 = vld [vmem:[#allocation2 + $0x470] sm:$0xff]  ;;  %v9390_v29 = vcombine.low %v5452_v11, %v5454_v12 }
 0x328   :  { %v5457_v23 = vld [vmem:[#allocation2 + $0x418] sm:$0xff] }
 0x329   :  { %5248 = vmatpush1.bf16.msra.mxu0 %v9354_v56  ;;  %5370 = vmatpush1.bf16.msra.mxu1 %v9356_v58  ;;  %v5447_v56 = vld [vmem:[#allocation2 + $0x238] sm:$0xff]  ;;  %v9378_v58 = vcombine.low %v5440_v25, %v5442_v38 }
 0x32a   :  { %5249 = vmatprep.subr.bf16.mxu0 %v9359_v62  ;;  %5371 = vmatprep.subr.bf16.mxu1 %v9361_v4  ;;  %v9380_v62 = vcombine.low %v5441_v40, %v5443_v41  ;;  %v9383_v4 = vcombine.high %v5444_v52, %v5446_v55  ;;  %v9385_v0 = vcombine.high %v5445_v61, %v5447_v56  ;;  %v5459_v28 = vld [vmem:[#allocation2 + $0x478] sm:$0xff] }
 0x32b   :  { %v5461_v32 = vld [vmem:[#allocation2 + $0x4d8] sm:$0xff]  ;;  %v9396_v36 = vcombine.low %v5457_v23, %v5459_v28 }
 0x32c   :  { %v5463_v34 = vld [vmem:[#allocation2 + $0x538] sm:$0xff] }
 0x32d   :  { %5250 = vmatpush1.bf16.msra.mxu0 %v9358_v5  ;;  %5372 = vmatpush1.bf16.msra.mxu1 %v9360_v6  ;;  %v5451_v5 = vld [vmem:[#allocation2 + $0x2f8] sm:$0xff]  ;;  %v9382_v6 = vcombine.low %v5444_v52, %v5446_v55  ;;  %v9400_v41 = vcombine.low %v5461_v32, %v5463_v34 }
 0x32e   :  { %5251 = vmatprep.subr.bf16.mxu0 %v9363_v9  ;;  %5373 = vmatprep.subr.bf16.mxu1 %v9365_v16  ;;  %v9387_v9 = vcombine.high %v5448_v1, %v5450_v2  ;;  %v9389_v16 = vcombine.high %v5449_v3, %v5451_v5  ;;  %v5465_v25 = vld [vmem:[#allocation2 + $0x598] sm:$0xff] }
 0x32f   :  { %v5467_v38 = vld [vmem:[#allocation2 + $0x5f8] sm:$0xff] }
 0x330   :  { %v5469_v52 = vld [vmem:[#allocation2 + $0x658] sm:$0xff] }
 0x331   :  { %5252 = vmatpush1.bf16.msra.mxu0 %v9362_v15  ;;  %5374 = vmatpush1.bf16.msra.mxu1 %v9364_v18  ;;  %v9388_v15 = vcombine.low %v5449_v3, %v5451_v5  ;;  %v9391_v18 = vcombine.high %v5452_v11, %v5454_v12  ;;  %v5471_v55 = vld [vmem:[#allocation2 + $0x6b8] sm:$0xff] }
 0x332   :  { %5253 = vmatprep.subr.bf16.mxu0 %v9367_v20  ;;  %5375 = vmatprep.subr.bf16.mxu1 %v9369_v21  ;;  %v9393_v20 = vcombine.high %v5453_v13, %v5455_v14  ;;  %v5456_v21 = vld [vmem:[#allocation2 + $0x410] sm:$0xff]  ;;  %v9408_v3 = vcombine.low %v5469_v52, %v5471_v55  ;;  %v5479_v11 = vld [vmem:[#allocation2 + $0x838] sm:$0xff] }
 0x333   :  { %v9394_v35 = vcombine.low %v5456_v21, %v5458_v22 }
 0x335   :  { %5254 = vmatpush1.bf16.msra.mxu0 %v9366_v24  ;;  %5376 = vmatpush1.bf16.msra.mxu1 %v9368_v31  ;;  %v9395_v24 = vcombine.high %v5456_v21, %v5458_v22  ;;  %v9397_v31 = vcombine.high %v5457_v23, %v5459_v28  ;;  %v5483_v21 = vld [vmem:[#allocation2 + $0x8f8] sm:$0xff] }
 0x336   :  { %5255 = vmatprep.subr.bf16.mxu0 %v9371_v60  ;;  %5377 = vmatprep.subr.bf16.mxu1 %v9373_v46  ;;  %v5460_v60 = vld [vmem:[#allocation2 + $0x4d0] sm:$0xff] }
 0x337   :  { %v5462_v46 = vld [vmem:[#allocation2 + $0x530] sm:$0xff] }
 0x338   :  { %v9398_v40 = vcombine.low %v5460_v60, %v5462_v46 }
 0x339   :  { %5256 = vmatpush1.bf16.msra.mxu0 %v9370_v44  ;;  %5378 = vmatpush1.bf16.msra.mxu1 %v9372_v42  ;;  %v9399_v44 = vcombine.high %v5460_v60, %v5462_v46  ;;  %v9401_v42 = vcombine.high %v5461_v32, %v5463_v34  ;;  %v5487_v60 = vld [vmem:[#allocation2 + $0x9b8] sm:$0xff] }
 0x33a   :  { %6204 = vmatprep.subr.bf16.mxu0 %v9375_v37  ;;  %6326 = vmatprep.subr.bf16.mxu1 %v9377_v8  ;;  %v5464_v37 = vld [vmem:[#allocation2 + $0x590] sm:$0xff] }
 0x33b   :  { %v5466_v8 = vld [vmem:[#allocation2 + $0x5f0] sm:$0xff] }
 0x33c   :  { %5258 = vmatmul.mubr.bf16.vlgmr.msra.gmra.mrb[48].mxu0 %v11117_v26  ;;  %5380 = vmatmul.mubr.bf16.vlgmr.msra.gmra.mrb[48].mxu1 %v11117_v26  ;;  %v9384_v26 = vcombine.low %v5445_v61, %v5447_v56  ;;  %v9402_v61 = vcombine.low %v5464_v37, %v5466_v8  ;;  %v9404_v56 = vcombine.low %v5465_v25, %v5467_v38 }
 0x33d   :  { %6205 = vmatpush1.bf16.msra.mxu0 %v9374_v43  ;;  %6327 = vmatpush1.bf16.msra.mxu1 %v9376_v47  ;;  %v9403_v43 = vcombine.high %v5464_v37, %v5466_v8  ;;  %v9405_v47 = vcombine.high %v5465_v25, %v5467_v38  ;;  %v5491_v37 = vld [vmem:[#allocation2 + $0xa78] sm:$0xff] }
 0x33e   :  { %6206 = vmatprep.subr.bf16.mxu0 %v9379_v57  ;;  %6328 = vmatprep.subr.bf16.mxu1 %v9381_v51  ;;  %v5468_v57 = vld [vmem:[#allocation2 + $0x650] sm:$0xff] }
 0x33f   :  { %5267 = vmatprep.mubr.bf16.mxu0 %v11124_v33  ;;  %5389 = vmatprep.mubr.bf16.mxu1 %v11124_v33  ;;  %v9386_v33 = vcombine.low %v5448_v1, %v5450_v2  ;;  %v5470_v51 = vld [vmem:[#allocation2 + $0x6b0] sm:$0xff]  ;;  %v5475_v1 = vld [vmem:[#allocation2 + $0x778] sm:$0xff] }
 0x340   :  { %v9406_v2 = vcombine.low %v5468_v57, %v5470_v51 }
 0x341   :  { %6207 = vmatpush1.bf16.msra.mxu0 %v9378_v58  ;;  %6329 = vmatpush1.bf16.msra.mxu1 %v9380_v62  ;;  %v9407_v58 = vcombine.high %v5468_v57, %v5470_v51  ;;  %v5472_v62 = vld [vmem:[#allocation2 + $0x710] sm:$0xff]  ;;  %v5495_v57 = vld [vmem:[#allocation2 + $0xb38] sm:$0xff] }
 0x342   :  { %6208 = vmatprep.subr.bf16.mxu0 %v9383_v4  ;;  %6330 = vmatprep.subr.bf16.mxu1 %v9385_v0  ;;  %v5474_v4 = vld [vmem:[#allocation2 + $0x770] sm:$0xff]  ;;  %v5473_v0 = vld [vmem:[#allocation2 + $0x718] sm:$0xff] }
 0x343   :  { %v9411_v5 = vcombine.high %v5472_v62, %v5474_v4  ;;  %v9410_v12 = vcombine.low %v5472_v62, %v5474_v4  ;;  %v5499_v62 = vld [vmem:[#allocation2 + $0xbf8] sm:$0xff] }
 0x344   :  { %5268 = vmatmul.mubr.bf16.gmra.mrb[52].mxu0 %v11131_v53  ;;  %5390 = vmatmul.mubr.bf16.gmra.mrb[52].mxu1 %v11131_v53  ;;  %v9392_v53 = vcombine.low %v5453_v13, %v5455_v14  ;;  %v9412_v13 = vcombine.low %v5473_v0, %v5475_v1 }
 0x345   :  { %6209 = vmatpush1.bf16.msra.mxu0 %v9382_v6  ;;  %6331 = vmatpush1.bf16.msra.mxu1 %v9384_v26  ;;  %v9413_v6 = vcombine.high %v5473_v0, %v5475_v1  ;;  %v5476_v26 = vld [vmem:[#allocation2 + $0x7d0] sm:$0xff] }
 0x346   :  { %6210 = vmatprep.subr.bf16.mxu0 %v9387_v9  ;;  %6332 = vmatprep.subr.bf16.mxu1 %v9389_v16  ;;  %v5478_v9 = vld [vmem:[#allocation2 + $0x830] sm:$0xff]  ;;  %v5477_v16 = vld [vmem:[#allocation2 + $0x7d8] sm:$0xff] }
 0x347   :  { %5277 = vmatprep.mubr.bf16.mxu0 %v10959_v49  ;;  %5399 = vmatprep.mubr.bf16.mxu1 %v10959_v49  ;;  %v9415_v14 = vcombine.high %v5476_v26, %v5478_v9  ;;  %v9414_v22 = vcombine.low %v5476_v26, %v5478_v9  ;;  %v9416_v23 = vcombine.low %v5477_v16, %v5479_v11  ;;  %v5503_v26 = vld [vmem:[#allocation2 + $0xcb8] sm:$0xff] }
 0x349   :  { %6211 = vmatpush1.bf16.msra.mxu0 %v9386_v33  ;;  %6333 = vmatpush1.bf16.msra.mxu1 %v9388_v15  ;;  %v9417_v33 = vcombine.high %v5477_v16, %v5479_v11  ;;  %v5480_v15 = vld [vmem:[#allocation2 + $0x890] sm:$0xff] }
 0x34a   :  { %6212 = vmatprep.subr.bf16.mxu0 %v9391_v18  ;;  %6334 = vmatprep.subr.bf16.mxu1 %v9393_v20  ;;  %v5482_v18 = vld [vmem:[#allocation2 + $0x8f0] sm:$0xff]  ;;  %v5481_v20 = vld [vmem:[#allocation2 + $0x898] sm:$0xff] }
 0x34b   :  { %v9419_v28 = vcombine.high %v5480_v15, %v5482_v18  ;;  %v9418_v46 = vcombine.low %v5480_v15, %v5482_v18  ;;  %v9420_v32 = vcombine.low %v5481_v20, %v5483_v21  ;;  %v5507_v15 = vld [vmem:[#allocation2 + $0xd78] sm:$0xff] }
 0x34c   :  { %5278 = vmatmul.mubr.bf16.gmra.mrb[56].mxu0 %v10963_v59  ;;  %5400 = vmatmul.mubr.bf16.gmra.mrb[56].mxu1 %v10963_v59 }
 0x34d   :  { %6213 = vmatpush1.bf16.msra.mxu0 %v9390_v29  ;;  %6335 = vmatpush1.bf16.msra.mxu1 %v9392_v53  ;;  %v9421_v29 = vcombine.high %v5481_v20, %v5483_v21  ;;  %v5484_v53 = vld [vmem:[#allocation2 + $0x950] sm:$0xff] }
 0x34e   :  { %6214 = vmatprep.subr.bf16.mxu0 %v9395_v24  ;;  %6336 = vmatprep.subr.bf16.mxu1 %v9397_v31  ;;  %v5486_v24 = vld [vmem:[#allocation2 + $0x9b0] sm:$0xff]  ;;  %v5485_v31 = vld [vmem:[#allocation2 + $0x958] sm:$0xff] }
 0x34f   :  { %6236 = vmatprep.mubr.bf16.mxu0 %v11142_v17  ;;  %6358 = vmatprep.mubr.bf16.mxu1 %v11142_v17  ;;  %v9409_v17 = vcombine.high %v5469_v52, %v5471_v55  ;;  %v9423_v34 = vcombine.high %v5484_v53, %v5486_v24  ;;  %v9422_v8 = vcombine.low %v5484_v53, %v5486_v24  ;;  %v5509_v53 = vld [vmem:[#allocation2 + $0xdd8] sm:$0xff] }
 0x350   :  { %v9424_v25 = vcombine.low %v5485_v31, %v5487_v60  ;;  %v5511_v24 = vld [vmem:[#allocation2 + $0xe38] sm:$0xff] }
 0x351   :  { %6215 = vmatpush1.bf16.msra.mxu0 %v9394_v35  ;;  %6337 = vmatpush1.bf16.msra.mxu1 %v9396_v36  ;;  %v9425_v35 = vcombine.high %v5485_v31, %v5487_v60  ;;  %v5488_v36 = vld [vmem:[#allocation2 + $0xa10] sm:$0xff] }
 0x352   :  { %6216 = vmatprep.subr.bf16.mxu0 %v9399_v44  ;;  %6338 = vmatprep.subr.bf16.mxu1 %v9401_v42  ;;  %v5490_v44 = vld [vmem:[#allocation2 + $0xa70] sm:$0xff]  ;;  %v5489_v42 = vld [vmem:[#allocation2 + $0xa18] sm:$0xff] }
 0x353   :  { %v9427_v38 = vcombine.high %v5488_v36, %v5490_v44  ;;  %v9426_v51 = vcombine.low %v5488_v36, %v5490_v44  ;;  %v9428_v52 = vcombine.low %v5489_v42, %v5491_v37  ;;  %v10474_v36 = vld [vmem:[%s11300_s0 + $0x24] ss:$16 sps:$4 sm:$0xff]   ;;  %v5513_v44 = vld [vmem:[#allocation2 + $0xe98] sm:$0xff] }
 0x355   :  { %6217 = vmatpush1.bf16.msra.mxu0 %v9398_v40  ;;  %6339 = vmatpush1.bf16.msra.mxu1 %v9400_v41  ;;  %v9429_v40 = vcombine.high %v5489_v42, %v5491_v37  ;;  %v5492_v41 = vld [vmem:[#allocation2 + $0xad0] sm:$0xff]  ;;  %v5515_v42 = vld [vmem:[#allocation2 + $0xef8] sm:$0xff] }
 0x356   :  { %6218 = vmatprep.subr.bf16.mxu0 %v9403_v43  ;;  %6340 = vmatprep.subr.bf16.mxu1 %v9405_v47  ;;  %v5494_v43 = vld [vmem:[#allocation2 + $0xb30] sm:$0xff]  ;;  %v5493_v47 = vld [vmem:[#allocation2 + $0xad8] sm:$0xff] }
 0x357   :  { %v9431_v55 = vcombine.high %v5492_v41, %v5494_v43  ;;  %v9430_v4 = vcombine.low %v5492_v41, %v5494_v43  ;;  %v9432_v0 = vcombine.low %v5493_v47, %v5495_v57  ;;  %v5518_v41 = vld [vmem:[#allocation2 + $0xfb0] sm:$0xff]  ;;  %v5517_v43 = vld [vmem:[#allocation2 + $0xf58] sm:$0xff] }
 0x359   :  { %6219 = vmatpush1.bf16.msra.mxu0 %v9402_v61  ;;  %6341 = vmatpush1.bf16.msra.mxu1 %v9404_v56  ;;  %v9433_v61 = vcombine.high %v5493_v47, %v5495_v57  ;;  %v5496_v56 = vld [vmem:[#allocation2 + $0xb90] sm:$0xff]  ;;  %v5519_v47 = vld [vmem:[#allocation2 + $0xfb8] sm:$0xff] }
 0x35a   :  { %6220 = vmatprep.subr.bf16.mxu0 %v9407_v58  ;;  %6342 = vmatprep.subr.bf16.mxu1 %v9409_v17  ;;  %v5498_v58 = vld [vmem:[#allocation2 + $0xbf0] sm:$0xff]  ;;  %v5497_v17 = vld [vmem:[#allocation2 + $0xb98] sm:$0xff] }
 0x35b   :  { %v9435_v1 = vcombine.high %v5496_v56, %v5498_v58  ;;  %v9434_v9 = vcombine.low %v5496_v56, %v5498_v58  ;;  %v9436_v16 = vcombine.low %v5497_v17, %v5499_v62  ;;  %v10475_v57 = vld [vmem:[%s11300_s0 + $0x20] ss:$16 sps:$4 sm:$0xff]  }
 0x35c   :  { %v5520_v56 = vld [vmem:[#allocation2 + $0x1010] sm:$0xff] }
 0x35d   :  { %6221 = vmatpush1.bf16.msra.mxu0 %v9406_v2  ;;  %6343 = vmatpush1.bf16.msra.mxu1 %v9408_v3  ;;  %v9437_v2 = vcombine.high %v5497_v17, %v5499_v62  ;;  %v5500_v3 = vld [vmem:[#allocation2 + $0xc50] sm:$0xff]  ;;  %v5521_v17 = vld [vmem:[#allocation2 + $0x1018] sm:$0xff] }
 0x35e   :  { %6222 = vmatprep.subr.bf16.mxu0 %v9411_v5  ;;  %6344 = vmatprep.subr.bf16.mxu1 %v9413_v6  ;;  %v5502_v5 = vld [vmem:[#allocation2 + $0xcb0] sm:$0xff]  ;;  %v5501_v6 = vld [vmem:[#allocation2 + $0xc58] sm:$0xff] }
 0x35f   :  { %v9439_v11 = vcombine.high %v5500_v3, %v5502_v5  ;;  %v9438_v18 = vcombine.low %v5500_v3, %v5502_v5  ;;  %v9440_v20 = vcombine.low %v5501_v6, %v5503_v26  ;;  %v5522_v58 = vld [vmem:[#allocation2 + $0x1070] sm:$0xff]  ;;  %v5523_v62 = vld [vmem:[#allocation2 + $0x1078] sm:$0xff] }
 0x360   :  { %v5524_v3 = vld [vmem:[#allocation2 + $0x10d0] sm:$0xff] }
 0x361   :  { %6223 = vmatpush1.bf16.msra.mxu0 %v9410_v12  ;;  %6345 = vmatpush1.bf16.msra.mxu1 %v9412_v13  ;;  %v9441_v12 = vcombine.high %v5501_v6, %v5503_v26  ;;  %v5504_v13 = vld [vmem:[#allocation2 + $0xd10] sm:$0xff]  ;;  %v5525_v6 = vld [vmem:[#allocation2 + $0x10d8] sm:$0xff] }
 0x362   :  { %6224 = vmatprep.subr.bf16.mxu0 %v9415_v14  ;;  %6346 = vmatprep.subr.bf16.mxu1 %v9417_v33  ;;  %v5506_v14 = vld [vmem:[#allocation2 + $0xd70] sm:$0xff]  ;;  %v5505_v33 = vld [vmem:[#allocation2 + $0xd18] sm:$0xff] }
 0x363   :  { %v9443_v21 = vcombine.high %v5504_v13, %v5506_v14  ;;  %v9442_v31 = vcombine.low %v5504_v13, %v5506_v14  ;;  %v9444_v60 = vcombine.low %v5505_v33, %v5507_v15  ;;  %v5526_v5 = vld [vmem:[#allocation2 + $0x1130] sm:$0xff]  ;;  %v5527_v26 = vld [vmem:[#allocation2 + $0x1138] sm:$0xff] }
 0x364   :  { %v5528_v13 = vld [vmem:[#allocation2 + $0x1190] sm:$0xff] }
 0x365   :  { %6225 = vmatpush1.bf16.msra.mxu0 %v9414_v22  ;;  %6347 = vmatpush1.bf16.msra.mxu1 %v9416_v23  ;;  %v9445_v22 = vcombine.high %v5505_v33, %v5507_v15  ;;  %v5508_v23 = vld [vmem:[#allocation2 + $0xdd0] sm:$0xff]  ;;  %v10476_v33 = vld [vmem:[%s11300_s0 + $0xc] ss:$16 sps:$4 sm:$0xff]  }
 0x366   :  { %6226 = vmatprep.subr.bf16.mxu0 %v9419_v28  ;;  %6348 = vmatprep.subr.bf16.mxu1 %v9421_v29  ;;  %v5510_v28 = vld [vmem:[#allocation2 + $0xe30] sm:$0xff] }
 0x367   :  { %v10473_v29 = vld [vmem:[%s11300_s0] ss:$16 sps:$4 sm:$0xff]   ;;  %v9446_v37 = vcombine.low %v5508_v23, %v5510_v28 }
 0x368   :  { %v5530_v14 = vld [vmem:[#allocation2 + $0x11f0] sm:$0xff] }
 0x369   :  { %6227 = vmatpush1.bf16.msra.mxu0 %v9418_v46  ;;  %6349 = vmatpush1.bf16.msra.mxu1 %v9420_v32  ;;  %v9447_v46 = vcombine.high %v5508_v23, %v5510_v28  ;;  %v9449_v32 = vcombine.high %v5509_v53, %v5511_v24  ;;  %v9462_v28 = vcombine.low %v5524_v3, %v5526_v5 }
 0x36a   :  { %6228 = vmatprep.subr.bf16.mxu0 %v9423_v34  ;;  %6350 = vmatprep.subr.bf16.mxu1 %v9425_v35  ;;  %v5512_v34 = vld [vmem:[#allocation2 + $0xe90] sm:$0xff] }
 0x36b   :  { %v5514_v35 = vld [vmem:[#allocation2 + $0xef0] sm:$0xff] }
 0x36d   :  { %6229 = vmatpush1.bf16.msra.mxu0 %v9422_v8  ;;  %6351 = vmatpush1.bf16.msra.mxu1 %v9424_v25  ;;  %v9448_v8 = vcombine.low %v5509_v53, %v5511_v24  ;;  %v9451_v25 = vcombine.high %v5512_v34, %v5514_v35 }
 0x36e   :  { %6230 = vmatprep.subr.bf16.mxu0 %v9427_v38  ;;  %6352 = vmatprep.subr.bf16.mxu1 %v9429_v40  ;;  %v9453_v38 = vcombine.high %v5513_v44, %v5515_v42  ;;  %v5516_v40 = vld [vmem:[#allocation2 + $0xf50] sm:$0xff] }
 0x371   :  { %6231 = vmatpush1.bf16.msra.mxu0 %v9426_v51  ;;  %6353 = vmatpush1.bf16.msra.mxu1 %v9428_v52  ;;  %v9450_v51 = vcombine.low %v5512_v34, %v5514_v35  ;;  %v9452_v52 = vcombine.low %v5513_v44, %v5515_v42  ;;  %v5532_v35 = vld [vmem:[#allocation2 + $0x1250] sm:$0xff] }
 0x372   :  { %6232 = vmatprep.subr.bf16.mxu0 %v9431_v55  ;;  %6354 = vmatprep.subr.bf16.mxu1 %v9433_v61  ;;  %v9455_v55 = vcombine.high %v5516_v40, %v5518_v41  ;;  %v9457_v61 = vcombine.high %v5517_v43, %v5519_v47 }
 0x375   :  { %6233 = vmatpush1.bf16.msra.mxu0 %v9430_v4  ;;  %6355 = vmatpush1.bf16.msra.mxu1 %v9432_v0  ;;  %v9454_v4 = vcombine.low %v5516_v40, %v5518_v41  ;;  %v9456_v0 = vcombine.low %v5517_v43, %v5519_v47  ;;  %v11196_v40 = vld [vmem:[#allocation4] ss:$0 sm:$0xff] }
 0x376   :  { %6234 = vmatprep.subr.bf16.mxu0 %v9435_v1  ;;  %6356 = vmatprep.subr.bf16.mxu1 %v9437_v2  ;;  %v9459_v1 = vcombine.high %v5520_v56, %v5522_v58  ;;  %v9461_v2 = vcombine.high %v5521_v17, %v5523_v62 }
 0x379   :  { %6235 = vmatpush1.bf16.msra.mxu0 %v9434_v9  ;;  %6357 = vmatpush1.bf16.msra.mxu1 %v9436_v16  ;;  %v9458_v9 = vcombine.low %v5520_v56, %v5522_v58  ;;  %v9463_v16 = vcombine.high %v5524_v3, %v5526_v5 }
 0x37a   :  { %6265 = vmatprep.subr.bf16.mxu0 %v9439_v11  ;;  %6387 = vmatprep.subr.bf16.mxu1 %v9441_v12  ;;  %v9465_v12 = vcombine.high %v5525_v6, %v5527_v26 }
 0x37c   :  { %6237 = vmatmul.mubr.bf16.vlgmr.msra.gmra.mrb[60].mxu0 %v10473_v29  ;;  %6359 = vmatmul.mubr.bf16.vlgmr.msra.gmra.mrb[60].mxu1 %v10473_v29 }
 0x37d   :  { %6266 = vmatpush1.bf16.msra.mxu0 %v9438_v18  ;;  %6388 = vmatpush1.bf16.msra.mxu1 %v9440_v20  ;;  %v5529_v20 = vld [vmem:[#allocation2 + $0x1198] sm:$0xff] }
 0x37e   :  { %6267 = vmatprep.subr.bf16.mxu0 %v9443_v21  ;;  %6389 = vmatprep.subr.bf16.mxu1 %v9445_v22  ;;  %v5531_v21 = vld [vmem:[#allocation2 + $0x11f8] sm:$0xff] }
 0x37f   :  { %6246 = vmatprep.mubr.bf16.mxu0 %v10474_v36  ;;  %6368 = vmatprep.mubr.bf16.mxu1 %v10474_v36  ;;  %v9469_v34 = vcombine.high %v5529_v20, %v5531_v21  ;;  %v5534_v36 = vld [vmem:[#allocation2 + $0x12b0] sm:$0xff] }
 0x380   :  { %v9471_v47 = vcombine.high %v5532_v35, %v5534_v36 }
 0x381   :  { %6268 = vmatpush1.bf16.msra.mxu0 %v9442_v31  ;;  %6390 = vmatpush1.bf16.msra.mxu1 %v9444_v60  ;;  %v9464_v31 = vcombine.low %v5525_v6, %v5527_v26  ;;  %v9467_v60 = vcombine.high %v5528_v13, %v5530_v14 }
 0x382   :  { %6269 = vmatprep.subr.bf16.mxu0 %v9447_v46  ;;  %6391 = vmatprep.subr.bf16.mxu1 %v9449_v32 }
 0x384   :  { %6247 = vmatmul.mubr.bf16.gmra.mrb[64].mxu0 %v10475_v57  ;;  %6369 = vmatmul.mubr.bf16.gmra.mrb[64].mxu1 %v10475_v57 }
 0x385   :  { %6270 = vmatpush1.bf16.msra.mxu0 %v9446_v37  ;;  %6392 = vmatpush1.bf16.msra.mxu1 %v9448_v8  ;;  %v5533_v37 = vld [vmem:[#allocation2 + $0x1258] sm:$0xff] }
 0x386   :  { %6271 = vmatprep.subr.bf16.mxu0 %v9451_v25  ;;  %6393 = vmatprep.subr.bf16.mxu1 %v9453_v38  ;;  %v5535_v8 = vld [vmem:[#allocation2 + $0x12b8] sm:$0xff]  ;;  %v9466_v25 = vcombine.low %v5528_v13, %v5530_v14  ;;  %v9468_v38 = vcombine.low %v5529_v20, %v5531_v21  ;;  %v5540_v14 = vld [vmem:[#allocation2 + $0x13d0] sm:$0xff] }
 0x387   :  { %6256 = vmatprep.mubr.bf16.mxu0 %v10936_v39  ;;  %6378 = vmatprep.mubr.bf16.mxu1 %v10936_v39  ;;  %v9460_v39 = vcombine.low %v5521_v17, %v5523_v62  ;;  %v5537_v17 = vld [vmem:[#allocation2 + $0x1318] sm:$0xff]  ;;  %v9472_v3 = vcombine.low %v5533_v37, %v5535_v8 }
 0x388   :  { %v5539_v62 = vld [vmem:[#allocation2 + $0x1378] sm:$0xff] }
 0x389   :  { %6272 = vmatpush1.bf16.msra.mxu0 %v9450_v51  ;;  %6394 = vmatpush1.bf16.msra.mxu1 %v9452_v52  ;;  %v9473_v51 = vcombine.high %v5533_v37, %v5535_v8  ;;  %v5536_v52 = vld [vmem:[#allocation2 + $0x1310] sm:$0xff]  ;;  %v9477_v13 = vcombine.high %v5537_v17, %v5539_v62  ;;  %v5541_v20 = vld [vmem:[#allocation2 + $0x13d8] sm:$0xff] }
 0x38a   :  { %6273 = vmatprep.subr.bf16.mxu0 %v9455_v55  ;;  %6395 = vmatprep.subr.bf16.mxu1 %v9457_v61  ;;  %v5538_v55 = vld [vmem:[#allocation2 + $0x1370] sm:$0xff]  ;;  %v5543_v21 = vld [vmem:[#allocation2 + $0x1438] sm:$0xff] }
 0x38c   :  { %6257 = vmatmul.mubr.bf16.gmra.mrb[68].mxu0 %v10940_v48  ;;  %6379 = vmatmul.mubr.bf16.gmra.mrb[68].mxu1 %v10940_v48 }
 0x38d   :  { %6274 = vmatpush1.bf16.msra.mxu0 %v9454_v4  ;;  %6396 = vmatpush1.bf16.msra.mxu1 %v9456_v0 }
 0x38e   :  { %6275 = vmatprep.subr.bf16.mxu0 %v9459_v1  ;;  %6397 = vmatprep.subr.bf16.mxu1 %v9461_v2  ;;  %v9470_v2 = vcombine.low %v5532_v35, %v5534_v36  ;;  %v5545_v36 = vld [vmem:[#allocation2 + $0x1498] sm:$0xff] }
 0x38f   :  { %v4219_v11 = vpop.f32.mrb[36].mxu0  ;;  %6297 = vmatprep.mubr.bf16.mxu0 %v10476_v33  ;;  %v4341_v15 = vpop.f32.mrb[36].mxu1  ;;  %6419 = vmatprep.mubr.bf16.mxu1 %v10476_v33  ;;  %v5542_v33 = vld [vmem:[#allocation2 + $0x1430] sm:$0xff] }
 0x390   :  { %v4221_v18 = vpop.f32.mrb[37].mxu0  ;;  %v4343_v22 = vpop.f32.mrb[37].mxu1 }
 0x391   :  { %v4368_v48 = vmax.f32 %v4219_v11, %v4221_v18  ;;  %v4223_v23 = vpop.f32.mrb[38].mxu0  ;;  %6276 = vmatpush1.bf16.msra.mxu0 %v9458_v9  ;;  %v4373_v29 = vmax.f32 %v4341_v15, %v4343_v22  ;;  %v4345_v53 = vpop.f32.mrb[38].mxu1  ;;  %6398 = vmatpush1.bf16.msra.mxu1 %v9460_v39  ;;  %v9474_v22 = vcombine.low %v5536_v52, %v5538_v55 }
 0x392   :  { %v4225_v24 = vpop.f32.mrb[39].mxu0  ;;  %6277 = vmatprep.subr.bf16.mxu0 %v9463_v16  ;;  %v4347_v32 = vpop.f32.mrb[39].mxu1  ;;  %6399 = vmatprep.subr.bf16.mxu1 %v9465_v12  ;;  %v9475_v16 = vcombine.high %v5536_v52, %v5538_v55 }
 0x393   :  { %v4369_v46 = vmax.f32 %v4223_v23, %v4225_v24  ;;  %v4378_v44 = vmax.f32 %v4368_v48, %v4373_v29  ;;  %v4374_v42 = vmax.f32 %v4345_v53, %v4347_v32  ;;  %v9476_v23 = vcombine.low %v5537_v17, %v5539_v62  ;;  %v5549_v62 = vld [vmem:[#allocation2 + $0x1558] sm:$0xff] }
 0x394   :  { %v9479_v53 = vcombine.high %v5540_v14, %v5542_v33 }
 0x395   :  { %6278 = vmatpush1.bf16.msra.mxu0 %v9462_v28  ;;  %v4383_v41 = vadd.f32 %v11196_v40, %v4378_v44  ;;  %v4379_v43 = vmax.f32 %v4369_v46, %v4374_v42  ;;  %6400 = vmatpush1.bf16.msra.mxu1 %v9464_v31  ;;  %v9481_v31 = vcombine.high %v5541_v20, %v5543_v21  ;;  %v5546_v46 = vld [vmem:[#allocation2 + $0x14f0] sm:$0xff]  ;;  %v5547_v44 = vld [vmem:[#allocation2 + $0x14f8] sm:$0xff] }
 0x396   :  { %6279 = vmatprep.subr.bf16.mxu0 %v9467_v60  ;;  %6401 = vmatprep.subr.bf16.mxu1 %v9469_v34  ;;  %v5544_v60 = vld [vmem:[#allocation2 + $0x1490] sm:$0xff] }
 0x397   :  { %v4229_v57 = vpop.f32.mrb[40].mxu0  ;;  %v4384_v61 = vadd.f32 %v11196_v40, %v4379_v43  ;;  %v4351_v56 = vpop.f32.mrb[40].mxu1  ;;  %v4388_v5 = vmax.f32 %v4383_v41, 0.0  ;;  %v9483_v52 = vcombine.high %v5544_v60, %v5546_v46 }
 0x398   :  { %v4231_v58 = vpop.f32.mrb[41].mxu0  ;;  %v4353_v0 = vpop.f32.mrb[41].mxu1 }
 0x399   :  { %v4370_v4 = vmax.f32 %v4229_v57, %v4231_v58  ;;  %v4233_v1 = vpop.f32.mrb[42].mxu0  ;;  %6280 = vmatpush1.bf16.msra.mxu0 %v9466_v25  ;;  %v4389_v6 = vmax.f32 %v4384_v61, 0.0  ;;  %v4375_v26 = vmax.f32 %v4351_v56, %v4353_v0  ;;  %v4355_v9 = vpop.f32.mrb[42].mxu1  ;;  %6402 = vmatpush1.bf16.msra.mxu1 %v9468_v38  ;;  %v9478_v25 = vcombine.low %v5540_v14, %v5542_v33  ;;  %v5548_v56 = vld [vmem:[#allocation2 + $0x1550] sm:$0xff] }
 0x39a   :  { %v4235_v39 = vpop.f32.mrb[43].mxu0  ;;  %6281 = vmatprep.subr.bf16.mxu0 %v9471_v47  ;;  %v4357_v12 = vpop.f32.mrb[43].mxu1  ;;  %6403 = vmatprep.subr.bf16.mxu1 %v9473_v51  ;;  %v9480_v38 = vcombine.low %v5541_v20, %v5543_v21  ;;  %v9485_v61 = vcombine.high %v5545_v36, %v5547_v44  ;;  %v5550_v58 = vld [vmem:[#allocation2 + $0x15b0] sm:$0xff] }
 0x39b   :  { %v4371_v11 = vmax.f32 %v4233_v1, %v4235_v39  ;;  %v4380_v15 = vmax.f32 %v4370_v4, %v4375_v26  ;;  %v4376_v18 = vmax.f32 %v4355_v9, %v4357_v12  ;;  %v11200_v48 = vpack.c.bf16 %v4389_v6, %v4388_v5  ;;  %v5551_v4 = vld [vmem:[#allocation2 + $0x15b8] sm:$0xff]  ;;  %v5552_v6 = vld [vmem:[#allocation2 + $0x1610] sm:$0xff] }
 0x39c   :  { %v9482_v1 = vcombine.low %v5544_v60, %v5546_v46  ;;  %v9489_v5 = vcombine.high %v5549_v62, %v5551_v4  ;;  %v5554_v26 = vld [vmem:[#allocation2 + $0x1670] sm:$0xff]  ;;  %v5553_v9 = vld [vmem:[#allocation2 + $0x1618] sm:$0xff] }
 0x39d   :  { %6282 = vmatpush1.bf16.msra.mxu0 %v9470_v2  ;;  %v4385_v28 = vadd.f32 %v11196_v40, %v4380_v15  ;;  %v4381_v29 = vmax.f32 %v4371_v11, %v4376_v18  ;;  %6404 = vmatpush1.bf16.msra.mxu1 %v9472_v3  ;;  %v9484_v2 = vcombine.low %v5545_v36, %v5547_v44  ;;  %v5555_v39 = vld [vmem:[#allocation2 + $0x1678] sm:$0xff]  ;;  %v5556_v14 = vld [vmem:[#allocation2 + $0x16d0] sm:$0xff] }
 0x39e   :  { %6283 = vmatprep.subr.bf16.mxu0 %v9475_v16  ;;  %6405 = vmatprep.subr.bf16.mxu1 %v9477_v13  ;;  %v9487_v3 = vcombine.high %v5548_v56, %v5550_v58  ;;  %v9486_v16 = vcombine.low %v5548_v56, %v5550_v58  ;;  %v9488_v11 = vcombine.low %v5549_v62, %v5551_v4  ;;  %v5558_v33 = vld [vmem:[#allocation2 + $0x1730] sm:$0xff]  ;;  %v5557_v15 = vld [vmem:[#allocation2 + $0x16d8] sm:$0xff] }
 0x39f   :  { %v4239_v24 = vpop.f32.mrb[44].mxu0  ;;  %v4386_v32 = vadd.f32 %v11196_v40, %v4381_v29  ;;  %v4361_v34 = vpop.f32.mrb[44].mxu1  ;;  %v4390_v41 = vmax.f32 %v4385_v28, 0.0  ;;  %v9491_v12 = vcombine.high %v5552_v6, %v5554_v26  ;;  %v9493_v13 = vcombine.high %v5553_v9, %v5555_v39  ;;  %v5559_v18 = vld [vmem:[#allocation2 + $0x1738] sm:$0xff]  ;;  %v5560_v28 = vld [vmem:[#allocation2 + $0x1790] sm:$0xff] }
 0x3a0   :  { %v4241_v35 = vpop.f32.mrb[45].mxu0  ;;  %v4363_v37 = vpop.f32.mrb[45].mxu1  ;;  %v9490_v20 = vcombine.low %v5552_v6, %v5554_v26  ;;  %v9492_v21 = vcombine.low %v5553_v9, %v5555_v39  ;;  %v5562_v29 = vld [vmem:[#allocation2 + $0x17f0] sm:$0xff]  ;;  %v9496_v60 = vcombine.low %v5557_v15, %v5559_v18  ;;  %v10480_v58 = vld [vmem:[%s11300_s0 + $0x28] ss:$16 sps:$4 sm:$0xff]  }
 0x3a1   :  { %v4372_v42 = vmax.f32 %v4239_v24, %v4241_v35  ;;  %v4243_v8 = vpop.f32.mrb[46].mxu0  ;;  %6284 = vmatpush1.bf16.msra.mxu0 %v9474_v22  ;;  %v4391_v43 = vmax.f32 %v4386_v32, 0.0  ;;  %v4377_v47 = vmax.f32 %v4361_v34, %v4363_v37  ;;  %v4365_v57 = vpop.f32.mrb[46].mxu1  ;;  %6406 = vmatpush1.bf16.msra.mxu1 %v9476_v23  ;;  %v9495_v22 = vcombine.high %v5556_v14, %v5558_v33  ;;  %v5563_v24 = vld [vmem:[#allocation2 + $0x17f8] sm:$0xff]  ;;  %v10129_v62 = vld [vmem:[#allocation6 + $0x60] ss:$16 sps:$4 sm:$0xff]  }
 0x3a2   :  { %v4244_v51 = vpop.f32.mrb[47].mxu0  ;;  %6285 = vmatprep.subr.bf16.mxu0 %v9479_v53  ;;  %v4366_v55 = vpop.f32.mrb[47].mxu1  ;;  %6407 = vmatprep.subr.bf16.mxu1 %v9481_v31  ;;  %v9497_v23 = vcombine.high %v5557_v15, %v5559_v18  ;;  %v5561_v53 = vld [vmem:[#allocation2 + $0x1798] sm:$0xff]  ;;  %v9494_v31 = vcombine.low %v5556_v14, %v5558_v33  ;;  %v9499_v46 = vcombine.high %v5560_v28, %v5562_v29  ;;  %v10141_v9 = vld [vmem:[#allocation6 + $0xa0] ss:$16 sps:$4 sm:$0xff]  }
 0x3a3   :  { %v11204_v17 = vmax.f32 %v4372_v42, %v4377_v47  ;;  %v11206_v0 = vpack.c.bf16 %v4391_v43, %v4390_v41  ;;  %v9501_v32 = vcombine.high %v5561_v53, %v5563_v24  ;;  %v9498_v34 = vcombine.low %v5560_v28, %v5562_v29  ;;  %v10113_v36 = vld [vmem:[#allocation6 + $0x4] ss:$16 sps:$4 sm:$0xff]   ;;  %v10116_v44 = vld [vmem:[#allocation6 + $0xc] ss:$16 sps:$4 sm:$0xff]   ;;  %v10111_v42 = vld [vmem:[#allocation6] ss:$16 sps:$4 sm:$0xff]  }
 0x3a4   :  { %v9500_v35 = vcombine.low %v5561_v53, %v5563_v24  ;;  %v10114_v37 = vld [vmem:[#allocation6 + $0x8] ss:$16 sps:$4 sm:$0xff]   ;;  %v10119_v8 = vld [vmem:[#allocation6 + $0x24] ss:$16 sps:$4 sm:$0xff]   ;;  %v10117_v41 = vld [vmem:[#allocation6 + $0x20] ss:$16 sps:$4 sm:$0xff]  }
 0x3a5   :  { %6286 = vmatpush1.bf16.msra.mxu0 %v9478_v25  ;;  %6408 = vmatpush1.bf16.msra.mxu1 %v9480_v38  ;;  %v10122_v25 = vld [vmem:[#allocation6 + $0x2c] ss:$16 sps:$4 sm:$0xff]   ;;  %v10478_v38 = vld [vmem:[%s11300_s0 + $0x8] ss:$16 sps:$4 sm:$0xff]   ;;  %v10153_v14 = vld [vmem:[#allocation6 + $0xe0] ss:$16 sps:$4 sm:$0xff]  }
 0x3a6   :  { %6287 = vmatprep.subr.bf16.mxu0 %v9483_v52  ;;  %6409 = vmatprep.subr.bf16.mxu1 %v9485_v61  ;;  %v10120_v43 = vld [vmem:[#allocation6 + $0x28] ss:$16 sps:$4 sm:$0xff]   ;;  %v10125_v47 = vld [vmem:[#allocation6 + $0x44] ss:$16 sps:$4 sm:$0xff]   ;;  %v10128_v51 = vld [vmem:[#allocation6 + $0x4c] ss:$16 sps:$4 sm:$0xff]  }
 0x3a7   :  { %v10479_v57 = vld [vmem:[%s11300_s0 + $0x2c] ss:$16 sps:$4 sm:$0xff]   ;;  %v10123_v52 = vld [vmem:[#allocation6 + $0x40] ss:$16 sps:$4 sm:$0xff]   ;;  %v10131_v61 = vld [vmem:[#allocation6 + $0x64] ss:$16 sps:$4 sm:$0xff]  }
 0x3a8   :  { %v10126_v55 = vld [vmem:[#allocation6 + $0x48] ss:$16 sps:$4 sm:$0xff]   ;;  %v10134_v56 = vld [vmem:[#allocation6 + $0x6c] ss:$16 sps:$4 sm:$0xff]   ;;  %v10143_v6 = vld [vmem:[#allocation6 + $0xa4] ss:$16 sps:$4 sm:$0xff]  }
 0x3a9   :  { %6288 = vmatpush1.bf16.msra.mxu0 %v9482_v1  ;;  %6410 = vmatpush1.bf16.msra.mxu1 %v9484_v2  ;;  %v10132_v4 = vld [vmem:[#allocation6 + $0x68] ss:$16 sps:$4 sm:$0xff]   ;;  %v10137_v1 = vld [vmem:[#allocation6 + $0x84] ss:$16 sps:$4 sm:$0xff]   ;;  %v10140_v2 = vld [vmem:[#allocation6 + $0x8c] ss:$16 sps:$4 sm:$0xff]  }
 0x3aa   :  { %6289 = vmatprep.subr.bf16.mxu0 %v9487_v3  ;;  %6411 = vmatprep.subr.bf16.mxu1 %v9489_v5  ;;  %v10135_v3 = vld [vmem:[#allocation6 + $0x80] ss:$16 sps:$4 sm:$0xff]   ;;  %v10138_v5 = vld [vmem:[#allocation6 + $0x88] ss:$16 sps:$4 sm:$0xff]   ;;  %v10146_v26 = vld [vmem:[#allocation6 + $0xac] ss:$16 sps:$4 sm:$0xff]  }
 0x3ab   :  { %v10144_v39 = vld [vmem:[#allocation6 + $0xa8] ss:$16 sps:$4 sm:$0xff]   ;;  %v10161_v15 = vld [vmem:[#allocation6 + $0x104] ss:$16 sps:$4 sm:$0xff]   ;;  %v10164_v18 = vld [vmem:[#allocation6 + $0x10c] ss:$16 sps:$4 sm:$0xff]  }
 0x3ac   :  { %v10156_v33 = vld [vmem:[#allocation6 + $0xe8] ss:$16 sps:$4 sm:$0xff]   ;;  %v10173_v29 = vld [vmem:[#allocation6 + $0x144] ss:$16 sps:$4 sm:$0xff]   ;;  %v10176_v53 = vld [vmem:[#allocation6 + $0x14c] ss:$16 sps:$4 sm:$0xff]  }
 0x3ad   :  { %6290 = vmatpush1.bf16.msra.mxu0 %v9486_v16  ;;  %6412 = vmatpush1.bf16.msra.mxu1 %v9488_v11  ;;  %v10149_v16 = vld [vmem:[#allocation6 + $0xc4] ss:$16 sps:$4 sm:$0xff]   ;;  %v10147_v11 = vld [vmem:[#allocation6 + $0xc0] ss:$16 sps:$4 sm:$0xff]   ;;  %v10168_v28 = vld [vmem:[#allocation6 + $0x128] ss:$16 sps:$4 sm:$0xff]  }
 0x3ae   :  { %6291 = vmatprep.subr.bf16.mxu0 %v9491_v12  ;;  %6413 = vmatprep.subr.bf16.mxu1 %v9493_v13  ;;  %v10150_v12 = vld [vmem:[#allocation6 + $0xc8] ss:$16 sps:$4 sm:$0xff]   ;;  %v10155_v13 = vld [vmem:[#allocation6 + $0xe4] ss:$16 sps:$4 sm:$0xff]   ;;  %v10171_v24 = vld [vmem:[#allocation6 + $0x140] ss:$16 sps:$4 sm:$0xff]  }
 0x3b1   :  { %6292 = vmatpush1.bf16.msra.mxu0 %v9490_v20  ;;  %6414 = vmatpush1.bf16.msra.mxu1 %v9492_v21  ;;  %v10162_v20 = vld [vmem:[#allocation6 + $0x108] ss:$16 sps:$4 sm:$0xff]   ;;  %v10167_v21 = vld [vmem:[#allocation6 + $0x124] ss:$16 sps:$4 sm:$0xff]  }
 0x3b2   :  { %6293 = vmatprep.subr.bf16.mxu0 %v9495_v22  ;;  %6415 = vmatprep.subr.bf16.mxu1 %v9497_v23  ;;  %v10170_v22 = vld [vmem:[#allocation6 + $0x12c] ss:$16 sps:$4 sm:$0xff]   ;;  %v10165_v23 = vld [vmem:[#allocation6 + $0x120] ss:$16 sps:$4 sm:$0xff]  }
 0x3b5   :  { %6294 = vmatpush1.bf16.msra.mxu0 %v9494_v31  ;;  %6416 = vmatpush1.bf16.msra.mxu1 %v9496_v60  ;;  %v10174_v31 = vld [vmem:[#allocation6 + $0x148] ss:$16 sps:$4 sm:$0xff]   ;;  %v10179_v60 = vld [vmem:[#allocation6 + $0x164] ss:$16 sps:$4 sm:$0xff]  }
 0x3b6   :  { %6295 = vmatprep.subr.bf16.mxu0 %v9499_v46  ;;  %6417 = vmatprep.subr.bf16.mxu1 %v9501_v32  ;;  %v10182_v46 = vld [vmem:[#allocation6 + $0x16c] ss:$16 sps:$4 sm:$0xff]   ;;  %v10177_v32 = vld [vmem:[#allocation6 + $0x160] ss:$16 sps:$4 sm:$0xff]  }
 0x3b9   :  { %6296 = vmatpush1.bf16.msra.mxu0 %v9498_v34  ;;  %6418 = vmatpush1.bf16.msra.mxu1 %v9500_v35  ;;  %v10180_v34 = vld [vmem:[#allocation6 + $0x168] ss:$16 sps:$4 sm:$0xff]   ;;  %v10185_v35 = vld [vmem:[#allocation6 + $0x184] ss:$16 sps:$4 sm:$0xff]  }
 0x3ba   :  { %7628 = vmatprep.subr.bf16.mxu0 %v10113_v36  ;;  %7811 = vmatprep.subr.bf16.mxu1 %v10116_v44  ;;  %v10188_v36 = vld [vmem:[#allocation6 + $0x18c] ss:$16 sps:$4 sm:$0xff]   ;;  %v10183_v44 = vld [vmem:[#allocation6 + $0x180] ss:$16 sps:$4 sm:$0xff]  }
 0x3bc   :  { %6298 = vmatmul.mubr.bf16.vlgmr.msra.gmra.mrb[60].mxu0 %v10478_v38  ;;  %6420 = vmatmul.mubr.bf16.vlgmr.msra.gmra.mrb[60].mxu1 %v10478_v38  ;;  %v10192_v38 = vld [vmem:[#allocation6 + $0x1a8] ss:$16 sps:$4 sm:$0xff]  }
 0x3bd   :  { %7629 = vmatpush1.bf16.msra.mxu0 %v10111_v42  ;;  %7812 = vmatpush1.bf16.msra.mxu1 %v10114_v37  ;;  %v10186_v42 = vld [vmem:[#allocation6 + $0x188] ss:$16 sps:$4 sm:$0xff]   ;;  %v10191_v37 = vld [vmem:[#allocation6 + $0x1a4] ss:$16 sps:$4 sm:$0xff]  }
 0x3be   :  { %7630 = vmatprep.subr.bf16.mxu0 %v10119_v8  ;;  %7813 = vmatprep.subr.bf16.mxu1 %v10122_v25  ;;  %v10194_v8 = vld [vmem:[#allocation6 + $0x1ac] ss:$16 sps:$4 sm:$0xff]   ;;  %v10189_v25 = vld [vmem:[#allocation6 + $0x1a0] ss:$16 sps:$4 sm:$0xff]  }
 0x3bf   :  { %6307 = vmatprep.mubr.bf16.mxu0 %v10479_v57  ;;  %6429 = vmatprep.mubr.bf16.mxu1 %v10479_v57  ;;  %v10198_v57 = vld [vmem:[#allocation6 + $0x1c8] ss:$16 sps:$4 sm:$0xff]  }
 0x3c1   :  { %7631 = vmatpush1.bf16.msra.mxu0 %v10117_v41  ;;  %7814 = vmatpush1.bf16.msra.mxu1 %v10120_v43  ;;  %v10197_v41 = vld [vmem:[#allocation6 + $0x1c4] ss:$16 sps:$4 sm:$0xff]   ;;  %v10200_v43 = vld [vmem:[#allocation6 + $0x1cc] ss:$16 sps:$4 sm:$0xff]  }
 0x3c2   :  { %7632 = vmatprep.subr.bf16.mxu0 %v10125_v47  ;;  %7815 = vmatprep.subr.bf16.mxu1 %v10128_v51  ;;  %v10195_v47 = vld [vmem:[#allocation6 + $0x1c0] ss:$16 sps:$4 sm:$0xff]   ;;  %v10203_v51 = vld [vmem:[#allocation6 + $0x1e4] ss:$16 sps:$4 sm:$0xff]  }
 0x3c4   :  { %6308 = vmatmul.mubr.bf16.gmra.mrb[64].mxu0 %v10480_v58  ;;  %6430 = vmatmul.mubr.bf16.gmra.mrb[64].mxu1 %v10480_v58  ;;  %v10212_v58 = vld [vmem:[#allocation6 + $0x20c] ss:$16 sps:$4 sm:$0xff]  }
 0x3c5   :  { %7633 = vmatpush1.bf16.msra.mxu0 %v10123_v52  ;;  %7816 = vmatpush1.bf16.msra.mxu1 %v10126_v55  ;;  %v10206_v52 = vld [vmem:[#allocation6 + $0x1ec] ss:$16 sps:$4 sm:$0xff]   ;;  %v10201_v55 = vld [vmem:[#allocation6 + $0x1e0] ss:$16 sps:$4 sm:$0xff]  }
 0x3c6   :  { %7634 = vmatprep.subr.bf16.mxu0 %v10131_v61  ;;  %7817 = vmatprep.subr.bf16.mxu1 %v10134_v56  ;;  %v10204_v61 = vld [vmem:[#allocation6 + $0x1e8] ss:$16 sps:$4 sm:$0xff]   ;;  %v10209_v56 = vld [vmem:[#allocation6 + $0x204] ss:$16 sps:$4 sm:$0xff]  }
 0x3c7   :  { %6317 = vmatprep.mubr.bf16.mxu0 %v10959_v49  ;;  %6439 = vmatprep.mubr.bf16.mxu1 %v10959_v49  ;;  %v10152_v49 = vld [vmem:[#allocation6 + $0xcc] ss:$16 sps:$4 sm:$0xff]  }
 0x3c9   :  { %7635 = vmatpush1.bf16.msra.mxu0 %v10129_v62  ;;  %7818 = vmatpush1.bf16.msra.mxu1 %v10132_v4  ;;  %v10207_v62 = vld [vmem:[#allocation6 + $0x200] ss:$16 sps:$4 sm:$0xff]   ;;  %v2307_v4 = vadd.f32 %v11196_v40, %v11110_v27  ;;  %v10224_v27 = vld [vmem:[#allocation6 + $0x24c] ss:$16 sps:$4 sm:$0xff]  }
 0x3ca   :  { %7636 = vmatprep.subr.bf16.mxu0 %v10137_v1  ;;  %7819 = vmatprep.subr.bf16.mxu1 %v10140_v2  ;;  %v10210_v1 = vld [vmem:[#allocation6 + $0x208] ss:$16 sps:$4 sm:$0xff]   ;;  %v10215_v2 = vld [vmem:[#allocation6 + $0x224] ss:$16 sps:$4 sm:$0xff]  }
 0x3cc   :  { %6318 = vmatmul.mubr.bf16.gmra.mrb[68].mxu0 %v10963_v59  ;;  %6440 = vmatmul.mubr.bf16.gmra.mrb[68].mxu1 %v10963_v59  ;;  %v10158_v59 = vld [vmem:[#allocation6 + $0xec] ss:$16 sps:$4 sm:$0xff]  }
 0x3cd   :  { %7637 = vmatpush1.bf16.msra.mxu0 %v10135_v3  ;;  %7660 = vmatprep.mubr.bf16.mxu0 %v11104_v54  ;;  %v10218_v3 = vld [vmem:[#allocation6 + $0x22c] ss:$16 sps:$4 sm:$0xff]  }
 0x3ce   :  { %7820 = vmatpush1.bf16.msra.mxu1 %v10138_v5  ;;  %7843 = vmatprep.mubr.bf16.mxu1 %v11104_v54  ;;  %v10159_v54 = vld [vmem:[#allocation6 + $0x100] ss:$16 sps:$4 sm:$0xff]  }
 0x3cf   :  { %7638 = vmatprep.subr.bf16.mxu0 %v10143_v6  ;;  %7821 = vmatprep.subr.bf16.mxu1 %v10146_v26  ;;  %v10213_v5 = vld [vmem:[#allocation6 + $0x220] ss:$16 sps:$4 sm:$0xff]   ;;  %v10216_v6 = vld [vmem:[#allocation6 + $0x228] ss:$16 sps:$4 sm:$0xff]   ;;  %v10221_v26 = vld [vmem:[#allocation6 + $0x244] ss:$16 sps:$4 sm:$0xff]  }
 0x3d1   :  { %7639 = vmatpush1.bf16.msra.mxu0 %v10141_v9  ;;  %v2312_v9 = vmax.f32 %v2307_v4, 0.0 }
 0x3d2   :  { %7822 = vmatpush1.bf16.msra.mxu1 %v10144_v39  ;;  %7640 = vmatprep.subr.bf16.mxu0 %v10149_v16  ;;  %v1267_v39 = vadd.f32 %v11196_v40, %v11054_v45  ;;  %v10219_v16 = vld [vmem:[#allocation6 + $0x240] ss:$16 sps:$4 sm:$0xff]   ;;  %v10228_v45 = vld [vmem:[#allocation6 + $0x268] ss:$16 sps:$4 sm:$0xff]  }
 0x3d3   :  { %7823 = vmatprep.subr.bf16.mxu1 %v10152_v49  ;;  %v2315_v49 = vpack.c.bf16 %v2312_v9, %v2312_v9 }
 0x3d5   :  { %7641 = vmatpush1.bf16.msra.mxu0 %v10147_v11  ;;  %v10227_v11 = vld [vmem:[#allocation6 + $0x264] ss:$16 sps:$4 sm:$0xff]  }
 0x3d6   :  { %7824 = vmatpush1.bf16.msra.mxu1 %v10150_v12  ;;  %7642 = vmatprep.subr.bf16.mxu0 %v10155_v13  ;;  %v10225_v12 = vld [vmem:[#allocation6 + $0x260] ss:$16 sps:$4 sm:$0xff]   ;;  %v1272_v13 = vmax.f32 %v1267_v39, 0.0  ;;  %v10258_v39 = vld [vmem:[#allocation6 + $0x308] ss:$16 sps:$4 sm:$0xff]  }
 0x3d7   :  { %7825 = vmatprep.subr.bf16.mxu1 %v10158_v59  ;;  %v10233_v59 = vld [vmem:[#allocation6 + $0x284] ss:$16 sps:$4 sm:$0xff]  }
 0x3d9   :  { %7643 = vmatpush1.bf16.msra.mxu0 %v10153_v14  ;;  %v10236_v14 = vld [vmem:[#allocation6 + $0x28c] ss:$16 sps:$4 sm:$0xff]  }
 0x3da   :  { %7826 = vmatpush1.bf16.msra.mxu1 %v10156_v33  ;;  %7644 = vmatprep.subr.bf16.mxu0 %v10161_v15  ;;  %v1275_v33 = vpack.c.bf16 %v1272_v13, %v1272_v13  ;;  %v10231_v15 = vld [vmem:[#allocation6 + $0x280] ss:$16 sps:$4 sm:$0xff]  }
 0x3db   :  { %7827 = vmatprep.subr.bf16.mxu1 %v10164_v18  ;;  %v10234_v18 = vld [vmem:[#allocation6 + $0x288] ss:$16 sps:$4 sm:$0xff]  }
 0x3dd   :  { %7645 = vmatpush1.bf16.msra.mxu0 %v10159_v54  ;;  %v10239_v54 = vld [vmem:[#allocation6 + $0x2a4] ss:$16 sps:$4 sm:$0xff]  }
 0x3de   :  { %7828 = vmatpush1.bf16.msra.mxu1 %v10162_v20  ;;  %7646 = vmatprep.subr.bf16.mxu0 %v10167_v21  ;;  %v10237_v20 = vld [vmem:[#allocation6 + $0x2a0] ss:$16 sps:$4 sm:$0xff]  }
 0x3df   :  { %7829 = vmatprep.subr.bf16.mxu1 %v10170_v22  ;;  %v10240_v22 = vld [vmem:[#allocation6 + $0x2a8] ss:$16 sps:$4 sm:$0xff]  }
 0x3e1   :  { %7647 = vmatpush1.bf16.msra.mxu0 %v10165_v23  ;;  %v10245_v23 = vld [vmem:[#allocation6 + $0x2c4] ss:$16 sps:$4 sm:$0xff]  }
 0x3e2   :  { %7830 = vmatpush1.bf16.msra.mxu1 %v10168_v28  ;;  %7648 = vmatprep.subr.bf16.mxu0 %v10173_v29 }
 0x3e3   :  { %7831 = vmatprep.subr.bf16.mxu1 %v10176_v53  ;;  %v10248_v53 = vld [vmem:[#allocation6 + $0x2cc] ss:$16 sps:$4 sm:$0xff]  }
 0x3e5   :  { %7649 = vmatpush1.bf16.msra.mxu0 %v10171_v24 }
 0x3e6   :  { %7832 = vmatpush1.bf16.msra.mxu1 %v10174_v31  ;;  %7650 = vmatprep.subr.bf16.mxu0 %v10179_v60 }
 0x3e7   :  { %7833 = vmatprep.subr.bf16.mxu1 %v10182_v46 }
 0x3e9   :  { %7651 = vmatpush1.bf16.msra.mxu0 %v10177_v32 }
 0x3ea   :  { %7834 = vmatpush1.bf16.msra.mxu1 %v10180_v34  ;;  %7652 = vmatprep.subr.bf16.mxu0 %v10185_v35  ;;  %v10243_v35 = vld [vmem:[#allocation6 + $0x2c0] ss:$16 sps:$4 sm:$0xff]  }
 0x3eb   :  { %7835 = vmatprep.subr.bf16.mxu1 %v10188_v36 }
 0x3ed   :  { %7653 = vmatpush1.bf16.msra.mxu0 %v10183_v44  ;;  %v10246_v44 = vld [vmem:[#allocation6 + $0x2c8] ss:$16 sps:$4 sm:$0xff]  }
 0x3ee   :  { %7836 = vmatpush1.bf16.msra.mxu1 %v10186_v42  ;;  %7654 = vmatprep.subr.bf16.mxu0 %v10191_v37  ;;  %v10251_v42 = vld [vmem:[#allocation6 + $0x2e4] ss:$16 sps:$4 sm:$0xff]  }
 0x3ef   :  { %7837 = vmatprep.subr.bf16.mxu1 %v10194_v8 }
 0x3f1   :  { %7655 = vmatpush1.bf16.msra.mxu0 %v10189_v25  ;;  %v10254_v25 = vld [vmem:[#allocation6 + $0x2ec] ss:$16 sps:$4 sm:$0xff]  }
 0x3f2   :  { %7838 = vmatpush1.bf16.msra.mxu1 %v10192_v38  ;;  %7656 = vmatprep.subr.bf16.mxu0 %v10197_v41 }
 0x3f3   :  { %7839 = vmatprep.subr.bf16.mxu1 %v10200_v43  ;;  %v10249_v43 = vld [vmem:[#allocation6 + $0x2e0] ss:$16 sps:$4 sm:$0xff]  }
 0x3f5   :  { %7657 = vmatpush1.bf16.msra.mxu0 %v10195_v47 }
 0x3f6   :  { %7840 = vmatpush1.bf16.msra.mxu1 %v10198_v57  ;;  %7658 = vmatprep.subr.bf16.mxu0 %v10203_v51  ;;  %v10252_v57 = vld [vmem:[#allocation6 + $0x2e8] ss:$16 sps:$4 sm:$0xff]   ;;  %v10257_v51 = vld [vmem:[#allocation6 + $0x304] ss:$16 sps:$4 sm:$0xff]  }
 0x3f7   :  { %7841 = vmatprep.subr.bf16.mxu1 %v10206_v52 }
 0x3f9   :  { %7659 = vmatpush1.bf16.msra.mxu0 %v10201_v55 }
 0x3fa   :  { %7842 = vmatpush1.bf16.msra.mxu1 %v10204_v61  ;;  %7689 = vmatprep.subr.bf16.mxu0 %v10209_v56  ;;  %v10260_v56 = vld [vmem:[#allocation6 + $0x30c] ss:$16 sps:$4 sm:$0xff]  }
 0x3fb   :  { %7872 = vmatprep.subr.bf16.mxu1 %v10212_v58 }
 0x3fc   :  { %7661 = vmatmul.mubr.bf16.vlgmr.msra.gmra.mrb[72].mxu0 %v11050_v7 }
 0x3fd   :  { %7844 = vmatmul.mubr.bf16.vlgmr.msra.gmra.mrb[72].mxu1 %v11050_v7  ;;  %7670 = vmatprep.mubr.bf16.mxu0 %v11112_v30  ;;  %v10222_v7 = vld [vmem:[#allocation6 + $0x248] ss:$16 sps:$4 sm:$0xff]  }
 0x3fe   :  { %7690 = vmatpush1.bf16.msra.mxu0 %v10207_v62  ;;  %7853 = vmatprep.mubr.bf16.mxu1 %v11112_v30  ;;  %v10230_v30 = vld [vmem:[#allocation6 + $0x26c] ss:$16 sps:$4 sm:$0xff]  }
 0x3ff   :  { %7873 = vmatpush1.bf16.msra.mxu1 %v10210_v1  ;;  %7691 = vmatprep.subr.bf16.mxu0 %v10215_v2 }
 0x400   :  { %7874 = vmatprep.subr.bf16.mxu1 %v10218_v3 }
 0x402   :  { %7692 = vmatpush1.bf16.msra.mxu0 %v10213_v5 }
 0x403   :  { %7875 = vmatpush1.bf16.msra.mxu1 %v10216_v6  ;;  %7693 = vmatprep.subr.bf16.mxu0 %v10221_v26  ;;  %v10255_v26 = vld [vmem:[#allocation6 + $0x300] ss:$16 sps:$4 sm:$0xff]  }
 0x404   :  { %7671 = vmatmul.mubr.bf16.gmra.mrb[76].mxu0 %v11056_v50  ;;  %7876 = vmatprep.subr.bf16.mxu1 %v10224_v27 }
 0x405   :  { %7854 = vmatmul.mubr.bf16.gmra.mrb[76].mxu1 %v11056_v50  ;;  %7680 = vmatprep.mubr.bf16.mxu0 %v2315_v49  ;;  %v10242_v50 = vld [vmem:[#allocation6 + $0x2ac] ss:$16 sps:$4 sm:$0xff]  }
 0x406   :  { %7694 = vmatpush1.bf16.msra.mxu0 %v10219_v16  ;;  %7863 = vmatprep.mubr.bf16.mxu1 %v2315_v49  ;;  %v10263_v16 = vld [vmem:[#allocation6 + $0x324] ss:$16 sps:$4 sm:$0xff]  }
 0x407   :  { %7877 = vmatpush1.bf16.msra.mxu1 %v10222_v7  ;;  %7695 = vmatprep.subr.bf16.mxu0 %v10227_v11 }
 0x408   :  { %7878 = vmatprep.subr.bf16.mxu1 %v10230_v30  ;;  %v10266_v30 = vld [vmem:[#allocation6 + $0x32c] ss:$16 sps:$4 sm:$0xff]  }
 0x40a   :  { %7696 = vmatpush1.bf16.msra.mxu0 %v10225_v12 }
 0x40b   :  { %7879 = vmatpush1.bf16.msra.mxu1 %v10228_v45  ;;  %7697 = vmatprep.subr.bf16.mxu0 %v10233_v59  ;;  %v10261_v45 = vld [vmem:[#allocation6 + $0x320] ss:$16 sps:$4 sm:$0xff]  }
 0x40c   :  { %7681 = vmatmul.mubr.bf16.gmra.mrb[80].mxu0 %v1275_v33  ;;  %7880 = vmatprep.subr.bf16.mxu1 %v10236_v14  ;;  %v10264_v14 = vld [vmem:[#allocation6 + $0x328] ss:$16 sps:$4 sm:$0xff]  }
 0x40d   :  { %7864 = vmatmul.mubr.bf16.gmra.mrb[80].mxu1 %v1275_v33  ;;  %7721 = vmatprep.mubr.bf16.mxu0 %v11200_v48  ;;  %v10269_v33 = vld [vmem:[#allocation6 + $0x344] ss:$16 sps:$4 sm:$0xff]  }
 0x40e   :  { %7698 = vmatpush1.bf16.msra.mxu0 %v10231_v15  ;;  %7904 = vmatprep.mubr.bf16.mxu1 %v11200_v48 }
 0x40f   :  { %7881 = vmatpush1.bf16.msra.mxu1 %v10234_v18  ;;  %v5259_v21 = vpop.f32.mrb[48].mxu0  ;;  %7699 = vmatprep.subr.bf16.mxu0 %v10239_v54  ;;  %v5381_v28 = vpop.f32.mrb[48].mxu1 }
 0x410   :  { %v5261_v29 = vpop.f32.mrb[49].mxu0  ;;  %7882 = vmatprep.subr.bf16.mxu1 %v10242_v50  ;;  %v5383_v31 = vpop.f32.mrb[49].mxu1  ;;  %v10272_v50 = vld [vmem:[#allocation6 + $0x34c] ss:$16 sps:$4 sm:$0xff]  }
 0x411   :  { %v5408_v24 = vmax.f32 %v5259_v21, %v5261_v29  ;;  %v5263_v60 = vpop.f32.mrb[50].mxu0  ;;  %v5413_v46 = vmax.f32 %v5381_v28, %v5383_v31  ;;  %v5385_v32 = vpop.f32.mrb[50].mxu1  ;;  %v10267_v31 = vld [vmem:[#allocation6 + $0x340] ss:$16 sps:$4 sm:$0xff]  }
 0x412   :  { %7700 = vmatpush1.bf16.msra.mxu0 %v10237_v20  ;;  %v5265_v34 = vpop.f32.mrb[51].mxu0  ;;  %v5387_v36 = vpop.f32.mrb[51].mxu1 }
 0x413   :  { %7883 = vmatpush1.bf16.msra.mxu1 %v10240_v22  ;;  %v5409_v48 = vmax.f32 %v5263_v60, %v5265_v34  ;;  %7701 = vmatprep.subr.bf16.mxu0 %v10245_v23  ;;  %v5418_v37 = vmax.f32 %v5408_v24, %v5413_v46  ;;  %v5414_v8 = vmax.f32 %v5385_v32, %v5387_v36  ;;  %v10270_v46 = vld [vmem:[#allocation6 + $0x348] ss:$16 sps:$4 sm:$0xff]   ;;  %v10275_v32 = vld [vmem:[#allocation6 + $0x364] ss:$16 sps:$4 sm:$0xff]   ;;  %v10273_v36 = vld [vmem:[#allocation6 + $0x360] ss:$16 sps:$4 sm:$0xff]  }
 0x414   :  { %7884 = vmatprep.subr.bf16.mxu1 %v10248_v53 }
 0x415   :  { %v5423_v38 = vadd.f32 %v11196_v40, %v5418_v37  ;;  %v5419_v41 = vmax.f32 %v5409_v48, %v5414_v8  ;;  %v10284_v37 = vld [vmem:[#allocation6 + $0x38c] ss:$16 sps:$4 sm:$0xff]   ;;  %v10279_v8 = vld [vmem:[#allocation6 + $0x380] ss:$16 sps:$4 sm:$0xff]  }
 0x416   :  { %7702 = vmatpush1.bf16.msra.mxu0 %v10243_v35  ;;  %v10278_v35 = vld [vmem:[#allocation6 + $0x36c] ss:$16 sps:$4 sm:$0xff]  }
 0x417   :  { %7885 = vmatpush1.bf16.msra.mxu1 %v10246_v44  ;;  %v5269_v47 = vpop.f32.mrb[52].mxu0  ;;  %7703 = vmatprep.subr.bf16.mxu0 %v10251_v42  ;;  %v5424_v52 = vadd.f32 %v11196_v40, %v5419_v41  ;;  %v5391_v55 = vpop.f32.mrb[52].mxu1  ;;  %v5428_v1 = vmax.f32 %v5423_v38, 0.0  ;;  %v10276_v44 = vld [vmem:[#allocation6 + $0x368] ss:$16 sps:$4 sm:$0xff]  }
 0x418   :  { %v5271_v61 = vpop.f32.mrb[53].mxu0  ;;  %7886 = vmatprep.subr.bf16.mxu1 %v10254_v25  ;;  %v5393_v62 = vpop.f32.mrb[53].mxu1  ;;  %v10281_v42 = vld [vmem:[#allocation6 + $0x384] ss:$16 sps:$4 sm:$0xff]   ;;  %v10282_v25 = vld [vmem:[#allocation6 + $0x388] ss:$16 sps:$4 sm:$0xff]  }
 0x419   :  { %v5410_v58 = vmax.f32 %v5269_v47, %v5271_v61  ;;  %v5273_v4 = vpop.f32.mrb[54].mxu0  ;;  %v5429_v2 = vmax.f32 %v5424_v52, 0.0  ;;  %v5415_v3 = vmax.f32 %v5391_v55, %v5393_v62  ;;  %v5395_v5 = vpop.f32.mrb[54].mxu1  ;;  %v10287_v38 = vld [vmem:[#allocation6 + $0x3a4] ss:$16 sps:$4 sm:$0xff]  }
 0x41a   :  { %7704 = vmatpush1.bf16.msra.mxu0 %v10249_v43  ;;  %v5275_v6 = vpop.f32.mrb[55].mxu0  ;;  %v5397_v27 = vpop.f32.mrb[55].mxu1  ;;  %v10290_v41 = vld [vmem:[#allocation6 + $0x3ac] ss:$16 sps:$4 sm:$0xff]   ;;  %v10285_v43 = vld [vmem:[#allocation6 + $0x3a0] ss:$16 sps:$4 sm:$0xff]  }
 0x41b   :  { %7887 = vmatpush1.bf16.msra.mxu1 %v10252_v57  ;;  %v5411_v9 = vmax.f32 %v5273_v4, %v5275_v6  ;;  %7705 = vmatprep.subr.bf16.mxu0 %v10257_v51  ;;  %v11237_v7 = vpack.c.bf16 %v5429_v2, %v5428_v1  ;;  %v5420_v49 = vmax.f32 %v5410_v58, %v5415_v3  ;;  %v10288_v47 = vld [vmem:[#allocation6 + $0x3a8] ss:$16 sps:$4 sm:$0xff]   ;;  %v10293_v57 = vld [vmem:[#allocation6 + $0x3c4] ss:$16 sps:$4 sm:$0xff]   ;;  %v10296_v51 = vld [vmem:[#allocation6 + $0x3cc] ss:$16 sps:$4 sm:$0xff]  }
 0x41c   :  { %v5416_v11 = vmax.f32 %v5395_v5, %v5397_v27  ;;  %7888 = vmatprep.subr.bf16.mxu1 %v10260_v56  ;;  %v10291_v52 = vld [vmem:[#allocation6 + $0x3c0] ss:$16 sps:$4 sm:$0xff]   ;;  %v10294_v55 = vld [vmem:[#allocation6 + $0x3c8] ss:$16 sps:$4 sm:$0xff]   ;;  %v10299_v61 = vld [vmem:[#allocation6 + $0x3e4] ss:$16 sps:$4 sm:$0xff]   ;;  %v4387_v3 = vadd.f32 %v11196_v40, %v11204_v17 }
 0x41d   :  { %v5425_v12 = vadd.f32 %v11196_v40, %v5420_v49  ;;  %v10302_v56 = vld [vmem:[#allocation6 + $0x3ec] ss:$16 sps:$4 sm:$0xff]   ;;  %v10297_v58 = vld [vmem:[#allocation6 + $0x3e0] ss:$16 sps:$4 sm:$0xff]   ;;  %v10300_v62 = vld [vmem:[#allocation6 + $0x3e8] ss:$16 sps:$4 sm:$0xff]   ;;  %v3347_v49 = vadd.f32 %v11196_v40, %v11164_v19 }
 0x41e   :  { %v5421_v13 = vmax.f32 %v5411_v9, %v5416_v11  ;;  %7706 = vmatpush1.bf16.msra.mxu0 %v10255_v26  ;;  %v10305_v4 = vld [vmem:[#allocation6 + $0x404] ss:$16 sps:$4 sm:$0xff]   ;;  %v10308_v1 = vld [vmem:[#allocation6 + $0x40c] ss:$16 sps:$4 sm:$0xff]   ;;  %v10303_v2 = vld [vmem:[#allocation6 + $0x400] ss:$16 sps:$4 sm:$0xff]  }
 0x41f   :  { %7889 = vmatpush1.bf16.msra.mxu1 %v10258_v39  ;;  %v5279_v59 = vpop.f32.mrb[56].mxu0  ;;  %7707 = vmatprep.subr.bf16.mxu0 %v10263_v16  ;;  %v5401_v18 = vpop.f32.mrb[56].mxu1  ;;  %v5430_v23 = vmax.f32 %v5425_v12, 0.0  ;;  %v10306_v5 = vld [vmem:[#allocation6 + $0x408] ss:$16 sps:$4 sm:$0xff]   ;;  %v4392_v27 = vmax.f32 %v4387_v3, 0.0 }
 0x420   :  { %v5426_v15 = vadd.f32 %v11196_v40, %v5421_v13  ;;  %v5281_v54 = vpop.f32.mrb[57].mxu0  ;;  %7890 = vmatprep.subr.bf16.mxu1 %v10266_v30  ;;  %v5403_v21 = vpop.f32.mrb[57].mxu1  ;;  %v10311_v6 = vld [vmem:[#allocation6 + $0x424] ss:$16 sps:$4 sm:$0xff]   ;;  %v10314_v26 = vld [vmem:[#allocation6 + $0x42c] ss:$16 sps:$4 sm:$0xff]  }
 0x421   :  { %v5412_v20 = vmax.f32 %v5279_v59, %v5281_v54  ;;  %v5283_v22 = vpop.f32.mrb[58].mxu0  ;;  %v5417_v29 = vmax.f32 %v5401_v18, %v5403_v21  ;;  %v5405_v53 = vpop.f32.mrb[58].mxu1  ;;  %v10309_v9 = vld [vmem:[#allocation6 + $0x420] ss:$16 sps:$4 sm:$0xff]   ;;  %v10312_v39 = vld [vmem:[#allocation6 + $0x428] ss:$16 sps:$4 sm:$0xff]   ;;  %v4395_v30 = vpack.c.bf16 %v4392_v27, %v4392_v27 }
 0x422   :  { %v5431_v28 = vmax.f32 %v5426_v15, 0.0  ;;  %7708 = vmatpush1.bf16.msra.mxu0 %v10261_v45  ;;  %v5284_v24 = vpop.f32.mrb[59].mxu0  ;;  %v5406_v60 = vpop.f32.mrb[59].mxu1  ;;  %v10317_v16 = vld [vmem:[#allocation6 + $0x444] ss:$16 sps:$4 sm:$0xff]   ;;  %v3352_v13 = vmax.f32 %v3347_v49, 0.0 }
 0x423   :  { %7891 = vmatpush1.bf16.msra.mxu1 %v10264_v14  ;;  %7709 = vmatprep.subr.bf16.mxu0 %v10269_v33  ;;  %v11241_v34 = vmax.f32 %v5412_v20, %v5417_v29  ;;  %v10320_v17 = vld [vmem:[#allocation6 + $0x44c] ss:$16 sps:$4 sm:$0xff]   ;;  %v10315_v11 = vld [vmem:[#allocation6 + $0x440] ss:$16 sps:$4 sm:$0xff]   ;;  %v10323_v12 = vld [vmem:[#allocation6 + $0x464] ss:$16 sps:$4 sm:$0xff]  }
 0x424   :  { %7892 = vmatprep.subr.bf16.mxu1 %v10272_v50  ;;  %v11243_v48 = vpack.c.bf16 %v5431_v28, %v5430_v23  ;;  %v10321_v45 = vld [vmem:[#allocation6 + $0x460] ss:$16 sps:$4 sm:$0xff]   ;;  %v10324_v19 = vld [vmem:[#allocation6 + $0x468] ss:$16 sps:$4 sm:$0xff]   ;;  %v10329_v40 = vld [vmem:[#allocation6 + $0x484] ss:$16 sps:$4 sm:$0xff]   ;;  %v3355_v14 = vpack.c.bf16 %v3352_v13, %v3352_v13 }
 0x425   :  { %v10332_v59 = vld [vmem:[#allocation6 + $0x48c] ss:$16 sps:$4 sm:$0xff]   ;;  %v10327_v33 = vld [vmem:[#allocation6 + $0x480] ss:$16 sps:$4 sm:$0xff]   ;;  %v10330_v15 = vld [vmem:[#allocation6 + $0x488] ss:$16 sps:$4 sm:$0xff]  }
 0x426   :  { %7710 = vmatpush1.bf16.msra.mxu0 %v10267_v31  ;;  %v10335_v18 = vld [vmem:[#allocation6 + $0x4a4] ss:$16 sps:$4 sm:$0xff]   ;;  %v10333_v54 = vld [vmem:[#allocation6 + $0x4a0] ss:$16 sps:$4 sm:$0xff]   ;;  %v10336_v50 = vld [vmem:[#allocation6 + $0x4a8] ss:$16 sps:$4 sm:$0xff]  }
 0x427   :  { %7893 = vmatpush1.bf16.msra.mxu1 %v10270_v46  ;;  %7711 = vmatprep.subr.bf16.mxu0 %v10275_v32  ;;  %v10341_v20 = vld [vmem:[#allocation6 + $0x4c4] ss:$16 sps:$4 sm:$0xff]   ;;  %v10344_v21 = vld [vmem:[#allocation6 + $0x4cc] ss:$16 sps:$4 sm:$0xff]   ;;  %v10339_v22 = vld [vmem:[#allocation6 + $0x4c0] ss:$16 sps:$4 sm:$0xff]  }
 0x428   :  { %7894 = vmatprep.subr.bf16.mxu1 %v10278_v35  ;;  %v10342_v23 = vld [vmem:[#allocation6 + $0x4c8] ss:$16 sps:$4 sm:$0xff]   ;;  %v10347_v28 = vld [vmem:[#allocation6 + $0x4e4] ss:$16 sps:$4 sm:$0xff]   ;;  %v10350_v29 = vld [vmem:[#allocation6 + $0x4ec] ss:$16 sps:$4 sm:$0xff]  }
 0x429   :  { %v10345_v53 = vld [vmem:[#allocation6 + $0x4e0] ss:$16 sps:$4 sm:$0xff]   ;;  %v10348_v24 = vld [vmem:[#allocation6 + $0x4e8] ss:$16 sps:$4 sm:$0xff]   ;;  %v10353_v31 = vld [vmem:[#allocation6 + $0x504] ss:$16 sps:$4 sm:$0xff]  }
 0x42a   :  { %7712 = vmatpush1.bf16.msra.mxu0 %v10273_v36  ;;  %v10356_v60 = vld [vmem:[#allocation6 + $0x50c] ss:$16 sps:$4 sm:$0xff]   ;;  %v10351_v46 = vld [vmem:[#allocation6 + $0x500] ss:$16 sps:$4 sm:$0xff]   ;;  %v10354_v32 = vld [vmem:[#allocation6 + $0x508] ss:$16 sps:$4 sm:$0xff]  }
 0x42b   :  { %7895 = vmatpush1.bf16.msra.mxu1 %v10276_v44  ;;  %7713 = vmatprep.subr.bf16.mxu0 %v10281_v42  ;;  %v10359_v35 = vld [vmem:[#allocation6 + $0x524] ss:$16 sps:$4 sm:$0xff]   ;;  %v10362_v36 = vld [vmem:[#allocation6 + $0x52c] ss:$16 sps:$4 sm:$0xff]   ;;  %v10357_v44 = vld [vmem:[#allocation6 + $0x520] ss:$16 sps:$4 sm:$0xff]  }
 0x42c   :  { %7896 = vmatprep.subr.bf16.mxu1 %v10284_v37  ;;  %v10360_v42 = vld [vmem:[#allocation6 + $0x528] ss:$16 sps:$4 sm:$0xff]   ;;  %v10365_v37 = vld [vmem:[#allocation6 + $0x544] ss:$16 sps:$4 sm:$0xff]   ;;  %v10387_v3 = vld [vmem:[#allocation6 + $0x5c0] ss:$16 sps:$4 sm:$0xff]  }
 0x42d   :  { %v10396_v27 = vld [vmem:[#allocation6 + $0x5e8] ss:$16 sps:$4 sm:$0xff]  }
 0x42e   :  { %7714 = vmatpush1.bf16.msra.mxu0 %v10279_v8  ;;  %v10368_v8 = vld [vmem:[#allocation6 + $0x54c] ss:$16 sps:$4 sm:$0xff]  }
 0x42f   :  { %7897 = vmatpush1.bf16.msra.mxu1 %v10282_v25  ;;  %7715 = vmatprep.subr.bf16.mxu0 %v10287_v38  ;;  %v10363_v25 = vld [vmem:[#allocation6 + $0x540] ss:$16 sps:$4 sm:$0xff]   ;;  %v10366_v38 = vld [vmem:[#allocation6 + $0x548] ss:$16 sps:$4 sm:$0xff]  }
 0x430   :  { %7898 = vmatprep.subr.bf16.mxu1 %v10290_v41  ;;  %v10371_v41 = vld [vmem:[#allocation6 + $0x564] ss:$16 sps:$4 sm:$0xff]  }
 0x432   :  { %7716 = vmatpush1.bf16.msra.mxu0 %v10285_v43  ;;  %v10374_v43 = vld [vmem:[#allocation6 + $0x56c] ss:$16 sps:$4 sm:$0xff]  }
 0x433   :  { %7899 = vmatpush1.bf16.msra.mxu1 %v10288_v47  ;;  %7717 = vmatprep.subr.bf16.mxu0 %v10293_v57  ;;  %v10369_v47 = vld [vmem:[#allocation6 + $0x560] ss:$16 sps:$4 sm:$0xff]   ;;  %v10372_v57 = vld [vmem:[#allocation6 + $0x568] ss:$16 sps:$4 sm:$0xff]  }
 0x434   :  { %7900 = vmatprep.subr.bf16.mxu1 %v10296_v51  ;;  %v10377_v51 = vld [vmem:[#allocation6 + $0x584] ss:$16 sps:$4 sm:$0xff]  }
 0x436   :  { %7718 = vmatpush1.bf16.msra.mxu0 %v10291_v52  ;;  %v10380_v52 = vld [vmem:[#allocation6 + $0x58c] ss:$16 sps:$4 sm:$0xff]  }
 0x437   :  { %7901 = vmatpush1.bf16.msra.mxu1 %v10294_v55  ;;  %7719 = vmatprep.subr.bf16.mxu0 %v10299_v61  ;;  %v10375_v55 = vld [vmem:[#allocation6 + $0x580] ss:$16 sps:$4 sm:$0xff]   ;;  %v10378_v61 = vld [vmem:[#allocation6 + $0x588] ss:$16 sps:$4 sm:$0xff]  }
 0x438   :  { %7902 = vmatprep.subr.bf16.mxu1 %v10302_v56  ;;  %v10383_v56 = vld [vmem:[#allocation6 + $0x5a4] ss:$16 sps:$4 sm:$0xff]  }
 0x43a   :  { %7720 = vmatpush1.bf16.msra.mxu0 %v10297_v58  ;;  %v10386_v58 = vld [vmem:[#allocation6 + $0x5ac] ss:$16 sps:$4 sm:$0xff]  }
 0x43b   :  { %7903 = vmatpush1.bf16.msra.mxu1 %v10300_v62  ;;  %7750 = vmatprep.subr.bf16.mxu0 %v10305_v4  ;;  %v10381_v62 = vld [vmem:[#allocation6 + $0x5a0] ss:$16 sps:$4 sm:$0xff]   ;;  %v10384_v4 = vld [vmem:[#allocation6 + $0x5a8] ss:$16 sps:$4 sm:$0xff]  }
 0x43c   :  { %7933 = vmatprep.subr.bf16.mxu1 %v10308_v1  ;;  %v10389_v1 = vld [vmem:[#allocation6 + $0x5c4] ss:$16 sps:$4 sm:$0xff]  }
 0x43d   :  { %7722 = vmatmul.mubr.bf16.vlgmr.msra.gmra.mrb[72].mxu0 %v11160_v10 }
 0x43e   :  { %7905 = vmatmul.mubr.bf16.vlgmr.msra.gmra.mrb[72].mxu1 %v11160_v10  ;;  %7731 = vmatprep.mubr.bf16.mxu0 %v11206_v0  ;;  %v10318_v10 = vld [vmem:[#allocation6 + $0x448] ss:$16 sps:$4 sm:$0xff]  }
 0x43f   :  { %7914 = vmatprep.mubr.bf16.mxu1 %v11206_v0  ;;  %7751 = vmatpush1.bf16.msra.mxu0 %v10303_v2  ;;  %v10326_v0 = vld [vmem:[#allocation6 + $0x46c] ss:$16 sps:$4 sm:$0xff]  }
 0x440   :  { %7934 = vmatpush1.bf16.msra.mxu1 %v10306_v5  ;;  %7752 = vmatprep.subr.bf16.mxu0 %v10311_v6  ;;  %v10392_v2 = vld [vmem:[#allocation6 + $0x5cc] ss:$16 sps:$4 sm:$0xff]   ;;  %v10390_v5 = vld [vmem:[#allocation6 + $0x5c8] ss:$16 sps:$4 sm:$0xff]   ;;  %v10395_v6 = vld [vmem:[#allocation6 + $0x5e4] ss:$16 sps:$4 sm:$0xff]  }
 0x441   :  { %7935 = vmatprep.subr.bf16.mxu1 %v10314_v26  ;;  %v10398_v26 = vld [vmem:[#allocation6 + $0x5ec] ss:$16 sps:$4 sm:$0xff]  }
 0x443   :  { %7753 = vmatpush1.bf16.msra.mxu0 %v10309_v9  ;;  %v10393_v9 = vld [vmem:[#allocation6 + $0x5e0] ss:$16 sps:$4 sm:$0xff]  }
 0x444   :  { %7936 = vmatpush1.bf16.msra.mxu1 %v10312_v39  ;;  %7754 = vmatprep.subr.bf16.mxu0 %v10317_v16  ;;  %v10399_v39 = vld [vmem:[#allocation9 + $0x40] sm:$0xff]  }
 0x445   :  { %7732 = vmatmul.mubr.bf16.gmra.mrb[76].mxu0 %v11166_v63  ;;  %7937 = vmatprep.subr.bf16.mxu1 %v10320_v17  ;;  %v10405_v16 = vld [vmem:[#allocation9 + $0xc0] sm:$0xff]  }
 0x446   :  { %7915 = vmatmul.mubr.bf16.gmra.mrb[76].mxu1 %v11166_v63  ;;  %7741 = vmatprep.mubr.bf16.mxu0 %v4395_v30  ;;  %v10338_v63 = vld [vmem:[#allocation6 + $0x4ac] ss:$16 sps:$4 sm:$0xff]  }
 0x447   :  { %7924 = vmatprep.mubr.bf16.mxu1 %v4395_v30  ;;  %7755 = vmatpush1.bf16.msra.mxu0 %v10315_v11 }
 0x448   :  { %7938 = vmatpush1.bf16.msra.mxu1 %v10318_v10  ;;  %7756 = vmatprep.subr.bf16.mxu0 %v10323_v12 }
 0x449   :  { %7939 = vmatprep.subr.bf16.mxu1 %v10326_v0 }
 0x44b   :  { %7757 = vmatpush1.bf16.msra.mxu0 %v10321_v45 }
 0x44c   :  { %7940 = vmatpush1.bf16.msra.mxu1 %v10324_v19  ;;  %7758 = vmatprep.subr.bf16.mxu0 %v10329_v40 }
 0x44d   :  { %7742 = vmatmul.mubr.bf16.gmra.mrb[80].mxu0 %v3355_v14  ;;  %7941 = vmatprep.subr.bf16.mxu1 %v10332_v59 }
 0x44e   :  { %7925 = vmatmul.mubr.bf16.gmra.mrb[80].mxu1 %v3355_v14 }
 0x44f   :  { %7759 = vmatpush1.bf16.msra.mxu0 %v10327_v33  ;;  %v10481_v33 = vld [vmem:[#allocation4] ss:$0 sm:$0xff] }
 0x450   :  { %7942 = vmatpush1.bf16.msra.mxu1 %v10330_v15  ;;  %7760 = vmatprep.subr.bf16.mxu0 %v10335_v18 }
 0x451   :  { %7943 = vmatprep.subr.bf16.mxu1 %v10338_v63 }
 0x453   :  { %7761 = vmatpush1.bf16.msra.mxu0 %v10333_v54 }
 0x454   :  { %7944 = vmatpush1.bf16.msra.mxu1 %v10336_v50  ;;  %7762 = vmatprep.subr.bf16.mxu0 %v10341_v20 }
 0x455   :  { %7945 = vmatprep.subr.bf16.mxu1 %v10344_v21 }
 0x457   :  { %7763 = vmatpush1.bf16.msra.mxu0 %v10339_v22 }
 0x458   :  { %7946 = vmatpush1.bf16.msra.mxu1 %v10342_v23  ;;  %7764 = vmatprep.subr.bf16.mxu0 %v10347_v28 }
 0x459   :  { %7947 = vmatprep.subr.bf16.mxu1 %v10350_v29 }
 0x45b   :  { %7765 = vmatpush1.bf16.msra.mxu0 %v10345_v53 }
 0x45c   :  { %7948 = vmatpush1.bf16.msra.mxu1 %v10348_v24  ;;  %7766 = vmatprep.subr.bf16.mxu0 %v10353_v31 }
 0x45d   :  { %7949 = vmatprep.subr.bf16.mxu1 %v10356_v60 }
 0x45f   :  { %7767 = vmatpush1.bf16.msra.mxu0 %v10351_v46 }
 0x460   :  { %7950 = vmatpush1.bf16.msra.mxu1 %v10354_v32  ;;  %7768 = vmatprep.subr.bf16.mxu0 %v10359_v35 }
 0x461   :  { %7951 = vmatprep.subr.bf16.mxu1 %v10362_v36 }
 0x463   :  { %7769 = vmatpush1.bf16.msra.mxu0 %v10357_v44  ;;  %v10400_v44 = vld [vmem:[#allocation9] sm:$0xff]  }
 0x464   :  { %7952 = vmatpush1.bf16.msra.mxu1 %v10360_v42  ;;  %7770 = vmatprep.subr.bf16.mxu0 %v10365_v37  ;;  %v10406_v42 = vld [vmem:[#allocation9 + $0x80] sm:$0xff]   ;;  %v10401_v37 = vld [vmem:[#allocation9 + $0x48] sm:$0xff]  }
 0x465   :  { %7953 = vmatprep.subr.bf16.mxu1 %v10368_v8  ;;  %v10409_v8 = vld [vmem:[#allocation9 + $0xc8] sm:$0xff]  }
 0x467   :  { %7771 = vmatpush1.bf16.msra.mxu0 %v10363_v25 }
 0x468   :  { %7954 = vmatpush1.bf16.msra.mxu1 %v10366_v38  ;;  %7772 = vmatprep.subr.bf16.mxu0 %v10371_v41 }
 0x469   :  { %7955 = vmatprep.subr.bf16.mxu1 %v10374_v43 }
 0x46b   :  { %7773 = vmatpush1.bf16.msra.mxu0 %v10369_v47 }
 0x46c   :  { %7956 = vmatpush1.bf16.msra.mxu1 %v10372_v57  ;;  %7774 = vmatprep.subr.bf16.mxu0 %v10377_v51  ;;  %v10402_v51 = vld [vmem:[#allocation9 + $0x8] sm:$0xff]  }
 0x46d   :  { %7957 = vmatprep.subr.bf16.mxu1 %v10380_v52  ;;  %v10410_v52 = vld [vmem:[#allocation9 + $0x88] sm:$0xff]  }
 0x46f   :  { %7775 = vmatpush1.bf16.msra.mxu0 %v10375_v55 }
 0x470   :  { %7958 = vmatpush1.bf16.msra.mxu1 %v10378_v61  ;;  %7776 = vmatprep.subr.bf16.mxu0 %v10383_v56 }
 0x471   :  { %7959 = vmatprep.subr.bf16.mxu1 %v10386_v58  ;;  %v10403_v58 = vld [vmem:[#allocation9 + $0x50] sm:$0xff]  }
 0x473   :  { %7777 = vmatpush1.bf16.msra.mxu0 %v10381_v62 }
 0x474   :  { %7960 = vmatpush1.bf16.msra.mxu1 %v10384_v4  ;;  %7778 = vmatprep.subr.bf16.mxu0 %v10389_v1 }
 0x475   :  { %7961 = vmatprep.subr.bf16.mxu1 %v10392_v2 }
 0x477   :  { %7779 = vmatpush1.bf16.msra.mxu0 %v10387_v3 }
 0x478   :  { %7962 = vmatpush1.bf16.msra.mxu1 %v10390_v5  ;;  %7780 = vmatprep.subr.bf16.mxu0 %v10395_v6 }
 0x479   :  { %7963 = vmatprep.subr.bf16.mxu1 %v10398_v26  ;;  %v10404_v26 = vld [vmem:[#allocation9 + $0x10] sm:$0xff]  }
 0x47b   :  { %7781 = vmatpush1.bf16.msra.mxu0 %v10393_v9  ;;  %v5427_v9 = vadd.f32 %v10481_v33, %v11241_v34  ;;  %v10411_v34 = vld [vmem:[#allocation9 + $0x60] sm:$0xff]  }
 0x47c   :  { %7964 = vmatpush1.bf16.msra.mxu1 %v10396_v27  ;;  %9754 = vmatprep.subr.bf16.mxu0 %v10399_v39  ;;  %v10407_v27 = vld [vmem:[#allocation9 + $0x58] sm:$0xff]  }
 0x47d   :  { %9776 = vmatprep.subr.bf16.mxu1 %v10405_v16 }
 0x48f   :  { %v6299_v17 = vpop.f32.mrb[60].mxu0  ;;  %v6421_v49 = vpop.f32.mrb[60].mxu1 }
 0x490   :  { %v6301_v11 = vpop.f32.mrb[61].mxu0  ;;  %v6423_v10 = vpop.f32.mrb[61].mxu1 }
 0x491   :  { %v6448_v30 = vmax.f32 %v6299_v17, %v6301_v11  ;;  %v6303_v12 = vpop.f32.mrb[62].mxu0  ;;  %v6453_v0 = vmax.f32 %v6421_v49, %v6423_v10  ;;  %v6425_v13 = vpop.f32.mrb[62].mxu1  ;;  %v5432_v17 = vmax.f32 %v5427_v9, 0.0  ;;  %v10408_v49 = vld [vmem:[#allocation9 + $0x18] sm:$0xff]   ;;  %v10412_v10 = vld [vmem:[#allocation9 + $0x20] sm:$0xff]  }
 0x492   :  { %v6305_v45 = vpop.f32.mrb[63].mxu0  ;;  %v6427_v40 = vpop.f32.mrb[63].mxu1 }
 0x493   :  { %v6449_v19 = vmax.f32 %v6303_v12, %v6305_v45  ;;  %v6458_v59 = vmax.f32 %v6448_v30, %v6453_v0  ;;  %v6454_v14 = vmax.f32 %v6425_v13, %v6427_v40  ;;  %v5435_v30 = vpack.c.bf16 %v5432_v17, %v5432_v17  ;;  %v10413_v12 = vld [vmem:[#allocation9 + $0xd0] sm:$0xff]   ;;  %v10416_v13 = vld [vmem:[#allocation9 + $0x28] sm:$0xff]   ;;  %v10417_v45 = vld [vmem:[#allocation9 + $0xd8] sm:$0xff]  }
 0x494   :  { %v10414_v0 = vld [vmem:[#allocation9 + $0x90] sm:$0xff]  }
 0x495   :  { %v6463_v15 = vadd.f32 %v10481_v33, %v6458_v59  ;;  %v6459_v18 = vmax.f32 %v6449_v19, %v6454_v14  ;;  %v10418_v19 = vld [vmem:[#allocation9 + $0x98] sm:$0xff]   ;;  %v10419_v40 = vld [vmem:[#allocation9 + $0x70] sm:$0xff]   ;;  %v10421_v14 = vld [vmem:[#allocation9 + $0xe0] sm:$0xff]  }
 0x496   :  { %v10420_v59 = vld [vmem:[#allocation9 + $0x30] sm:$0xff]  }
 0x497   :  { %v6309_v63 = vpop.f32.mrb[64].mxu0  ;;  %v6464_v54 = vadd.f32 %v10481_v33, %v6459_v18  ;;  %v6431_v50 = vpop.f32.mrb[64].mxu1  ;;  %v6468_v28 = vmax.f32 %v6463_v15, 0.0  ;;  %v10423_v15 = vld [vmem:[#allocation9 + $0x78] sm:$0xff]  }
 0x498   :  { %v6311_v20 = vpop.f32.mrb[65].mxu0  ;;  %v6433_v22 = vpop.f32.mrb[65].mxu1  ;;  %v10424_v18 = vld [vmem:[#allocation9 + $0x38] sm:$0xff]  }
 0x499   :  { %v6450_v21 = vmax.f32 %v6309_v63, %v6311_v20  ;;  %v6313_v23 = vpop.f32.mrb[66].mxu0  ;;  %v6469_v29 = vmax.f32 %v6464_v54, 0.0  ;;  %v6455_v53 = vmax.f32 %v6431_v50, %v6433_v22  ;;  %v6435_v24 = vpop.f32.mrb[66].mxu1  ;;  %v10425_v63 = vld [vmem:[#allocation9 + $0xe8] sm:$0xff]   ;;  %v10427_v50 = vld [vmem:[#allocation9 + $0xf0] sm:$0xff]   ;;  %v10730_v20 = vmov 0.0  }
 0x49a   :  { %v6315_v31 = vpop.f32.mrb[67].mxu0  ;;  %v6437_v46 = vpop.f32.mrb[67].mxu1  ;;  %v10426_v54 = vld [vmem:[#allocation9 + $0xa8] sm:$0xff]   ;;  %v10430_v22 = vld [vmem:[#allocation9 + $0xf8] sm:$0xff]  }
 0x49b   :  { %v6451_v60 = vmax.f32 %v6313_v23, %v6315_v31  ;;  %v6460_v32 = vmax.f32 %v6450_v21, %v6455_v53  ;;  %v6456_v35 = vmax.f32 %v6435_v24, %v6437_v46  ;;  %v6473_v36 = vpack.c.bf16 %v6469_v29, %v6468_v28  ;;  %v10429_v21 = vld [vmem:[#allocation9 + $0xb0] sm:$0xff]   ;;  %v10432_v23 = vld [vmem:[#allocation9 + $0xb8] sm:$0xff]  }
 0x49d   :  { %v6465_v25 = vadd.f32 %v10481_v33, %v6460_v32  ;;  %v6461_v38 = vmax.f32 %v6451_v60, %v6456_v35  ;;  %7782 = vmatprep.mubr.bf16.mxu0 %v6473_v36  ;;  %7965 = vmatprep.mubr.bf16.mxu1 %v6473_v36  ;;  %v11262_v35 = vld [vmem:[#allocation7] ss:$0 sm:$0xff] }
 0x49e   :  { %7783 = vmatmul.mubr.bf16.vlgmr.msra.gmra.mrb[72].mxu0 %v11237_v7  ;;  %7966 = vmatmul.mubr.bf16.vlgmr.msra.gmra.mrb[72].mxu1 %v11237_v7 }
 0x49f   :  { %v6319_v41 = vpop.f32.mrb[68].mxu0  ;;  %v6466_v43 = vadd.f32 %v10481_v33, %v6461_v38  ;;  %v6441_v47 = vpop.f32.mrb[68].mxu1  ;;  %9755 = vmatpush3.bf16.msra.mxu0 %v10400_v44  ;;  %9777 = vmatpush3.bf16.msra.mxu1 %v10406_v42  ;;  %v6470_v62 = vmax.f32 %v6465_v25, 0.0 }
 0x4a0   :  { %v6321_v57 = vpop.f32.mrb[69].mxu0  ;;  %v6443_v61 = vpop.f32.mrb[69].mxu1  ;;  %9756 = vmatprep.subr.bf16.mxu0 %v10401_v37  ;;  %9778 = vmatprep.subr.bf16.mxu1 %v10409_v8 }
 0x4a1   :  { %v6452_v55 = vmax.f32 %v6319_v41, %v6321_v57  ;;  %v6323_v56 = vpop.f32.mrb[70].mxu0  ;;  %v6471_v4 = vmax.f32 %v6466_v43, 0.0  ;;  %v6457_v1 = vmax.f32 %v6441_v47, %v6443_v61  ;;  %v6445_v2 = vpop.f32.mrb[70].mxu1 }
 0x4a2   :  { %v6324_v3 = vpop.f32.mrb[71].mxu0  ;;  %v6446_v7 = vpop.f32.mrb[71].mxu1 }
 0x4a3   :  { %v6462_v5 = vmax.f32 %v6452_v55, %v6457_v1  ;;  %v6474_v6 = vpack.c.bf16 %v6471_v4, %v6470_v62  ;;  %9757 = vmatpush3.bf16.msra.mxu0 %v10402_v51  ;;  %9779 = vmatpush3.bf16.msra.mxu1 %v10410_v52 }
 0x4a4   :  { %9758 = vmatprep.subr.bf16.mxu0 %v10403_v58  ;;  %9780 = vmatprep.subr.bf16.mxu1 %v10413_v12 }
 0x4a5   :  { %v6467_v39 = vadd.f32 %v10481_v33, %v6462_v5  ;;  %7792 = vmatprep.mubr.bf16.mxu0 %v6474_v6  ;;  %7975 = vmatprep.mubr.bf16.mxu1 %v6474_v6  ;;  %v10422_v33 = vld [vmem:[#allocation9 + $0xa0] sm:$0xff]  }
 0x4a6   :  { %7793 = vmatmul.mubr.bf16.gmra.mrb[76].mxu0 %v11243_v48  ;;  %7976 = vmatmul.mubr.bf16.gmra.mrb[76].mxu1 %v11243_v48  ;;  %v10415_v48 = vld [vmem:[#allocation9 + $0x68] sm:$0xff]  }
 0x4a7   :  { %v6472_v16 = vmax.f32 %v6467_v39, 0.0  ;;  %9759 = vmatpush3.bf16.msra.mxu0 %v10404_v26  ;;  %9781 = vmatpush3.bf16.msra.mxu1 %v10414_v0 }
 0x4a8   :  { %9760 = vmatprep.subr.bf16.mxu0 %v10407_v27  ;;  %9782 = vmatprep.subr.bf16.mxu1 %v10417_v45  ;;  %v10428_v27 = vld [vmem:[#allocation9 + $0x100] sm:$0xff]  }
 0x4a9   :  { %v6475_v11 = vpack.c.bf16 %v6472_v16, %v6472_v16 }
 0x4ab   :  { %7802 = vmatprep.mubr.bf16.mxu0 %v6475_v11  ;;  %7985 = vmatprep.mubr.bf16.mxu1 %v6475_v11 }
 0x4ac   :  { %9761 = vmatpush3.bf16.msra.mxu0 %v10408_v49  ;;  %9783 = vmatpush3.bf16.msra.mxu1 %v10418_v19 }
 0x4ad   :  { %9762 = vmatprep.subr.bf16.mxu0 %v10411_v34  ;;  %9784 = vmatprep.subr.bf16.mxu1 %v10421_v14 }
 0x4ae   :  { %7803 = vmatmul.mubr.bf16.gmra.mrb[80].mxu0 %v5435_v30  ;;  %7986 = vmatmul.mubr.bf16.gmra.mrb[80].mxu1 %v5435_v30 }
 0x4b0   :  { %9763 = vmatpush3.bf16.msra.mxu0 %v10412_v10  ;;  %9785 = vmatpush3.bf16.msra.mxu1 %v10422_v33  ;;  %v10433_v33 = vld [vmem:[#allocation9 + $0x110] sm:$0xff]  }
 0x4b1   :  { %9764 = vmatprep.subr.bf16.mxu0 %v10415_v48  ;;  %9786 = vmatprep.subr.bf16.mxu1 %v10425_v63  ;;  %v10436_v63 = vld [vmem:[#allocation9 + $0x128] sm:$0xff]  }
 0x4b4   :  { %9765 = vmatpush3.bf16.msra.mxu0 %v10416_v13  ;;  %9787 = vmatpush3.bf16.msra.mxu1 %v10426_v54  ;;  %v10431_v13 = vld [vmem:[#allocation9 + $0x108] sm:$0xff]   ;;  %v10437_v54 = vld [vmem:[#allocation9 + $0x130] sm:$0xff]  }
 0x4b5   :  { %9766 = vmatprep.subr.bf16.mxu0 %v10419_v40  ;;  %9788 = vmatprep.subr.bf16.mxu1 %v10427_v50 }
 0x4b8   :  { %9767 = vmatpush3.bf16.msra.mxu0 %v10420_v59  ;;  %9789 = vmatpush3.bf16.msra.mxu1 %v10429_v21  ;;  %v10438_v21 = vld [vmem:[#allocation9 + $0x138] sm:$0xff]  }
 0x4b9   :  { %9768 = vmatprep.subr.bf16.mxu0 %v10423_v15  ;;  %9790 = vmatprep.subr.bf16.mxu1 %v10430_v22  ;;  %v10434_v15 = vld [vmem:[#allocation9 + $0x118] sm:$0xff]  }
 0x4bc   :  { %9769 = vmatpush3.bf16.msra.mxu0 %v10424_v18  ;;  %9791 = vmatpush3.bf16.msra.mxu1 %v10432_v23  ;;  %v10435_v18 = vld [vmem:[#allocation9 + $0x120] sm:$0xff]  }
 0x4bd   :  { %9825 = vmatprep.subr.bf16.mxu0 %v10730_v20  ;;  %9845 = vmatprep.subr.bf16.mxu1 %v10730_v20 }
 0x571   :  { %v7784_v28 = vpop.f32.mrb[72].mxu0  ;;  %v7967_v29 = vpop.f32.mrb[72].mxu1 }
 0x572   :  { %v7786_v53 = vpop.f32.mrb[73].mxu0  ;;  %v7969_v24 = vpop.f32.mrb[73].mxu1 }
 0x573   :  { %v7994_v31 = vmax.f32 %v7784_v28, %v7786_v53  ;;  %v7999_v60 = vmax.f32 %v7967_v29, %v7969_v24  ;;  %v7788_v46 = vpop.f32.mrb[74].mxu0  ;;  %v7971_v32 = vpop.f32.mrb[74].mxu1  ;;  %v10439_v28 = vld [vmem:[#allocation12] sm:$0xff]   ;;  %v10440_v29 = vld [vmem:[#allocation12 + $0x8] sm:$0xff]   ;;  %v10441_v53 = vld [vmem:[#allocation12 + $0x10] sm:$0xff]  }
 0x574   :  { %v7790_v36 = vpop.f32.mrb[75].mxu0  ;;  %v7973_v44 = vpop.f32.mrb[75].mxu1  ;;  %v10442_v24 = vld [vmem:[#allocation12 + $0x18] sm:$0xff]  }
 0x575   :  { %v8004_v42 = vmax.f32 %v7994_v31, %v7999_v60  ;;  %v7995_v37 = vmax.f32 %v7788_v46, %v7790_v36  ;;  %v8000_v8 = vmax.f32 %v7971_v32, %v7973_v44  ;;  %v10443_v31 = vld [vmem:[#allocation12 + $0x20] sm:$0xff]   ;;  %v10444_v60 = vld [vmem:[#allocation12 + $0x28] sm:$0xff]   ;;  %v10445_v46 = vld [vmem:[#allocation12 + $0x30] sm:$0xff]  }
 0x576   :  { %v10446_v32 = vld [vmem:[#allocation12 + $0x38] sm:$0xff]   ;;  %v10448_v36 = vld [vmem:[#allocation15 + $0x8] sm:$0xff]  }
 0x577   :  { %v8016_v25 = vadd.f32 %v11262_v35, %v8004_v42  ;;  %v8005_v38 = vmax.f32 %v7995_v37, %v8000_v8  ;;  %v10449_v44 = vld [vmem:[#allocation15 + $0x10] sm:$0xff]   ;;  %v10450_v42 = vld [vmem:[#allocation15 + $0x18] sm:$0xff]   ;;  %v10451_v37 = vld [vmem:[#allocation15 + $0x20] sm:$0xff]  }
 0x578   :  { %v10452_v8 = vld [vmem:[#allocation15 + $0x28] sm:$0xff]  }
 0x579   :  { %v8017_v41 = vadd.f32 %v11262_v35, %v8005_v38  ;;  %v7794_v43 = vpop.f32.mrb[76].mxu0  ;;  %v7977_v47 = vpop.f32.mrb[76].mxu1  ;;  %v8021_v52 = vmax.f32 %v8016_v25, 0.0 }
 0x57a   :  { %v7796_v57 = vpop.f32.mrb[77].mxu0  ;;  %v7979_v51 = vpop.f32.mrb[77].mxu1 }
 0x57b   :  { %v8022_v55 = vmax.f32 %v8017_v41, 0.0  ;;  %v7996_v61 = vmax.f32 %v7794_v43, %v7796_v57  ;;  %v8001_v56 = vmax.f32 %v7977_v47, %v7979_v51  ;;  %v7798_v58 = vpop.f32.mrb[78].mxu0  ;;  %v7981_v62 = vpop.f32.mrb[78].mxu1  ;;  %v9695_v57 = vld [vmem:[#allocation10] ss:$0 sm:$0xff] }
 0x57c   :  { %v7800_v4 = vpop.f32.mrb[79].mxu0  ;;  %v7983_v1 = vpop.f32.mrb[79].mxu1 }
 0x57d   :  { %v8006_v2 = vmax.f32 %v7996_v61, %v8001_v56  ;;  %v7997_v3 = vmax.f32 %v7798_v58, %v7800_v4  ;;  %v8002_v7 = vmax.f32 %v7981_v62, %v7983_v1  ;;  %v8026_v5 = vpack.c.bf16 %v8022_v55, %v8021_v52 }
 0x57f   :  { %v8018_v6 = vadd.f32 %v11262_v35, %v8006_v2  ;;  %v8007_v26 = vmax.f32 %v7997_v3, %v8002_v7  ;;  %v8030_v9 = vrot.slane %v8026_v5, 4 }
 0x581   :  { %v8019_v39 = vadd.f32 %v11262_v35, %v8007_v26  ;;  %v7804_v16 = vpop.f32.mrb[80].mxu0  ;;  %v7987_v17 = vpop.f32.mrb[80].mxu1  ;;  %8394 = vmatprep.mubr.bf16.mxu0 %v8030_v9  ;;  %v8023_v30 = vmax.f32 %v8018_v6, 0.0  ;;  %v10453_v26 = vld [vmem:[#allocation15 + $0x30] sm:$0xff]   ;;  %v10454_v9 = vld [vmem:[#allocation15 + $0x38] sm:$0xff]  }
 0x582   :  { %v7806_v49 = vpop.f32.mrb[81].mxu0  ;;  %v7989_v11 = vpop.f32.mrb[81].mxu1  ;;  %8395 = vmatmul.mubr.bf16.vlgmr.msra.gmra.mrb[84].mxu0 %v8026_v5 }
 0x583   :  { %v8024_v34 = vmax.f32 %v8019_v39, 0.0  ;;  %v7998_v10 = vmax.f32 %v7804_v16, %v7806_v49  ;;  %v8003_v12 = vmax.f32 %v7987_v17, %v7989_v11  ;;  %9826 = vmatpush3.bf16.msra.mxu0 %v10428_v27  ;;  %v7808_v0 = vpop.f32.mrb[82].mxu0  ;;  %v7991_v48 = vpop.f32.mrb[82].mxu1  ;;  %9841 = vmatprep.mubr.msk.bf16.mxu0 %vm10731_vm0, %v10730_v20  ;;  %v9736_v27 = vld [vmem:[#allocation13] ss:$0 sm:$0xff] }
 0x584   :  { %v7809_v45 = vpop.f32.mrb[83].mxu0  ;;  %v7992_v19 = vpop.f32.mrb[83].mxu1  ;;  %9827 = vmatprep.subr.bf16.mxu0 %v10730_v20 }
 0x585   :  { %v8008_v40 = vmax.f32 %v7998_v10, %v8003_v12  ;;  %v8027_v59 = vpack.c.bf16 %v8024_v34, %v8023_v30  ;;  %v9745_v10 = vld [vmem:[#allocation16] ss:$0 sm:$0xff] }
 0x587   :  { %9828 = vmatpush3.bf16.msra.mxu0 %v10431_v13  ;;  %v8033_v14 = vrot.slane %v8027_v59, 4  ;;  %v8020_v50 = vadd.f32 %v11262_v35, %v8008_v40  ;;  %v10447_v35 = vld [vmem:[#allocation15] sm:$0xff]  }
 0x588   :  { %9829 = vmatprep.subr.bf16.mxu0 %v10730_v20 }
 0x589   :  { %8434 = vmatprep.mubr.bf16.mxu1 %v8033_v14  ;;  %v8025_v22 = vmax.f32 %v8020_v50, 0.0 }
 0x58a   :  { %8435 = vmatmul.mubr.bf16.vlgmr.msra.gmra.mrb[84].mxu1 %v8027_v59 }
 0x58b   :  { %9830 = vmatpush3.bf16.msra.mxu0 %v10433_v33  ;;  %9861 = vmatprep.mubr.msk.bf16.mxu1 %vm10731_vm0, %v10730_v20  ;;  %v8028_v23 = vpack.c.bf16 %v8025_v22, %v8025_v22 }
 0x58c   :  { %9831 = vmatprep.subr.bf16.mxu0 %v10730_v20  ;;  %9846 = vmatpush3.bf16.msra.mxu1 %v10439_v28 }
 0x58d   :  { %9847 = vmatprep.subr.bf16.mxu1 %v10730_v20 }
 0x58f   :  { %9832 = vmatpush3.bf16.msra.mxu0 %v10434_v15 }
 0x590   :  { %9833 = vmatprep.subr.bf16.mxu0 %v10730_v20  ;;  %9848 = vmatpush3.bf16.msra.mxu1 %v10440_v29 }
 0x591   :  { %9849 = vmatprep.subr.bf16.mxu1 %v10730_v20 }
 0x593   :  { %9834 = vmatpush3.bf16.msra.mxu0 %v10435_v18 }
 0x594   :  { %9835 = vmatprep.subr.bf16.mxu0 %v10730_v20  ;;  %9850 = vmatpush3.bf16.msra.mxu1 %v10441_v53 }
 0x595   :  { %9851 = vmatprep.subr.bf16.mxu1 %v10730_v20 }
 0x597   :  { %9836 = vmatpush3.bf16.msra.mxu0 %v10436_v63 }
 0x598   :  { %9837 = vmatprep.subr.bf16.mxu0 %v10730_v20  ;;  %9852 = vmatpush3.bf16.msra.mxu1 %v10442_v24 }
 0x599   :  { %9853 = vmatprep.subr.bf16.mxu1 %v10730_v20 }
 0x59b   :  { %9838 = vmatpush3.bf16.msra.mxu0 %v10437_v54 }
 0x59c   :  { %9839 = vmatprep.subr.bf16.mxu0 %v10730_v20  ;;  %9854 = vmatpush3.bf16.msra.mxu1 %v10443_v31 }
 0x59d   :  { %9855 = vmatprep.subr.bf16.mxu1 %v10730_v20 }
 0x59f   :  { %9840 = vmatpush3.bf16.msra.mxu0 %v10438_v21 }
 0x5a0   :  { %9865 = vmatprep.subr.bf16.mxu0 %v10730_v20  ;;  %9856 = vmatpush3.bf16.msra.mxu1 %v10444_v60 }
 0x5a1   :  { %9857 = vmatprep.subr.bf16.mxu1 %v10730_v20 }
 0x5a2   :  { %9842 = vmatmul.mubr.bf16.vlgmr.msra.gmra.mrb[88].mxu0 %v8028_v23 }
 0x5a3   :  { %9881 = vmatprep.mubr.msk.bf16.mxu0 %vm10731_vm0, %v10730_v20  ;;  %9866 = vmatpush3.bf16.msra.mxu0 %v10447_v35 }
 0x5a4   :  { %9858 = vmatpush3.bf16.msra.mxu1 %v10445_v46  ;;  %9867 = vmatprep.subr.bf16.mxu0 %v10730_v20 }
 0x5a5   :  { %9859 = vmatprep.subr.bf16.mxu1 %v10730_v20 }
 0x5a7   :  { %9868 = vmatpush3.bf16.msra.mxu0 %v10448_v36 }
 0x5a8   :  { %9860 = vmatpush3.bf16.msra.mxu1 %v10446_v32  ;;  %9869 = vmatprep.subr.bf16.mxu0 %v10730_v20 }
 0x5ab   :  { %9870 = vmatpush3.bf16.msra.mxu0 %v10449_v44 }
 0x5ac   :  { %9871 = vmatprep.subr.bf16.mxu0 %v10730_v20 }
 0x5af   :  { %9872 = vmatpush3.bf16.msra.mxu0 %v10450_v42 }
 0x5b0   :  { %9873 = vmatprep.subr.bf16.mxu0 %v10730_v20 }
 0x5b3   :  { %9874 = vmatpush3.bf16.msra.mxu0 %v10451_v37 }
 0x5b4   :  { %9875 = vmatprep.subr.bf16.mxu0 %v10730_v20 }
 0x5b7   :  { %9876 = vmatpush3.bf16.msra.mxu0 %v10452_v8 }
 0x5b8   :  { %9877 = vmatprep.subr.bf16.mxu0 %v10730_v20 }
 0x5bb   :  { %9878 = vmatpush3.bf16.msra.mxu0 %v10453_v26 }
 0x5bc   :  { %9879 = vmatprep.subr.bf16.mxu0 %v10730_v20 }
 0x5bf   :  { %9880 = vmatpush3.bf16.msra.mxu0 %v10454_v9 }
 0x655   :  { %v9770_v25 = vpop.f32.mrb[84].mxu0 }
 0x656   :  { %v9771_v38 = vpop.f32.mrb[85].mxu0 }
 0x657   :  { %v9772_v41 = vadd.f32 %v9771_v38, %v9770_v25  ;;  %v9773_v43 = vpop.f32.mrb[86].mxu0 }
 0x658   :  { %v9774_v47 = vpop.f32.mrb[87].mxu0 }
 0x659   :  { %v8397_v55 = vadd.f32 %v9772_v41, %v9695_v57 }
 0x65d   :  { %v9792_v51 = vpop.f32.mrb[84].mxu1 }
 0x65e   :  { %v9793_v52 = vpop.f32.mrb[85].mxu1 }
 0x65f   :  { %v9794_v61 = vadd.f32 %v9793_v52, %v9792_v51  ;;  %v9795_v56 = vpop.f32.mrb[86].mxu1 }
 0x660   :  { %v9796_v58 = vpop.f32.mrb[87].mxu1 }
 0x661   :  { %v8437_v62 = vadd.f32 %v9794_v61, %v8397_v55 }
 0x675   :  { %v8476_v4 = vpop.f32.mrb[88].mxu0 }
 0x676   :  { %v8477_v1 = vadd.f32 %v8476_v4, %v8437_v62  ;;  %v9843_v2 = vpop.f32.mrb[89].mxu0 }
 0x677   :  { %v8479_v3 = vpop.f32.mrb[90].mxu0 }
 0x678   :  { %v8482_v7 = vmax.f32 %v8477_v1, 0.0  ;;  %v9844_v5 = vpop.f32.mrb[91].mxu0 }
 0x67a   :  { %v8483_v6 = vpack.c.bf16 %v8482_v7, %v8482_v7 }
 0x67c   :  { %9862 = vmatmul.mubr.bf16.vlgmr.msra.gmra.mrb[88].mxu1 %v8483_v6 }
 0x74f   :  { %v8589_v39 = vpop.f32.mrb[88].mxu1 }
 0x750   :  { %v8590_v16 = vadd.f32 %v9736_v27, %v8589_v39  ;;  %v9863_v17 = vpop.f32.mrb[89].mxu1 }
 0x751   :  { %v8592_v49 = vpop.f32.mrb[90].mxu1 }
 0x752   :  { %v8595_v11 = vmax.f32 %v8590_v16, 0.0  ;;  %v9864_v30 = vpop.f32.mrb[91].mxu1 }
 0x754   :  { %v8596_v34 = vpack.c.bf16 %v8595_v11, %v8595_v11 }
 0x756   :  { %9882 = vmatmul.mubr.bf16.vlgmr.msra.gmra.mrb[92].mxu0 %v8596_v34 }
 0x829   :  { %v8702_v12 = vpop.f32.mrb[92].mxu0 }
 0x82a   :  { %v8703_v0 = vadd.f32 %v9745_v10, %v8702_v12  ;;  %v9883_v48 = vpop.f32.mrb[93].mxu0 }
 0x82b   :  { %v8705_v13 = vpop.f32.mrb[94].mxu0 }
 0x82c   :  { %v8708_v45 = vmax.f32 %v8703_v0, 0.0  ;;  %v9884_v19 = vpop.f32.mrb[95].mxu0 }
 0x82e   :  { %v8709_v40 = vpack.c.bf16 %v8708_v45, %v8708_v45 }
 0x830   :  { %8710 = vst [vmem:[%s11311_s11] sm:$0xf] %v8709_v40 }
 0x831   :  { %8715 = vsyncpa [#allocation3], 1 }
 0x832   :  { %8716 = vsyncpa [#allocation5], 1 }
 0x833   :  { %8717 = vsyncpa [#allocation8], 1 }
 0x834   :  { %8718 = vsyncpa [#allocation11], 1 }
 0x835   :  { %8719 = vsyncpa [#allocation14], 1 }
 0x836   :  { %8720 = vsyncpa [#allocation17], 1 }

</bundles_post_ra>
